<compile_context>
chip_gen: v7x
topology: tpu7x:2x2x1
jax: 0.10.0
libtpu: 0.0.40
codegen_flags: <defaults>
</compile_context>

<pallas_src>
import functools
import math

import numpy as np

import jax
import jax.numpy as jnp
from jax.experimental import pallas as pl
from jax.experimental.pallas import tpu as pltpu


# ----------------------------------------------------------------------------
# Fused kernel: conv1(matmul) + conv2(roll+mask, single matmul) + CLS
# attention + MLP + fused policy/value head.  Single invocation, no grid.
# ----------------------------------------------------------------------------
def fused_kernel(x_im_ref, cmask_ref, w1c_ref, b1c_ref, w2c_ref, b2c_ref,
                 cls_ref, wq_ref, bq_ref, wkv_ref, bkv_ref, wo_ref, bo_ref,
                 wm1_ref, bm1_ref, wm2_ref, bm2_ref, wh_ref, bh_ref,
                 hmask_ref, hmaskt_ref, out_ref, *, B, H, W, num_heads):
    E = cls_ref.shape[1]
    nh = num_heads
    hd = E // nh
    HW = H * W
    N = B * HW
    scale = 1.0 / math.sqrt(hd)

    # ---- conv1: wrapper-side im2col -> single bf16 MXU matmul + ReLU -------
    h1 = jnp.dot(x_im_ref[...], w1c_ref[...],
                 preferred_element_type=jnp.float32)
    h1 = jnp.maximum(h1 + b1c_ref[...], 0.0)                  # (N, E) f32

    # ---- conv2: 9 rolled+masked taps -> lane concat -> one K=9E matmul -----
    # Shift by delta rows of the flat (B*HW) index; boundary (and cross-image)
    # wrap-around is zeroed by the precomputed per-tap spatial mask.
    cmask = cmask_ref[...]                                     # (N, 9) f32
    taps = []
    for j in range(9):
        dh, dw = divmod(j, 3)
        delta = (dh - 1) * W + (dw - 1)
        if delta == 0:
            t = h1
        else:
            t = pltpu.roll(h1, shift=(-delta) % N, axis=0)     # t[p] = h1[p+delta]
        taps.append((t * cmask[:, j:j + 1]).astype(jnp.bfloat16))
    x2 = jnp.concatenate(taps, axis=1)                         # (N, 9E) bf16
    h2 = jnp.dot(x2, w2c_ref[...], preferred_element_type=jnp.float32)
    h2 = jnp.maximum(h2 + b2c_ref[...], 0.0)                   # (N, E) f32

    # ---- multi-head attention, CLS query only ------------------------------
    cls = cls_ref[...].astype(jnp.bfloat16)                    # (1, E)
    q = (jnp.dot(cls, wq_ref[...], preferred_element_type=jnp.float32)
         + bq_ref[...]) * scale                                # (1, E)
    cls_kv = (jnp.dot(cls, wkv_ref[...], preferred_element_type=jnp.float32)
              + bkv_ref[...])                                  # (1, 2E)
    k_cls, v_cls = cls_kv[:, :E], cls_kv[:, E:]
    body_kv = (jnp.dot(h2.astype(jnp.bfloat16), wkv_ref[...],
                       preferred_element_type=jnp.float32)
               + bkv_ref[...])                                 # (N, 2E)
    k_body, v_body = body_kv[:, :E], body_kv[:, E:]

    # per-head scores via head-membership masks (no per-head lane slicing)
    hmask = hmask_ref[...]                                     # (E, nh) f32
    hmask_t = hmaskt_ref[...]                                  # (nh, E) f32
    s_cls = jnp.dot(k_cls * q, hmask,
                    preferred_element_type=jnp.float32)        # (1, nh)
    s_body = jnp.dot(k_body * q, hmask,
                     preferred_element_type=jnp.float32).reshape(B, HW, nh)

    s_cls3 = s_cls.reshape(1, 1, nh)
    m = jnp.maximum(jnp.max(s_body, axis=1, keepdims=True), s_cls3)  # (B,1,nh)
    e_body = jnp.exp(s_body - m)                               # (B, HW, nh)
    e_cls = jnp.exp(s_cls3 - m)                                # (B, 1, nh)
    denom = jnp.sum(e_body, axis=1, keepdims=True) + e_cls
    inv = pl.reciprocal(denom, approx=True)
    p_body = e_body * inv                                      # (B, HW, nh)
    p_cls = (e_cls * inv).reshape(B, nh)                       # (B, nh)

    # broadcast head probs over each head's lanes and weight V
    pb_e = jnp.dot(p_body.reshape(N, nh), hmask_t,
                   preferred_element_type=jnp.float32).reshape(B, HW, E)
    pc_e = jnp.dot(p_cls, hmask_t, preferred_element_type=jnp.float32)
    attn = jnp.sum(pb_e * v_body.reshape(B, HW, E), axis=1) + pc_e * v_cls

    attn_o = (jnp.dot(attn.astype(jnp.bfloat16), wo_ref[...],
                      preferred_element_type=jnp.float32) + bo_ref[...])  # (B,E)

    # ---- MLP + fused policy/value head (dropout = identity, eval mode) -----
    m1 = jnp.maximum(jnp.dot(attn_o.astype(jnp.bfloat16), wm1_ref[...],
                             preferred_element_type=jnp.float32)
                     + bm1_ref[...], 0.0)
    m2 = jnp.maximum(jnp.dot(m1.astype(jnp.bfloat16), wm2_ref[...],
                             preferred_element_type=jnp.float32)
                     + bm2_ref[...], 0.0)
    out_ref[...] = (jnp.dot(m2.astype(jnp.bfloat16), wh_ref[...],
                            preferred_element_type=jnp.float32)
                    + bh_ref[...])                             # (B, 128)


# ----------------------------------------------------------------------------
# One-time parameter preparation (weight fusion, bf16 cast, static masks).
# Call ONCE at parameter-load time; not part of the per-step forward path.
# ----------------------------------------------------------------------------
def prepare_params(params, *, batch_size, height, width, num_heads):
    E = params["conv1_w"].shape[-1]
    Cin = params["conv1_w"].shape[2]
    Hm = params["w1"].shape[1]
    A = params["wp"].shape[1]
    assert A + 1 <= 128, "fused head assumes num_actions + 1 <= 128"
    assert E % num_heads == 0
    HW = height * width
    N = batch_size * HW
    bf16, f32 = jnp.bfloat16, jnp.float32

    # conv1 im2col weight, K padded to 128 lanes
    k_pad = ((9 * Cin + 127) // 128) * 128
    w1c = jnp.zeros((k_pad, E), f32)
    w1c = w1c.at[:9 * Cin].set(params["conv1_w"].reshape(9 * Cin, E)).astype(bf16)
    # conv2 weight flattened to (9E, E), tap-major (dh, dw) row blocks
    w2c = params["conv2_w"].reshape(9 * E, E).astype(bf16)

    # fused K/V projection (body-token q is never used)
    wkv = jnp.concatenate([params["wk"], params["wv"]], axis=1).astype(bf16)
    bkv = jnp.concatenate([params["bk"], params["bv"]], axis=1).astype(f32)

    # fused, lane-dense policy+value head: columns [0:A]=policy, [A]=value
    n_out = 128
    wh = jnp.zeros((Hm, n_out), f32)
    wh = wh.at[:, :A].set(params["wp"]).at[:, A].set(params["wvh"][:, 0])
    bh = jnp.zeros((1, n_out), f32)
    bh = bh.at[:, :A].set(params["bp"]).at[:, A].set(params["bvh"][:, 0])

    # head-membership masks
    hd = E // num_heads
    lane = np.arange(E)
    hmask = (lane[:, None] // hd == np.arange(num_heads)[None, :]).astype(np.float32)
    hmask_t = np.ascontiguousarray(hmask.T)

    # per-tap spatial validity mask for the roll-based 3x3 conv shifts
    p = np.arange(N)
    r = (p // width) % height
    c = p % width
    cols = []
    for dh in range(3):
        for dw in range(3):
            rr, cc = r + dh - 1, c + dw - 1
            cols.append((rr >= 0) & (rr < height) & (cc >= 0) & (cc < width))
    cmask = np.stack(cols, axis=1).astype(np.float32)          # (N, 9)

    return dict(
        w1c=w1c, b1c=params["conv1_b"].astype(f32),
        w2c=w2c, b2c=params["conv2_b"].astype(f32),
        cls=params["cls_token"].reshape(1, E).astype(f32),
        wq=params["wq"].astype(bf16), bq=params["bq"].astype(f32),
        wkv=wkv, bkv=bkv,
        wo=params["wo"].astype(bf16), bo=params["bo"].astype(f32),
        wm1=params["w1"].astype(bf16), bm1=params["b1"].astype(f32),
        wm2=params["w2"].astype(bf16), bm2=params["b2"].astype(f32),
        wh=wh.astype(bf16), bh=bh,
        hmask=jnp.asarray(hmask), hmask_t=jnp.asarray(hmask_t),
        cmask=jnp.asarray(cmask),
    )


# ----------------------------------------------------------------------------
# Per-step forward: NCHW->NHWC + conv1 im2col (fused by XLA) + one pallas_call.
# ----------------------------------------------------------------------------
@functools.partial(jax.jit, static_argnames=("num_heads", "num_actions"))
def snake_policy_forward(x_nchw, prep, *, num_heads, num_actions):
    x = jnp.transpose(x_nchw, (0, 2, 3, 1)).astype(jnp.float32)    # NHWC
    B, H, W, Cin = x.shape
    HW = H * W
    k_pad = prep["w1c"].shape[0]

    # conv1 im2col on the tiny raw input (fused with the transpose by XLA)
    xp = jnp.pad(x, ((0, 0), (1, 1), (1, 1), (0, 0)))
    patches = [xp[:, dh:dh + H, dw:dw + W, :]
               for dh in range(3) for dw in range(3)]
    x_im = jnp.concatenate(patches, axis=-1).reshape(B * HW, 9 * Cin)
    x_im = jnp.pad(x_im, ((0, 0), (0, k_pad - 9 * Cin))).astype(jnp.bfloat16)

    kernel = functools.partial(fused_kernel, B=B, H=H, W=W,
                               num_heads=num_heads)
    out = pl.pallas_call(
        kernel,
        out_shape=jax.ShapeDtypeStruct((B, 128), jnp.float32),
    )(x_im, prep["cmask"], prep["w1c"], prep["b1c"], prep["w2c"], prep["b2c"],
      prep["cls"], prep["wq"], prep["bq"], prep["wkv"], prep["bkv"],
      prep["wo"], prep["bo"], prep["wm1"], prep["bm1"], prep["wm2"],
      prep["bm2"], prep["wh"], prep["bh"], prep["hmask"], prep["hmask_t"])

    return out[:, :num_actions], out[:, num_actions]


# ----------------------------------------------------------------------------
# Deterministic parameter initialization (shapes mirror the PyTorch module).
# ----------------------------------------------------------------------------
def init_params(key, *, in_channels, cnn_channels, mlp_hidden, num_actions):
    ks = jax.random.split(key, 24)
    n = lambda k, shape, std=0.02: jax.random.normal(k, shape, jnp.float32) * std
    E, Hm = cnn_channels, mlp_hidden
    return dict(
        conv1_w=n(ks[0], (3, 3, in_channels, E), 0.05),
        conv1_b=n(ks[1], (1, E)),
        conv2_w=n(ks[2], (3, 3, E, E), 0.02),
        conv2_b=n(ks[3], (1, E)),
        cls_token=n(ks[4], (1, 1, E), 0.02),
        wq=n(ks[5], (E, E)), bq=n(ks[6], (1, E)),
        wk=n(ks[7], (E, E)), bk=n(ks[8], (1, E)),
        wv=n(ks[9], (E, E)), bv=n(ks[10], (1, E)),
        wo=n(ks[11], (E, E)), bo=n(ks[12], (1, E)),
        w1=n(ks[13], (E, Hm)), b1=n(ks[14], (1, Hm)),
        w2=n(ks[15], (Hm, Hm)), b2=n(ks[16], (1, Hm)),
        wp=n(ks[17], (Hm, num_actions)), bp=n(ks[18], (1, num_actions)),
        wvh=n(ks[19], (Hm, 1)), bvh=n(ks[20], (1, 1)),
    )


# ----------------------------------------------------------------------------
# Pure-JAX f32 reference (same math, no Pallas) for a correctness check.
# ----------------------------------------------------------------------------
def reference_forward(x_nchw, params, *, num_heads=4):
    x = jnp.transpose(x_nchw, (0, 2, 3, 1)).astype(jnp.float32)

    def conv(x, w, b):
        B, H, W, _ = x.shape
        xp = jnp.pad(x, ((0, 0), (1, 1), (1, 1), (0, 0)))
        out = jnp.zeros((B, H, W, w.shape[-1]), jnp.float32)
        for dh in range(3):
            for dw in range(3):
                out = out + jnp.einsum("bhwc,cd->bhwd",
                                       xp[:, dh:dh + H, dw:dw + W, :], w[dh, dw])
        return jax.nn.relu(out + b.reshape(1, 1, 1, -1))

    h = conv(x, params["conv1_w"], params["conv1_b"])
    h = conv(h, params["conv2_w"], params["conv2_b"])
    B, H, W, E = h.shape
    seq = jnp.concatenate(
        [jnp.broadcast_to(params["cls_token"], (B, 1, E)),
         h.reshape(B, H * W, E)], axis=1)
    q = seq[:, 0:1, :] @ params["wq"] + params["bq"]
    k = seq @ params["wk"] + params["bk"]
    v = seq @ params["wv"] + params["bv"]
    hd = E // num_heads
    outs = []
    for hh in range(num_heads):
        qh = q[:, :, hh * hd:(hh + 1) * hd]
        kh = k[:, :, hh * hd:(hh + 1) * hd]
        vh = v[:, :, hh * hd:(hh + 1) * hd]
        s = jnp.einsum("bqd,bkd->bqk", qh, kh) / math.sqrt(hd)
        p = jax.nn.softmax(s, axis=-1)
        outs.append(jnp.einsum("bqk,bkd->bqd", p, vh))
    attn = (jnp.concatenate(outs, axis=-1) @ params["wo"] + params["bo"])[:, 0]
    h1 = jax.nn.relu(attn @ params["w1"] + params["b1"])
    h2 = jax.nn.relu(h1 @ params["w2"] + params["b2"])
    pol = h2 @ params["wp"] + params["bp"]
    val = (h2 @ params["wvh"] + params["bvh"])[:, 0]
    return pol, val


if __name__ == "__main__":
    B, Cin, H, W = 2, 5, 8, 8
    num_actions, cnn_channels, mlp_hidden, num_heads = 4, 128, 256, 4

    key = jax.random.PRNGKey(0)
    kx, kp = jax.random.split(key)
    x = jax.random.normal(kx, (B, Cin, H, W), jnp.float32)
    params = init_params(kp, in_channels=Cin, cnn_channels=cnn_channels,
                         mlp_hidden=mlp_hidden, num_actions=num_actions)

    # One-time prep (weight fusion, bf16 cast, static masks) — not per-step.
    prep = prepare_params(params, batch_size=B, height=H, width=W,
                          num_heads=num_heads)
    prep = jax.block_until_ready(prep)

    pol, val = snake_policy_forward(x, prep, num_heads=num_heads,
                                    num_actions=num_actions)
    pol, val = jax.block_until_ready((pol, val))

    assert pol.shape == (B, num_actions) and val.shape == (B,)
    pol_ref, val_ref = reference_forward(x, params, num_heads=num_heads)
    # bf16 matmul operands + approx reciprocal => slightly looser tolerance.
    assert jnp.allclose(pol, pol_ref, atol=2e-2, rtol=2e-2)
    assert jnp.allclose(val, val_ref, atol=2e-2, rtol=2e-2)

    print("KERNEL_OK")
</pallas_src>

<mosaic_0001>
module attributes {stable_mosaic.version = 11 : i64} {
  func.func @fused_kernel(%arg0: memref<128x128xbf16, #tpu.memory_space<vmem>>, %arg1: memref<128x9xf32, #tpu.memory_space<vmem>>, %arg2: memref<128x128xbf16, #tpu.memory_space<vmem>>, %arg3: memref<1x128xf32, #tpu.memory_space<vmem>>, %arg4: memref<1152x128xbf16, #tpu.memory_space<vmem>>, %arg5: memref<1x128xf32, #tpu.memory_space<vmem>>, %arg6: memref<1x128xf32, #tpu.memory_space<vmem>>, %arg7: memref<128x128xbf16, #tpu.memory_space<vmem>>, %arg8: memref<1x128xf32, #tpu.memory_space<vmem>>, %arg9: memref<128x256xbf16, #tpu.memory_space<vmem>>, %arg10: memref<1x256xf32, #tpu.memory_space<vmem>>, %arg11: memref<128x128xbf16, #tpu.memory_space<vmem>>, %arg12: memref<1x128xf32, #tpu.memory_space<vmem>>, %arg13: memref<128x256xbf16, #tpu.memory_space<vmem>>, %arg14: memref<1x256xf32, #tpu.memory_space<vmem>>, %arg15: memref<256x256xbf16, #tpu.memory_space<vmem>>, %arg16: memref<1x256xf32, #tpu.memory_space<vmem>>, %arg17: memref<256x128xbf16, #tpu.memory_space<vmem>>, %arg18: memref<1x128xf32, #tpu.memory_space<vmem>>, %arg19: memref<128x4xf32, #tpu.memory_space<vmem>>, %arg20: memref<4x128xf32, #tpu.memory_space<vmem>>, %arg21: memref<2x128xf32, #tpu.memory_space<vmem>>) attributes {dimension_semantics = [], scalar_prefetch = 0 : i64, scratch_operands = 0 : i64, tpu.core_type = #tpu.core_type<tc>} {
    %c0 = arith.constant 0 : index
    %c0_0 = arith.constant 0 : index
    %0 = vector.load %arg0[%c0, %c0_0] : memref<128x128xbf16, #tpu.memory_space<vmem>>, vector<128x128xbf16>
    %c0_1 = arith.constant 0 : index
    %c0_2 = arith.constant 0 : index
    %1 = vector.load %arg2[%c0_1, %c0_2] : memref<128x128xbf16, #tpu.memory_space<vmem>>, vector<128x128xbf16>
    %cst = arith.constant dense<0.000000e+00> : vector<128x128xf32>
    %2 = tpu.matmul %0, %1, %cst {dimension_numbers = #tpu.dot_dimension_numbers<[1], [0], [0], [1], [0, 0, 1, 1], [], []>} : vector<128x128xbf16>, vector<128x128xbf16>, vector<128x128xf32> -> vector<128x128xf32>
    %c0_3 = arith.constant 0 : index
    %c0_4 = arith.constant 0 : index
    %3 = vector.load %arg3[%c0_3, %c0_4] : memref<1x128xf32, #tpu.memory_space<vmem>>, vector<1x128xf32>
    %4 = vector.broadcast %3 : vector<1x128xf32> to vector<128x128xf32>
    %5 = arith.addf %2, %4 : vector<128x128xf32>
    %cst_5 = arith.constant 0.000000e+00 : f32
    %6 = vector.broadcast %cst_5 : f32 to vector<128x128xf32>
    %7 = arith.maximumf %5, %6 : vector<128x128xf32>
    %c0_6 = arith.constant 0 : index
    %c0_7 = arith.constant 0 : index
    %8 = vector.load %arg1[%c0_6, %c0_7] : memref<128x9xf32, #tpu.memory_space<vmem>>, vector<128x9xf32>
    %c9_i32 = arith.constant 9 : i32
    %9 = tpu.dynamic_rotate %7 by %c9_i32 dim 0 : vector<128x128xf32>, i32 -> vector<128x128xf32>
    %10 = vector.extract_strided_slice %8 {offsets = [0, 0], sizes = [128, 1], strides = [1, 1]} : vector<128x9xf32> to vector<128x1xf32>
    %11 = vector.broadcast %10 : vector<128x1xf32> to vector<128x128xf32>
    %12 = arith.mulf %9, %11 : vector<128x128xf32>
    %13 = arith.truncf %12 : vector<128x128xf32> to vector<128x128xbf16>
    %c8_i32 = arith.constant 8 : i32
    %14 = tpu.dynamic_rotate %7 by %c8_i32 dim 0 : vector<128x128xf32>, i32 -> vector<128x128xf32>
    %15 = vector.extract_strided_slice %8 {offsets = [0, 1], sizes = [128, 1], strides = [1, 1]} : vector<128x9xf32> to vector<128x1xf32>
    %16 = vector.broadcast %15 : vector<128x1xf32> to vector<128x128xf32>
    %17 = arith.mulf %14, %16 : vector<128x128xf32>
    %18 = arith.truncf %17 : vector<128x128xf32> to vector<128x128xbf16>
    %c7_i32 = arith.constant 7 : i32
    %19 = tpu.dynamic_rotate %7 by %c7_i32 dim 0 : vector<128x128xf32>, i32 -> vector<128x128xf32>
    %20 = vector.extract_strided_slice %8 {offsets = [0, 2], sizes = [128, 1], strides = [1, 1]} : vector<128x9xf32> to vector<128x1xf32>
    %21 = vector.broadcast %20 : vector<128x1xf32> to vector<128x128xf32>
    %22 = arith.mulf %19, %21 : vector<128x128xf32>
    %23 = arith.truncf %22 : vector<128x128xf32> to vector<128x128xbf16>
    %c1_i32 = arith.constant 1 : i32
    %24 = tpu.dynamic_rotate %7 by %c1_i32 dim 0 : vector<128x128xf32>, i32 -> vector<128x128xf32>
    %25 = vector.extract_strided_slice %8 {offsets = [0, 3], sizes = [128, 1], strides = [1, 1]} : vector<128x9xf32> to vector<128x1xf32>
    %26 = vector.broadcast %25 : vector<128x1xf32> to vector<128x128xf32>
    %27 = arith.mulf %24, %26 : vector<128x128xf32>
    %28 = arith.truncf %27 : vector<128x128xf32> to vector<128x128xbf16>
    %29 = vector.extract_strided_slice %8 {offsets = [0, 4], sizes = [128, 1], strides = [1, 1]} : vector<128x9xf32> to vector<128x1xf32>
    %30 = vector.broadcast %29 : vector<128x1xf32> to vector<128x128xf32>
    %31 = arith.mulf %7, %30 : vector<128x128xf32>
    %32 = arith.truncf %31 : vector<128x128xf32> to vector<128x128xbf16>
    %c127_i32 = arith.constant 127 : i32
    %33 = tpu.dynamic_rotate %7 by %c127_i32 dim 0 : vector<128x128xf32>, i32 -> vector<128x128xf32>
    %34 = vector.extract_strided_slice %8 {offsets = [0, 5], sizes = [128, 1], strides = [1, 1]} : vector<128x9xf32> to vector<128x1xf32>
    %35 = vector.broadcast %34 : vector<128x1xf32> to vector<128x128xf32>
    %36 = arith.mulf %33, %35 : vector<128x128xf32>
    %37 = arith.truncf %36 : vector<128x128xf32> to vector<128x128xbf16>
    %c121_i32 = arith.constant 121 : i32
    %38 = tpu.dynamic_rotate %7 by %c121_i32 dim 0 : vector<128x128xf32>, i32 -> vector<128x128xf32>
    %39 = vector.extract_strided_slice %8 {offsets = [0, 6], sizes = [128, 1], strides = [1, 1]} : vector<128x9xf32> to vector<128x1xf32>
    %40 = vector.broadcast %39 : vector<128x1xf32> to vector<128x128xf32>
    %41 = arith.mulf %38, %40 : vector<128x128xf32>
    %42 = arith.truncf %41 : vector<128x128xf32> to vector<128x128xbf16>
    %c120_i32 = arith.constant 120 : i32
    %43 = tpu.dynamic_rotate %7 by %c120_i32 dim 0 : vector<128x128xf32>, i32 -> vector<128x128xf32>
    %44 = vector.extract_strided_slice %8 {offsets = [0, 7], sizes = [128, 1], strides = [1, 1]} : vector<128x9xf32> to vector<128x1xf32>
    %45 = vector.broadcast %44 : vector<128x1xf32> to vector<128x128xf32>
    %46 = arith.mulf %43, %45 : vector<128x128xf32>
    %47 = arith.truncf %46 : vector<128x128xf32> to vector<128x128xbf16>
    %c119_i32 = arith.constant 119 : i32
    %48 = tpu.dynamic_rotate %7 by %c119_i32 dim 0 : vector<128x128xf32>, i32 -> vector<128x128xf32>
    %49 = vector.extract_strided_slice %8 {offsets = [0, 8], sizes = [128, 1], strides = [1, 1]} : vector<128x9xf32> to vector<128x1xf32>
    %50 = vector.broadcast %49 : vector<128x1xf32> to vector<128x128xf32>
    %51 = arith.mulf %48, %50 : vector<128x128xf32>
    %52 = arith.truncf %51 : vector<128x128xf32> to vector<128x128xbf16>
    %53 = tpu.concatenate %13, %18, %23, %28, %32, %37, %42, %47, %52 in 1 : vector<128x128xbf16>, vector<128x128xbf16>, vector<128x128xbf16>, vector<128x128xbf16>, vector<128x128xbf16>, vector<128x128xbf16>, vector<128x128xbf16>, vector<128x128xbf16>, vector<128x128xbf16> -> vector<128x1152xbf16>
    %c0_8 = arith.constant 0 : index
    %c0_9 = arith.constant 0 : index
    %54 = vector.load %arg4[%c0_8, %c0_9] : memref<1152x128xbf16, #tpu.memory_space<vmem>>, vector<1152x128xbf16>
    %cst_10 = arith.constant dense<0.000000e+00> : vector<128x128xf32>
    %55 = tpu.matmul %53, %54, %cst_10 {dimension_numbers = #tpu.dot_dimension_numbers<[1], [0], [0], [1], [0, 0, 1, 1], [], []>} : vector<128x1152xbf16>, vector<1152x128xbf16>, vector<128x128xf32> -> vector<128x128xf32>
    %c0_11 = arith.constant 0 : index
    %c0_12 = arith.constant 0 : index
    %56 = vector.load %arg5[%c0_11, %c0_12] : memref<1x128xf32, #tpu.memory_space<vmem>>, vector<1x128xf32>
    %57 = vector.broadcast %56 : vector<1x128xf32> to vector<128x128xf32>
    %58 = arith.addf %55, %57 : vector<128x128xf32>
    %cst_13 = arith.constant 0.000000e+00 : f32
    %59 = vector.broadcast %cst_13 : f32 to vector<128x128xf32>
    %60 = arith.maximumf %58, %59 : vector<128x128xf32>
    %c0_14 = arith.constant 0 : index
    %c0_15 = arith.constant 0 : index
    %61 = vector.load %arg6[%c0_14, %c0_15] : memref<1x128xf32, #tpu.memory_space<vmem>>, vector<1x128xf32>
    %62 = arith.truncf %61 : vector<1x128xf32> to vector<1x128xbf16>
    %c0_16 = arith.constant 0 : index
    %c0_17 = arith.constant 0 : index
    %63 = vector.load %arg7[%c0_16, %c0_17] : memref<128x128xbf16, #tpu.memory_space<vmem>>, vector<128x128xbf16>
    %cst_18 = arith.constant dense<0.000000e+00> : vector<1x128xf32>
    %64 = tpu.matmul %62, %63, %cst_18 {dimension_numbers = #tpu.dot_dimension_numbers<[1], [0], [0], [1], [0, 0, 1, 1], [], []>} : vector<1x128xbf16>, vector<128x128xbf16>, vector<1x128xf32> -> vector<1x128xf32>
    %c0_19 = arith.constant 0 : index
    %c0_20 = arith.constant 0 : index
    %65 = vector.load %arg8[%c0_19, %c0_20] : memref<1x128xf32, #tpu.memory_space<vmem>>, vector<1x128xf32>
    %66 = arith.addf %64, %65 : vector<1x128xf32>
    %cst_21 = arith.constant 0.176776692 : f32
    %67 = vector.broadcast %cst_21 : f32 to vector<1x128xf32>
    %68 = arith.mulf %66, %67 : vector<1x128xf32>
    %c0_22 = arith.constant 0 : index
    %c0_23 = arith.constant 0 : index
    %69 = vector.load %arg9[%c0_22, %c0_23] : memref<128x256xbf16, #tpu.memory_space<vmem>>, vector<128x256xbf16>
    %cst_24 = arith.constant dense<0.000000e+00> : vector<1x256xf32>
    %70 = tpu.matmul %62, %69, %cst_24 {dimension_numbers = #tpu.dot_dimension_numbers<[1], [0], [0], [1], [0, 0, 1, 1], [], []>} : vector<1x128xbf16>, vector<128x256xbf16>, vector<1x256xf32> -> vector<1x256xf32>
    %c0_25 = arith.constant 0 : index
    %c0_26 = arith.constant 0 : index
    %71 = vector.load %arg10[%c0_25, %c0_26] : memref<1x256xf32, #tpu.memory_space<vmem>>, vector<1x256xf32>
    %72 = arith.addf %70, %71 : vector<1x256xf32>
    %73 = vector.extract_strided_slice %72 {offsets = [0, 0], sizes = [1, 128], strides = [1, 1]} : vector<1x256xf32> to vector<1x128xf32>
    %74 = vector.extract_strided_slice %72 {offsets = [0, 128], sizes = [1, 128], strides = [1, 1]} : vector<1x256xf32> to vector<1x128xf32>
    %75 = arith.truncf %60 : vector<128x128xf32> to vector<128x128xbf16>
    %c0_27 = arith.constant 0 : index
    %c0_28 = arith.constant 0 : index
    %76 = vector.load %arg9[%c0_27, %c0_28] : memref<128x256xbf16, #tpu.memory_space<vmem>>, vector<128x256xbf16>
    %cst_29 = arith.constant dense<0.000000e+00> : vector<128x256xf32>
    %77 = tpu.matmul %75, %76, %cst_29 {dimension_numbers = #tpu.dot_dimension_numbers<[1], [0], [0], [1], [0, 0, 1, 1], [], []>} : vector<128x128xbf16>, vector<128x256xbf16>, vector<128x256xf32> -> vector<128x256xf32>
    %c0_30 = arith.constant 0 : index
    %c0_31 = arith.constant 0 : index
    %78 = vector.load %arg10[%c0_30, %c0_31] : memref<1x256xf32, #tpu.memory_space<vmem>>, vector<1x256xf32>
    %79 = vector.broadcast %78 : vector<1x256xf32> to vector<128x256xf32>
    %80 = arith.addf %77, %79 : vector<128x256xf32>
    %81 = vector.extract_strided_slice %80 {offsets = [0, 0], sizes = [128, 128], strides = [1, 1]} : vector<128x256xf32> to vector<128x128xf32>
    %82 = vector.extract_strided_slice %80 {offsets = [0, 128], sizes = [128, 128], strides = [1, 1]} : vector<128x256xf32> to vector<128x128xf32>
    %c0_32 = arith.constant 0 : index
    %c0_33 = arith.constant 0 : index
    %83 = vector.load %arg19[%c0_32, %c0_33] : memref<128x4xf32, #tpu.memory_space<vmem>>, vector<128x4xf32>
    %c0_34 = arith.constant 0 : index
    %c0_35 = arith.constant 0 : index
    %84 = vector.load %arg20[%c0_34, %c0_35] : memref<4x128xf32, #tpu.memory_space<vmem>>, vector<4x128xf32>
    %85 = arith.mulf %73, %68 : vector<1x128xf32>
    %cst_36 = arith.constant dense<0.000000e+00> : vector<1x4xf32>
    %86 = tpu.matmul %85, %83, %cst_36 {dimension_numbers = #tpu.dot_dimension_numbers<[1], [0], [0], [1], [0, 0, 1, 1], [], []>} : vector<1x128xf32>, vector<128x4xf32>, vector<1x4xf32> -> vector<1x4xf32>
    %87 = vector.broadcast %68 : vector<1x128xf32> to vector<128x128xf32>
    %88 = arith.mulf %81, %87 : vector<128x128xf32>
    %cst_37 = arith.constant dense<0.000000e+00> : vector<128x4xf32>
    %89 = tpu.matmul %88, %83, %cst_37 {dimension_numbers = #tpu.dot_dimension_numbers<[1], [0], [0], [1], [0, 0, 1, 1], [], []>} : vector<128x128xf32>, vector<128x4xf32>, vector<128x4xf32> -> vector<128x4xf32>
    %90 = vector.shape_cast %89 : vector<128x4xf32> to vector<2x64x4xf32>
    %91 = vector.shape_cast %86 : vector<1x4xf32> to vector<1x1x4xf32>
    %cst_38 = arith.constant dense<0xFF800000> : vector<2x4xf32>
    %92 = vector.multi_reduction <maximumf>, %90, %cst_38 [1] : vector<2x64x4xf32> to vector<2x4xf32>
    %93 = vector.shape_cast %92 : vector<2x4xf32> to vector<2x1x4xf32>
    %94 = vector.broadcast %91 : vector<1x1x4xf32> to vector<2x1x4xf32>
    %95 = arith.maximumf %93, %94 : vector<2x1x4xf32>
    %96 = vector.broadcast %95 : vector<2x1x4xf32> to vector<2x64x4xf32>
    %97 = arith.subf %90, %96 : vector<2x64x4xf32>
    %98 = math.exp %97 : vector<2x64x4xf32>
    %99 = vector.broadcast %91 : vector<1x1x4xf32> to vector<2x1x4xf32>
    %100 = arith.subf %99, %95 : vector<2x1x4xf32>
    %101 = math.exp %100 : vector<2x1x4xf32>
    %cst_39 = arith.constant dense<0.000000e+00> : vector<2x4xf32>
    %102 = vector.multi_reduction <add>, %98, %cst_39 [1] : vector<2x64x4xf32> to vector<2x4xf32>
    %103 = vector.shape_cast %102 : vector<2x4xf32> to vector<2x1x4xf32>
    %104 = arith.addf %103, %101 : vector<2x1x4xf32>
    %105 = tpu.reciprocal %104 {approx = true} : vector<2x1x4xf32> -> vector<2x1x4xf32>
    %106 = vector.broadcast %105 : vector<2x1x4xf32> to vector<2x64x4xf32>
    %107 = arith.mulf %98, %106 : vector<2x64x4xf32>
    %108 = arith.mulf %101, %105 : vector<2x1x4xf32>
    %109 = vector.shape_cast %108 : vector<2x1x4xf32> to vector<2x4xf32>
    %110 = vector.shape_cast %107 : vector<2x64x4xf32> to vector<128x4xf32>
    %cst_40 = arith.constant dense<0.000000e+00> : vector<128x128xf32>
    %111 = tpu.matmul %110, %84, %cst_40 {dimension_numbers = #tpu.dot_dimension_numbers<[1], [0], [0], [1], [0, 0, 1, 1], [], []>} : vector<128x4xf32>, vector<4x128xf32>, vector<128x128xf32> -> vector<128x128xf32>
    %112 = vector.shape_cast %111 : vector<128x128xf32> to vector<2x64x128xf32>
    %cst_41 = arith.constant dense<0.000000e+00> : vector<2x128xf32>
    %113 = tpu.matmul %109, %84, %cst_41 {dimension_numbers = #tpu.dot_dimension_numbers<[1], [0], [0], [1], [0, 0, 1, 1], [], []>} : vector<2x4xf32>, vector<4x128xf32>, vector<2x128xf32> -> vector<2x128xf32>
    %114 = vector.shape_cast %82 : vector<128x128xf32> to vector<2x64x128xf32>
    %115 = arith.mulf %112, %114 : vector<2x64x128xf32>
    %cst_42 = arith.constant dense<0.000000e+00> : vector<2x128xf32>
    %116 = vector.multi_reduction <add>, %115, %cst_42 [1] : vector<2x64x128xf32> to vector<2x128xf32>
    %117 = vector.broadcast %74 : vector<1x128xf32> to vector<2x128xf32>
    %118 = arith.mulf %113, %117 : vector<2x128xf32>
    %119 = arith.addf %116, %118 : vector<2x128xf32>
    %120 = arith.truncf %119 : vector<2x128xf32> to vector<2x128xbf16>
    %c0_43 = arith.constant 0 : index
    %c0_44 = arith.constant 0 : index
    %121 = vector.load %arg11[%c0_43, %c0_44] : memref<128x128xbf16, #tpu.memory_space<vmem>>, vector<128x128xbf16>
    %cst_45 = arith.constant dense<0.000000e+00> : vector<2x128xf32>
    %122 = tpu.matmul %120, %121, %cst_45 {dimension_numbers = #tpu.dot_dimension_numbers<[1], [0], [0], [1], [0, 0, 1, 1], [], []>} : vector<2x128xbf16>, vector<128x128xbf16>, vector<2x128xf32> -> vector<2x128xf32>
    %c0_46 = arith.constant 0 : index
    %c0_47 = arith.constant 0 : index
    %123 = vector.load %arg12[%c0_46, %c0_47] : memref<1x128xf32, #tpu.memory_space<vmem>>, vector<1x128xf32>
    %124 = vector.broadcast %123 : vector<1x128xf32> to vector<2x128xf32>
    %125 = arith.addf %122, %124 : vector<2x128xf32>
    %126 = arith.truncf %125 : vector<2x128xf32> to vector<2x128xbf16>
    %c0_48 = arith.constant 0 : index
    %c0_49 = arith.constant 0 : index
    %127 = vector.load %arg13[%c0_48, %c0_49] : memref<128x256xbf16, #tpu.memory_space<vmem>>, vector<128x256xbf16>
    %cst_50 = arith.constant dense<0.000000e+00> : vector<2x256xf32>
    %128 = tpu.matmul %126, %127, %cst_50 {dimension_numbers = #tpu.dot_dimension_numbers<[1], [0], [0], [1], [0, 0, 1, 1], [], []>} : vector<2x128xbf16>, vector<128x256xbf16>, vector<2x256xf32> -> vector<2x256xf32>
    %c0_51 = arith.constant 0 : index
    %c0_52 = arith.constant 0 : index
    %129 = vector.load %arg14[%c0_51, %c0_52] : memref<1x256xf32, #tpu.memory_space<vmem>>, vector<1x256xf32>
    %130 = vector.broadcast %129 : vector<1x256xf32> to vector<2x256xf32>
    %131 = arith.addf %128, %130 : vector<2x256xf32>
    %cst_53 = arith.constant 0.000000e+00 : f32
    %132 = vector.broadcast %cst_53 : f32 to vector<2x256xf32>
    %133 = arith.maximumf %131, %132 : vector<2x256xf32>
    %134 = arith.truncf %133 : vector<2x256xf32> to vector<2x256xbf16>
    %c0_54 = arith.constant 0 : index
    %c0_55 = arith.constant 0 : index
    %135 = vector.load %arg15[%c0_54, %c0_55] : memref<256x256xbf16, #tpu.memory_space<vmem>>, vector<256x256xbf16>
    %cst_56 = arith.constant dense<0.000000e+00> : vector<2x256xf32>
    %136 = tpu.matmul %134, %135, %cst_56 {dimension_numbers = #tpu.dot_dimension_numbers<[1], [0], [0], [1], [0, 0, 1, 1], [], []>} : vector<2x256xbf16>, vector<256x256xbf16>, vector<2x256xf32> -> vector<2x256xf32>
    %c0_57 = arith.constant 0 : index
    %c0_58 = arith.constant 0 : index
    %137 = vector.load %arg16[%c0_57, %c0_58] : memref<1x256xf32, #tpu.memory_space<vmem>>, vector<1x256xf32>
    %138 = vector.broadcast %137 : vector<1x256xf32> to vector<2x256xf32>
    %139 = arith.addf %136, %138 : vector<2x256xf32>
    %cst_59 = arith.constant 0.000000e+00 : f32
    %140 = vector.broadcast %cst_59 : f32 to vector<2x256xf32>
    %141 = arith.maximumf %139, %140 : vector<2x256xf32>
    %142 = arith.truncf %141 : vector<2x256xf32> to vector<2x256xbf16>
    %c0_60 = arith.constant 0 : index
    %c0_61 = arith.constant 0 : index
    %143 = vector.load %arg17[%c0_60, %c0_61] : memref<256x128xbf16, #tpu.memory_space<vmem>>, vector<256x128xbf16>
    %cst_62 = arith.constant dense<0.000000e+00> : vector<2x128xf32>
    %144 = tpu.matmul %142, %143, %cst_62 {dimension_numbers = #tpu.dot_dimension_numbers<[1], [0], [0], [1], [0, 0, 1, 1], [], []>} : vector<2x256xbf16>, vector<256x128xbf16>, vector<2x128xf32> -> vector<2x128xf32>
    %c0_63 = arith.constant 0 : index
    %c0_64 = arith.constant 0 : index
    %145 = vector.load %arg18[%c0_63, %c0_64] : memref<1x128xf32, #tpu.memory_space<vmem>>, vector<1x128xf32>
    %146 = vector.broadcast %145 : vector<1x128xf32> to vector<2x128xf32>
    %147 = arith.addf %144, %146 : vector<2x128xf32>
    %c0_65 = arith.constant 0 : index
    %c0_66 = arith.constant 0 : index
    %148 = vector.load %arg21[%c0_65, %c0_66] : memref<2x128xf32, #tpu.memory_space<vmem>>, vector<2x128xf32>
    tpu.vector_store %arg21[%c0_65, %c0_66], %147 {strides = array<i32>} : memref<2x128xf32, #tpu.memory_space<vmem>>, vector<2x128xf32>,
    return
  }
}

</mosaic_0001>

<bundles_post_ra>
// kernel: snake_policy_forward.1
= control target key start
LH: loop header
LB: loop body
LE: loop exit
PB: predicated region body
PF: predicated region fallthrough
CT: control target
= control target key end

     0   :  { %v7618_v0 = vmov 0   ;;  %v5385_v2 = vmov 1   ;;  %v7627_v32 = vmov 3   ;;  %v7628_v34 = vmov 4   ;;  %s7591_s1 = inlined_call_operand.vmem [shape: f32[128,9], index: 1, kind: input, shape index: {}]   ;;  %s7592_s2 = inlined_call_operand.vmem [shape: bf16[128,128], index: 2, kind: input, shape index: {}]   ;;  %s7593_s0 = inlined_call_operand.vmem [shape: bf16[128,128], index: 0, kind: input, shape index: {}]   ;;  %s7594_s4 = inlined_call_operand.vmem [shape: bf16[1152,128], index: 4, kind: input, shape index: {}]   ;;  %s7595_s3 = inlined_call_operand.vmem [shape: f32[1,128], index: 3, kind: input, shape index: {}]   ;;  %s7596_s7 = inlined_call_operand.vmem [shape: bf16[128,128], index: 7, kind: input, shape index: {}]   ;;  %s7597_s9 = inlined_call_operand.vmem [shape: bf16[128,256], index: 9, kind: input, shape index: {}]   ;;  %s7598_s5 = inlined_call_operand.vmem [shape: f32[1,128], index: 5, kind: input, shape index: {}]   ;;  %s7599_s6 = inlined_call_operand.vmem [shape: f32[1,128], index: 6, kind: input, shape index: {}]   ;;  %s7600_s19 = inlined_call_operand.vmem [shape: f32[128,4], index: 19, kind: input, shape index: {}]   ;;  %s7601_s10 = inlined_call_operand.vmem [shape: f32[1,256], index: 10, kind: input, shape index: {}]   ;;  %s7602_s8 = inlined_call_operand.vmem [shape: f32[1,128], index: 8, kind: input, shape index: {}]   ;;  %s7603_s20 = inlined_call_operand.vmem [shape: f32[4,128], index: 20, kind: input, shape index: {}]   ;;  %s7604_s11 = inlined_call_operand.vmem [shape: bf16[128,128], index: 11, kind: input, shape index: {}]   ;;  %s7605_s13 = inlined_call_operand.vmem [shape: bf16[128,256], index: 13, kind: input, shape index: {}]   ;;  %s7606_s15 = inlined_call_operand.vmem [shape: bf16[256,256], index: 15, kind: input, shape index: {}]   ;;  %s7607_s12 = inlined_call_operand.vmem [shape: f32[1,128], index: 12, kind: input, shape index: {}]   ;;  %s7608_s17 = inlined_call_operand.vmem [shape: bf16[256,128], index: 17, kind: input, shape index: {}]   ;;  %s7609_s14 = inlined_call_operand.vmem [shape: f32[1,256], index: 14, kind: input, shape index: {}]   ;;  %s7610_s16 = inlined_call_operand.vmem [shape: f32[1,256], index: 16, kind: input, shape index: {}]   ;;  %s7611_s18 = inlined_call_operand.vmem [shape: f32[1,128], index: 18, kind: input, shape index: {}]   ;;  %s7612_s21 = inlined_call_operand.vmem [shape: f32[2,128], index: 21, kind: output, shape index: {}]  }
   0x1   :  { %7659 = sst [smem:[#allocation42_spill]] %s7591_s1  ;;  %5032 = vset.pattern.permute.xlu1 %v7618_v0  ;;  %5031 = vset.pattern.permute.xlu0 %v5385_v2  ;;  %v7626_v36 = vmov 2   ;;  %v7630_v37 = vmov 5   ;;  %v7622_v63 = vmov 6   ;;  %vm5394_vm2 = vmmov 0  }
   0x2   :  { %7660 = sst [smem:[#allocation43_spill]] %s7592_s2  ;;  %s7665_s26 = sld [smem:[#allocation42_spill]]  ;;  %vm2924_vm3 = vcmask 31744   ;;  %vm3151_vm4 = vcmask 1043456   ;;  %vm3303_vm5 = vcmask 1041409  }
   0x3   :  { %7661 = sst [smem:[#allocation44_spill]] %s7593_s0  ;;  %s7666_s28 = sld [smem:[#allocation43_spill]] }
   0x4   :  { %7662 = sst [smem:[#allocation45_spill]] %s7594_s4  ;;  %s7667_s30 = sld [smem:[#allocation44_spill]] }
   0x5   :  { %7663 = sst [smem:[#allocation46_spill]] %s7595_s3  ;;  %s7668_s27 = sld [smem:[#allocation45_spill]] }
   0x6   :  { %7664 = sst [smem:[#allocation47_spill]] %s7596_s7 }
   0x7   :  { %s7781_s2 = sld [smem:[#allocation47_spill]] }
   0x8   :  { %v5510_v1 = vld [vmem:[%s7665_s26] sm:$0xff]  ;;  %v5521_v4 = vld [vmem:[%s7665_s26 + $0x8] sm:$0xff]  ;;  %v5533_v7 = vld [vmem:[%s7665_s26 + $0x18] sm:$0xff] }
   0x9   :  { %370 = vperm.xlu1 %5032, %v5510_v1   ;;  %v5112_v3 = vld [vmem:[%s7666_s28] sm:$0xff]   ;;  %473 = vperm.xlu0 %5031, %v5510_v1   ;;  %v5113_v5 = vld [vmem:[%s7666_s28 + $0x8] sm:$0xff]   ;;  %v5114_v6 = vld [vmem:[%s7666_s28 + $0x10] sm:$0xff]  }
   0xa   :  { %4737 = vmatprep.subr.bf16.mxu0 %v5112_v3  ;;  %v5539_v8 = vld [vmem:[%s7665_s26 + $0x10] sm:$0xff]  ;;  %v5115_v9 = vld [vmem:[%s7666_s28 + $0x18] sm:$0xff]   ;;  %v5550_v10 = vld [vmem:[%s7665_s26 + $0x28] sm:$0xff] }
   0xb   :  { %4738 = vmatpush3.bf16.msra.mxu0 %v5112_v3  ;;  %v5120_v11 = vld [vmem:[%s7667_s30] sm:$0xff]   ;;  %v5564_v13 = vld [vmem:[%s7665_s26 + $0x30] sm:$0xff]  ;;  %v5117_v15 = vld [vmem:[%s7666_s28 + $0x28] sm:$0xff]  }
   0xc   :  { %4739 = vmatprep.subr.bf16.mxu0 %v5113_v5  ;;  %v5116_v12 = vld [vmem:[%s7666_s28 + $0x20] sm:$0xff]   ;;  %4753 = vmatprep.mubr.bf16.mxu0 %v5120_v11  ;;  %v5579_v16 = vld [vmem:[%s7665_s26 + $0x48] sm:$0xff]  ;;  %v5118_v17 = vld [vmem:[%s7666_s28 + $0x30] sm:$0xff]   ;;  %v7620_v11 = vmov 8  }
   0xd   :  { %375 = vperm.xlu1 %5032, %v5521_v4   ;;  %477 = vperm.xlu0 %5031, %v5521_v4   ;;  %v5569_v14 = vld [vmem:[%s7665_s26 + $0x20] sm:$0xff]  ;;  %v5589_v18 = vld [vmem:[%s7665_s26 + $0x50] sm:$0xff]  ;;  %v5119_v19 = vld [vmem:[%s7666_s28 + $0x38] sm:$0xff]   ;;  %s7688_s28 = sld [smem:[#allocation46_spill]] }
   0xe   :  { %v5600_v20 = vld [vmem:[%s7665_s26 + $0x68] sm:$0xff]  ;;  %v5607_v21 = vld [vmem:[%s7665_s26 + $0x38] sm:$0xff]  ;;  %v5615_v23 = vld [vmem:[%s7665_s26 + $0x70] sm:$0xff] }
   0xf   :  { %4740 = vmatpush3.bf16.msra.mxu0 %v5113_v5  ;;  %v5121_v22 = vld [vmem:[%s7667_s30 + $0x8] sm:$0xff]   ;;  %v5122_v24 = vld [vmem:[%s7667_s30 + $0x10] sm:$0xff]   ;;  %v5123_v25 = vld [vmem:[%s7667_s30 + $0x18] sm:$0xff]  }
  0x10   :  { %4741 = vmatprep.subr.bf16.mxu0 %v5114_v6  ;;  %v5633_v26 = vld [vmem:[%s7665_s26 + $0x40] sm:$0xff]  ;;  %v5125_v28 = vld [vmem:[%s7667_s30 + $0x28] sm:$0xff]   ;;  %v5126_v29 = vld [vmem:[%s7667_s30 + $0x30] sm:$0xff]  }
  0x11   :  { %5033 = vset.pattern.permute.xlu1 %v5385_v2  ;;  %481 = vperm.xlu0 %5031, %v5539_v8   ;;  %v5124_v27 = vld [vmem:[%s7667_s30 + $0x20] sm:$0xff]   ;;  %v5655_v30 = vld [vmem:[%s7665_s26 + $0x58] sm:$0xff]  ;;  %v5132_v42 = vld [vmem:[%s7668_s27 + $0x48] sm:$0xff]  }
  0x12   :  { %485 = vperm.xlu1 %5033, %v5533_v7   ;;  %v5127_v31 = vld [vmem:[%s7667_s30 + $0x38] sm:$0xff]   ;;  %v5670_v33 = vld [vmem:[%s7665_s26 + $0x60] sm:$0xff]  ;;  %v5133_v44 = vld [vmem:[%s7668_s27 + $0x8] sm:$0xff]  }
  0x13   :  { %4742 = vmatpush3.bf16.msra.mxu0 %v5114_v6  ;;  %v5685_v35 = vld [vmem:[%s7665_s26 + $0x78] sm:$0xff]  ;;  %v5128_v38 = vld [vmem:[%s7668_s27 + $0x40] sm:$0xff]   ;;  %v5134_v45 = vld [vmem:[%s7668_s27 + $0xc8] sm:$0xff]  }
  0x14   :  { %4743 = vmatprep.subr.bf16.mxu0 %v5115_v9  ;;  %v5129_v39 = vld [vmem:[%s7668_s27] sm:$0xff]   ;;  %4357 = vmatprep.subr.bf16.mxu1 %v5128_v38  ;;  %v5135_v46 = vld [vmem:[%s7668_s27 + $0x88] sm:$0xff]   ;;  %v5136_v47 = vld [vmem:[%s7668_s27 + $0x50] sm:$0xff]  }
  0x15   :  { %493 = vperm.xlu0 %5031, %v5550_v10   ;;  %v5130_v40 = vld [vmem:[%s7668_s27 + $0xc0] sm:$0xff]   ;;  %4358 = vmatpush3.bf16.msra.mxu1 %v5129_v39  ;;  %v5137_v49 = vld [vmem:[%s7668_s27 + $0x10] sm:$0xff]   ;;  %v5140_v52 = vld [vmem:[%s7668_s27 + $0x58] sm:$0xff]  }
  0x16   :  { %5034 = vset.pattern.permute.xlu1 %v7618_v0  ;;  %v5131_v41 = vld [vmem:[%s7668_s27 + $0x80] sm:$0xff]   ;;  %4359 = vmatprep.subr.bf16.mxu1 %v5132_v42  ;;  %v5138_v50 = vld [vmem:[%s7668_s27 + $0xd0] sm:$0xff]   ;;  %v5141_v53 = vld [vmem:[%s7668_s27 + $0x18] sm:$0xff]  }
  0x17   :  { %385 = vperm.xlu1 %5034, %v5533_v7   ;;  %4744 = vmatpush3.bf16.msra.mxu0 %v5115_v9  ;;  %v5139_v51 = vld [vmem:[%s7668_s27 + $0x90] sm:$0xff]   ;;  %v5142_v55 = vld [vmem:[%s7668_s27 + $0xd8] sm:$0xff]   ;;  %v5144_v57 = vld [vmem:[%s7668_s27 + $0x60] sm:$0xff]  }
  0x18   :  { %4745 = vmatprep.subr.bf16.mxu0 %v5116_v12  ;;  %v5143_v56 = vld [vmem:[%s7668_s27 + $0x98] sm:$0xff]   ;;  %v5145_v58 = vld [vmem:[%s7668_s27 + $0x20] sm:$0xff]   ;;  %v5149_v3 = vld [vmem:[%s7668_s27 + $0x28] sm:$0xff]  }
  0x19   :  { %497 = vperm.xlu0 %5031, %v5564_v13   ;;  %4360 = vmatpush3.bf16.msra.mxu1 %v5133_v44  ;;  %v5146_v59 = vld [vmem:[%s7668_s27 + $0xe0] sm:$0xff]   ;;  %v5150_v5 = vld [vmem:[%s7668_s27 + $0xe8] sm:$0xff]  }
  0x1a   :  { %4361 = vmatprep.subr.bf16.mxu1 %v5136_v47  ;;  %v5147_v61 = vld [vmem:[%s7668_s27 + $0xa0] sm:$0xff]   ;;  %v5151_v6 = vld [vmem:[%s7668_s27 + $0xa8] sm:$0xff]  }
  0x1b   :  { %5035 = vset.pattern.permute.xlu1 %v5385_v2  ;;  %4746 = vmatpush3.bf16.msra.mxu0 %v5116_v12  ;;  %v5153_v12 = vld [vmem:[%s7668_s27 + $0x30] sm:$0xff]  }
  0x1c   :  { %489 = vperm.xlu1 %5035, %v5569_v14   ;;  %4747 = vmatprep.subr.bf16.mxu0 %v5117_v15 }
  0x1d   :  { %509 = vperm.xlu0 %5031, %v5579_v16   ;;  %4362 = vmatpush3.bf16.msra.mxu1 %v5137_v49 }
  0x1e   :  { %4363 = vmatprep.subr.bf16.mxu1 %v5140_v52 }
  0x1f   :  { %4748 = vmatpush3.bf16.msra.mxu0 %v5117_v15  ;;  %v5154_v15 = vld [vmem:[%s7668_s27 + $0xf0] sm:$0xff]  }
  0x20   :  { %5036 = vset.pattern.permute.xlu1 %v7618_v0  ;;  %4749 = vmatprep.subr.bf16.mxu0 %v5118_v17 }
  0x21   :  { %390 = vperm.xlu1 %5036, %v5569_v14   ;;  %513 = vperm.xlu0 %5031, %v5589_v18  }
  0x22   :  { %4364 = vmatpush3.bf16.msra.mxu1 %v5141_v53 }
  0x23   :  { %4750 = vmatpush3.bf16.msra.mxu0 %v5118_v17  ;;  %4365 = vmatprep.subr.bf16.mxu1 %v5144_v57 }
  0x24   :  { %4751 = vmatprep.subr.bf16.mxu0 %v5119_v19 }
  0x25   :  { %395 = vperm.xlu1 %5036, %v5550_v10   ;;  %525 = vperm.xlu0 %5031, %v5600_v20  }
  0x26   :  { %4366 = vmatpush3.bf16.msra.mxu1 %v5145_v58 }
  0x27   :  { %4752 = vmatpush3.bf16.msra.mxu0 %v5119_v19  ;;  %v5155_v19 = vld [vmem:[%s7668_s27 + $0xb0] sm:$0xff]  }
  0x28   :  { %4421 = vmatprep.subr.bf16.mxu0 %v5130_v40 }
  0x29   :  { %5037 = vset.pattern.permute.xlu1 %v5385_v2  ;;  %529 = vperm.xlu0 %5031, %v5615_v23  }
  0x2a   :  { %501 = vperm.xlu1 %5037, %v5607_v21   ;;  %4754 = vmatmul.mubr.bf16.vlgmr.msra.gmra.mrb[0].mxu0 %v5121_v22 }
  0x2b   :  { %4757 = vmatprep.mubr.bf16.mxu0 %v5122_v24  ;;  %4422 = vmatpush3.bf16.msra.mxu0 %v5131_v41  ;;  %v5156_v24 = vld [vmem:[%s7668_s27 + $0x78] sm:$0xff]  }
  0x2c   :  { %4423 = vmatprep.subr.bf16.mxu0 %v5134_v45 }
  0x2d   :  { %5045 = vset.pattern.permute.xlu0 %v7618_v0 }
  0x2e   :  { %5038 = vset.pattern.permute.xlu1 %v7618_v0  ;;  %380 = vperm.xlu0 %5045, %v5539_v8  }
  0x2f   :  { %405 = vperm.xlu1 %5038, %v5607_v21   ;;  %4424 = vmatpush3.bf16.msra.mxu0 %v5135_v46 }
  0x30   :  { %4425 = vmatprep.subr.bf16.mxu0 %v5138_v50 }
  0x32   :  { %4758 = vmatmul.mubr.bf16.gmra.mrb[4].mxu0 %v5123_v25  ;;  %400 = vperm.xlu0 %5045, %v5564_v13   ;;  %v5158_v25 = vld [vmem:[%s7668_s27 + $0xf8] sm:$0xff]  }
  0x33   :  { %5039 = vset.pattern.permute.xlu1 %v5385_v2  ;;  %4761 = vmatprep.mubr.bf16.mxu0 %v5124_v27  ;;  %v5159_v27 = vld [vmem:[%s7668_s27 + $0xb8] sm:$0xff]  }
  0x34   :  { %505 = vperm.xlu1 %5039, %v5633_v26   ;;  %4426 = vmatpush3.bf16.msra.mxu0 %v5139_v51 }
  0x35   :  { %4427 = vmatprep.subr.bf16.mxu0 %v5142_v55 }
  0x36   :  { %420 = vperm.xlu0 %5045, %v5589_v18  }
  0x38   :  { %5040 = vset.pattern.permute.xlu1 %v7618_v0  ;;  %4428 = vmatpush3.bf16.msra.mxu0 %v5143_v56 }
  0x39   :  { %410 = vperm.xlu1 %5040, %v5633_v26   ;;  %4429 = vmatprep.subr.bf16.mxu0 %v5146_v59 }
  0x3a   :  { %4762 = vmatmul.mubr.bf16.gmra.mrb[8].mxu0 %v5125_v28  ;;  %440 = vperm.xlu0 %5045, %v5615_v23  }
  0x3b   :  { %4765 = vmatprep.mubr.bf16.mxu0 %v5126_v29 }
  0x3c   :  { %4430 = vmatpush3.bf16.msra.mxu0 %v5147_v61 }
  0x3d   :  { %415 = vperm.xlu1 %5040, %v5579_v16   ;;  %4431 = vmatprep.subr.bf16.mxu0 %v5150_v5 }
  0x3e   :  { %5049 = vset.pattern.permute.xlu0 %v7627_v32 }
  0x3f   :  { %686 = vperm.xlu0 %5049, %v5521_v4  }
  0x40   :  { %4432 = vmatpush3.bf16.msra.mxu0 %v5151_v6 }
  0x41   :  { %5041 = vset.pattern.permute.xlu1 %v5385_v2  ;;  %4433 = vmatprep.subr.bf16.mxu0 %v5154_v15 }
  0x42   :  { %517 = vperm.xlu1 %5041, %v5655_v30   ;;  %4766 = vmatmul.mubr.bf16.gmra.mrb[12].mxu0 %v5127_v31  ;;  %v7624_v31 = vmov 7  }
  0x43   :  { %698 = vperm.xlu0 %5049, %v5569_v14  }
  0x44   :  { %4434 = vmatpush3.bf16.msra.mxu0 %v5155_v19 }
  0x45   :  { %4435 = vmatprep.subr.bf16.mxu0 %v5158_v25 }
  0x46   :  { %5042 = vset.pattern.permute.xlu1 %v7618_v0 }
  0x47   :  { %425 = vperm.xlu1 %5042, %v5655_v30   ;;  %710 = vperm.xlu0 %5049, %v5607_v21  }
  0x48   :  { %4436 = vmatpush3.bf16.msra.mxu0 %v5159_v27 }
  0x4b   :  { %5043 = vset.pattern.permute.xlu1 %v5385_v2  ;;  %722 = vperm.xlu0 %5049, %v5589_v18  }
  0x4c   :  { %521 = vperm.xlu1 %5043, %v5670_v33  }
  0x4f   :  { %734 = vperm.xlu0 %5049, %v5600_v20  }
  0x50   :  { %5044 = vset.pattern.permute.xlu1 %v7618_v0 }
  0x51   :  { %430 = vperm.xlu1 %5044, %v5670_v33  }
  0x53   :  { %5074 = vset.pattern.permute.xlu0 %v7628_v34 }
  0x54   :  { %774 = vperm.xlu0 %5074, %v5521_v4  }
  0x55   :  { %435 = vperm.xlu1 %5044, %v5600_v20  }
  0x58   :  { %786 = vperm.xlu0 %5074, %v5569_v14  }
  0x59   :  { %5046 = vset.pattern.permute.xlu1 %v5385_v2  ;;  %v5148_v2 = vld [vmem:[%s7668_s27 + $0x68] sm:$0xff]  }
  0x5a   :  { %533 = vperm.xlu1 %5046, %v5685_v35   ;;  %4367 = vmatprep.subr.bf16.mxu1 %v5148_v2 }
  0x5b   :  { %4368 = vmatpush3.bf16.msra.mxu1 %v5149_v3 }
  0x5c   :  { %798 = vperm.xlu0 %5074, %v5607_v21  }
  0x5e   :  { %5047 = vset.pattern.permute.xlu1 %v7618_v0 }
  0x5f   :  { %445 = vperm.xlu1 %5047, %v5685_v35  }
  0x60   :  { %810 = vperm.xlu0 %5074, %v5589_v18  }
  0x63   :  { %5048 = vset.pattern.permute.xlu1 %v7627_v32 }
  0x64   :  { %682 = vperm.xlu1 %5048, %v5510_v1   ;;  %822 = vperm.xlu0 %5074, %v5600_v20  }
  0x68   :  { %5050 = vset.pattern.permute.xlu1 %v7626_v36  ;;  %5078 = vset.pattern.permute.xlu0 %v7626_v36 }
  0x69   :  { %594 = vperm.xlu1 %5050, %v5510_v1   ;;  %602 = vperm.xlu0 %5078, %v5539_v8  }
  0x6d   :  { %598 = vperm.xlu1 %5050, %v5521_v4   ;;  %614 = vperm.xlu0 %5078, %v5550_v10  }
  0x71   :  { %5051 = vset.pattern.permute.xlu1 %v7630_v37  ;;  %626 = vperm.xlu0 %5078, %v5633_v26  }
  0x72   :  { %862 = vperm.xlu1 %5051, %v5521_v4  }
  0x75   :  { %638 = vperm.xlu0 %5078, %v5655_v30  }
  0x76   :  { %5052 = vset.pattern.permute.xlu1 %v7628_v34 }
  0x77   :  { %770 = vperm.xlu1 %5052, %v5510_v1  }
  0x79   :  { %650 = vperm.xlu0 %5078, %v5615_v23  }
  0x7b   :  { %5053 = vset.pattern.permute.xlu1 %v7627_v32 }
  0x7c   :  { %690 = vperm.xlu1 %5053, %v5539_v8  }
  0x7d   :  { %5080 = vset.pattern.permute.xlu0 %v7630_v37 }
  0x7e   :  { %858 = vperm.xlu0 %5080, %v5510_v1  }
  0x80   :  { %694 = vperm.xlu1 %5053, %v5533_v7  }
  0x82   :  { %870 = vperm.xlu0 %5080, %v5533_v7  }
  0x84   :  { %5054 = vset.pattern.permute.xlu1 %v7626_v36 }
  0x85   :  { %606 = vperm.xlu1 %5054, %v5533_v7  }
  0x86   :  { %882 = vperm.xlu0 %5080, %v5564_v13  }
  0x88   :  { %v5733_v43 = vpop.permute.xlu1 %370  ;;  %v5797_v62 = vpop.permute.xlu0 %473 }
  0x89   :  { %5055 = vset.pattern.permute.xlu1 %v7630_v37 }
  0x8a   :  { %866 = vperm.xlu1 %5055, %v5539_v8   ;;  %894 = vperm.xlu0 %5080, %v5579_v16  }
  0x8c   :  { %v5750_v48 = vpop.permute.xlu1 %375  ;;  %v5827_v17 = vpop.permute.xlu0 %477 }
  0x8e   :  { %5056 = vset.pattern.permute.xlu1 %v7628_v34  ;;  %906 = vperm.xlu0 %5080, %v5670_v33  }
  0x8f   :  { %778 = vperm.xlu1 %5056, %v5539_v8  }
  0x90   :  { %v5850_v28 = vpop.permute.xlu0 %481 }
  0x91   :  { %v5771_v54 = vpop.permute.xlu1 %485 }
  0x92   :  { %918 = vperm.xlu0 %5080, %v5685_v35  }
  0x93   :  { %782 = vperm.xlu1 %5056, %v5533_v7  }
  0x94   :  { %v5859_v39 = vpop.permute.xlu0 %493 }
  0x96   :  { %v5790_v60 = vpop.permute.xlu1 %385  ;;  %5086 = vset.pattern.permute.xlu0 %v7622_v63 }
  0x97   :  { %5057 = vset.pattern.permute.xlu1 %v7627_v32  ;;  %950 = vperm.xlu0 %5086, %v5521_v4   ;;  %v5152_v4 = vld [vmem:[%s7668_s27 + $0x70] sm:$0xff]  }
  0x98   :  { %702 = vperm.xlu1 %5057, %v5550_v10   ;;  %4369 = vmatprep.subr.bf16.mxu1 %v5152_v4  ;;  %v5868_v41 = vpop.permute.xlu0 %497 }
  0x99   :  { %4370 = vmatpush3.bf16.msra.mxu1 %v5153_v12 }
  0x9a   :  { %4371 = vmatprep.subr.bf16.mxu1 %v5156_v24 }
  0x9b   :  { %v5813_v9 = vpop.permute.xlu1 %489  ;;  %5088 = vset.pattern.permute.xlu0 %v7620_v11 }
  0x9c   :  { %5058 = vset.pattern.permute.xlu1 %v7626_v36  ;;  %1130 = vperm.xlu0 %5088, %v5539_v8   ;;  %v5157_v8 = vld [vmem:[%s7668_s27 + $0x38] sm:$0xff]  }
  0x9d   :  { %610 = vperm.xlu1 %5058, %v5569_v14   ;;  %4372 = vmatpush3.bf16.msra.mxu1 %v5157_v8 }
  0xa0   :  { %v5833_v22 = vpop.permute.xlu1 %390  ;;  %1142 = vperm.xlu0 %5088, %v5550_v10  }
  0xa1   :  { %5059 = vset.pattern.permute.xlu1 %v7630_v37 }
  0xa2   :  { %874 = vperm.xlu1 %5059, %v5569_v14  }
  0xa4   :  { %v5852_v29 = vpop.permute.xlu1 %395  ;;  %5094 = vset.pattern.permute.xlu0 %v7624_v31 }
  0xa5   :  { %1034 = vperm.xlu0 %5094, %v5510_v1  }
  0xa6   :  { %878 = vperm.xlu1 %5059, %v5550_v10  }
  0xa9   :  { %v5857_v38 = vpop.permute.xlu1 %501  ;;  %1046 = vperm.xlu0 %5094, %v5533_v7  }
  0xaa   :  { %5060 = vset.pattern.permute.xlu1 %v7628_v34 }
  0xab   :  { %790 = vperm.xlu1 %5060, %v5550_v10   ;;  %v5876_v10 = vpop.permute.xlu0 %509 }
  0xad   :  { %1050 = vperm.xlu0 %5094, %v5569_v14  }
  0xae   :  { %v5864_v40 = vpop.permute.xlu1 %405 }
  0xaf   :  { %5061 = vset.pattern.permute.xlu1 %v7627_v32  ;;  %v5883_v42 = vpop.permute.xlu0 %513 }
  0xb0   :  { %706 = vperm.xlu1 %5061, %v5564_v13   ;;  %7671 = vst [vmem:[#allocation4_spill] sm:$0xff] %v5883_v42  ;;  %v7706_v42 = vmov 2  }
  0xb1   :  { %1058 = vperm.xlu0 %5094, %v5564_v13  }
  0xb3   :  { %v5871_v1 = vpop.permute.xlu1 %505  ;;  %v5893_v46 = vpop.permute.xlu0 %525 }
  0xb4   :  { %7669 = vst [vmem:[#allocation2_spill] sm:$0xff] %v5871_v1  ;;  %5062 = vset.pattern.permute.xlu1 %v7626_v36  ;;  %7674 = vst [vmem:[#allocation7_spill] sm:$0xff] %v5893_v46 }
  0xb5   :  { %618 = vperm.xlu1 %5062, %v5564_v13   ;;  %1078 = vperm.xlu0 %5094, %v5655_v30  }
  0xb8   :  { %v5879_v7 = vpop.permute.xlu1 %410 }
  0xb9   :  { %7670 = vst [vmem:[#allocation3_spill] sm:$0xff] %v5879_v7  ;;  %622 = vperm.xlu1 %5062, %v5607_v21   ;;  %5101 = vset.pattern.permute.xlu0 %v7622_v63 }
  0xba   :  { %962 = vperm.xlu0 %5101, %v5569_v14   ;;  %v5160_v14 = vld [vmem:[%s7668_s27 + $0x140] sm:$0xff]  }
  0xbb   :  { %4485 = vmatprep.subr.bf16.mxu1 %v5160_v14 }
  0xbc   :  { %v5885_v44 = vpop.permute.xlu1 %415 }
  0xbd   :  { %7672 = vst [vmem:[#allocation5_spill] sm:$0xff] %v5885_v44  ;;  %5063 = vset.pattern.permute.xlu1 %v7630_v37 }
  0xbe   :  { %886 = vperm.xlu1 %5063, %v5607_v21   ;;  %974 = vperm.xlu0 %5101, %v5607_v21   ;;  %v5904_v21 = vpop.permute.xlu0 %529 }
  0xbf   :  { %7676 = vst [vmem:[#allocation9_spill] sm:$0xff] %v5904_v21 }
  0xc1   :  { %v5891_v45 = vpop.permute.xlu1 %517 }
  0xc2   :  { %7673 = vst [vmem:[#allocation6_spill] sm:$0xff] %v5891_v45  ;;  %5064 = vset.pattern.permute.xlu1 %v7628_v34  ;;  %978 = vperm.xlu0 %5101, %v5633_v26  }
  0xc3   :  { %794 = vperm.xlu1 %5064, %v5564_v13   ;;  %v5913_v13 = vpop.permute.xlu0 %380 }
  0xc6   :  { %v5901_v47 = vpop.permute.xlu1 %425  ;;  %994 = vperm.xlu0 %5101, %v5670_v33  }
  0xc7   :  { %7675 = vst [vmem:[#allocation8_spill] sm:$0xff] %v5901_v47  ;;  %5065 = vset.pattern.permute.xlu1 %v7627_v32  ;;  %v5920_v51 = vpop.permute.xlu0 %400 }
  0xc8   :  { %714 = vperm.xlu1 %5065, %v5633_v26  }
  0xca   :  { %5104 = vset.pattern.permute.xlu0 %v7620_v11 }
  0xcb   :  { %v5908_v49 = vpop.permute.xlu1 %521  ;;  %1154 = vperm.xlu0 %5104, %v5633_v26   ;;  %v5930_v55 = vpop.permute.xlu0 %420 }
  0xcc   :  { %7677 = vst [vmem:[#allocation10_spill] sm:$0xff] %v5908_v49  ;;  %718 = vperm.xlu1 %5065, %v5579_v16   ;;  %7681 = vst [vmem:[#allocation14_spill] sm:$0xff] %v5930_v55 }
  0xcf   :  { %1166 = vperm.xlu0 %5104, %v5655_v30   ;;  %v5939_v57 = vpop.permute.xlu0 %440 }
  0xd0   :  { %5066 = vset.pattern.permute.xlu1 %v7626_v36  ;;  %v5916_v50 = vpop.permute.xlu1 %430  ;;  %7683 = vst [vmem:[#allocation16_spill] sm:$0xff] %v5939_v57 }
  0xd1   :  { %7678 = vst [vmem:[#allocation11_spill] sm:$0xff] %v5916_v50  ;;  %630 = vperm.xlu1 %5066, %v5579_v16   ;;  %v7701_v50 = vmov 3  }
  0xd3   :  { %1174 = vperm.xlu0 %5104, %v5600_v20   ;;  %v5947_v59 = vpop.permute.xlu0 %686 }
  0xd4   :  { %v5922_v52 = vpop.permute.xlu1 %435 }
  0xd5   :  { %7679 = vst [vmem:[#allocation12_spill] sm:$0xff] %v5922_v52  ;;  %5067 = vset.pattern.permute.xlu1 %v7630_v37 }
  0xd6   :  { %890 = vperm.xlu1 %5067, %v5633_v26  }
  0xd7   :  { %5107 = vset.pattern.permute.xlu0 %v7624_v31 }
  0xd8   :  { %1082 = vperm.xlu0 %5107, %v5670_v33  }
  0xd9   :  { %v5927_v53 = vpop.permute.xlu1 %533 }
  0xda   :  { %7680 = vst [vmem:[#allocation13_spill] sm:$0xff] %v5927_v53  ;;  %5068 = vset.pattern.permute.xlu1 %v7628_v34 }
  0xdb   :  { %802 = vperm.xlu1 %5068, %v5633_v26  }
  0xdc   :  { %1090 = vperm.xlu0 %5107, %v5615_v23  }
  0xde   :  { %v5935_v56 = vpop.permute.xlu1 %445 }
  0xdf   :  { %7682 = vst [vmem:[#allocation15_spill] sm:$0xff] %v5935_v56  ;;  %806 = vperm.xlu1 %5068, %v5579_v16   ;;  %v5954_v16 = vpop.permute.xlu0 %698 }
  0xe0   :  { %5110 = vset.pattern.permute.xlu0 %v7622_v63 }
  0xe1   :  { %1006 = vperm.xlu0 %5110, %v5685_v35  }
  0xe3   :  { %5069 = vset.pattern.permute.xlu1 %v7627_v32  ;;  %v5943_v58 = vpop.permute.xlu1 %682  ;;  %v5962_v3 = vpop.permute.xlu0 %710 }
  0xe4   :  { %726 = vperm.xlu1 %5069, %v5655_v30  }
  0xe5   :  { %5111 = vset.pattern.permute.xlu0 %v7620_v11 }
  0xe7   :  { %v5969_v6 = vpop.permute.xlu0 %722 }
  0xe8   :  { %5070 = vset.pattern.permute.xlu1 %v7626_v36  ;;  %v5951_v26 = vpop.permute.xlu1 %594  ;;  %7686 = vst [vmem:[#allocation19_spill] sm:$0xff] %v5969_v6 }
  0xe9   :  { %634 = vperm.xlu1 %5070, %v5589_v18  }
  0xec   :  { %v5956_v61 = vpop.permute.xlu1 %598 }
  0xed   :  { %5071 = vset.pattern.permute.xlu1 %v7630_v37 }
  0xee   :  { %898 = vperm.xlu1 %5071, %v5589_v18   ;;  %v5975_v18 = vpop.permute.xlu0 %734 }
  0xef   :  { %7687 = vst [vmem:[#allocation20_spill] sm:$0xff] %v5975_v18 }
  0xf1   :  { %v5960_v2 = vpop.permute.xlu1 %862 }
  0xf2   :  { %7684 = vst [vmem:[#allocation17_spill] sm:$0xff] %v5960_v2  ;;  %902 = vperm.xlu1 %5071, %v5655_v30   ;;  %v775_v0 = vpop.permute.xlu0 %774 }
  0xf6   :  { %5072 = vset.pattern.permute.xlu1 %v7628_v34  ;;  %v5966_v5 = vpop.permute.xlu1 %770  ;;  %v349_v34 = vlaneseq }
  0xf7   :  { %7685 = vst [vmem:[#allocation18_spill] sm:$0xff] %v5966_v5  ;;  %814 = vperm.xlu1 %5072, %v5655_v30   ;;  %v5983_v30 = vld [vmem:[%s7688_s28] ss:$0 sm:$0xff]  ;;  %v7694_v5 = vmov 4  }
  0xfb   :  { %5073 = vset.pattern.permute.xlu1 %v7627_v32  ;;  %v5972_v4 = vpop.permute.xlu1 %690 }
  0xfc   :  { %730 = vperm.xlu1 %5073, %v5670_v33  }
  0xfd   :  { %v4755_v12 = vpop.f32.mrb[0].mxu0 }
  0xfe   :  { %v238_v19 = vpop.f32.mrb[1].mxu0 }
  0xff   :  { %v5977_v15 = vpop.permute.xlu1 %694  ;;  %v4756_v24 = vpop.f32.mrb[2].mxu0 }
 0x100   :  { %5075 = vset.pattern.permute.xlu1 %v7626_v36  ;;  %v241_v8 = vpop.f32.mrb[3].mxu0  ;;  %v250_v56 = vadd.f32 %v4756_v24, %v5983_v30 }
 0x101   :  { %642 = vperm.xlu1 %5075, %v5670_v33   ;;  %v242_v25 = vadd.f32 %v5983_v30, %v241_v8 }
 0x103   :  { %v5987_v27 = vmax.f32 %v242_v25, 0.0 }
 0x104   :  { %v5989_v14 = vpop.permute.xlu1 %606 }
 0x105   :  { %7689 = vst [vmem:[#allocation21_spill] sm:$0xff] %v5987_v27  ;;  %646 = vperm.xlu1 %5075, %v5600_v20   ;;  %v5993_v11 = vmul.f32 %v775_v0, %v5987_v27  ;;  %v5995_v63 = vpop.f32.mrb[4].mxu0  ;;  %v6007_v0 = vshrl.u32 %v349_v34, 7  ;;  %v561_v47 = vrot.slane %v5987_v27, 1 }
 0x106   :  { %v254_v31 = vpop.f32.mrb[5].mxu0 }
 0x107   :  { %7690 = vst [vmem:[#allocation22_spill] sm:$0xff] %v5993_v11  ;;  %v255_v36 = vadd.f32 %v5983_v30, %v254_v31  ;;  %v5998_v32 = vpop.f32.mrb[6].mxu0  ;;  %vm576_vm0 = vcmp.lt.s32.totalorder %v6007_v0, 7  ;;  %vm351_vm1 = vcmp.lt.s32.totalorder %v6007_v0, 1 }
 0x108   :  { %v257_v25 = vpop.f32.mrb[7].mxu0 }
 0x109   :  { %5076 = vset.pattern.permute.xlu1 %v7630_v37  ;;  %v6001_v8 = vpop.permute.xlu1 %866  ;;  %v258_v18 = vadd.f32 %v5983_v30, %v257_v25  ;;  %v6005_v6 = vmax.f32 %v255_v36, 0.0 }
 0x10a   :  { %7691 = vst [vmem:[#allocation23_spill] sm:$0xff] %v6001_v8  ;;  %910 = vperm.xlu1 %5076, %v5600_v20   ;;  %v787_v8 = vpop.permute.xlu0 %786 }
 0x10b   :  { %7692 = vst [vmem:[#allocation24_spill] sm:$0xff] %v6005_v6  ;;  %v6009_v11 = vmax.f32 %v258_v18, 0.0  ;;  %v7631_v34 = vrot.slane %v6005_v6, 7  ;;  %v7700_v24 = vrot.slane %v6005_v6, 1  ;;  %v6055_v21 = vmul.f32 %v787_v8, %v6005_v6 }
 0x10d   :  { %7693 = vst [vmem:[#allocation25_spill] sm:$0xff] %v6009_v11  ;;  %v6014_v2 = vpop.f32.mrb[8].mxu0  ;;  %v7632_v18 = vrot.slane %v6009_v11, 1  ;;  %v7698_v36 = vrot.slane %v6009_v11, 7 }
 0x10e   :  { %5077 = vset.pattern.permute.xlu1 %v7694_v5  ;;  %v6012_v31 = vpop.permute.xlu1 %778  ;;  %v6017_v37 = vpop.f32.mrb[9].mxu0 }
 0x10f   :  { %7695 = vst [vmem:[#allocation26_spill] sm:$0xff] %v6012_v31  ;;  %818 = vperm.xlu1 %5077, %v5670_v33   ;;  %v6021_v25 = vpop.f32.mrb[10].mxu0  ;;  %v247_v33 = vadd.f32 %v4755_v12, %v5983_v30  ;;  %v6039_v57 = vsel %vm351_vm1, %v7631_v34, %v7698_v36  ;;  %v6047_v53 = vsel %vm576_vm0, %v7700_v24, %v7632_v18  ;;  %v6057_v36 = vpop.permute.xlu0 %798 }
 0x110   :  { %7696 = vst [vmem:[#allocation27_spill] sm:$0xff] %v6021_v25  ;;  %v6027_v31 = vpop.f32.mrb[11].mxu0  ;;  %7699 = vst [vmem:[#allocation29_spill] sm:$0xff] %v6039_v57  ;;  %v239_v12 = vadd.f32 %v5983_v30, %v238_v19 }
 0x111   :  { %7702 = vst [vmem:[#allocation30_spill] sm:$0xff] %v6057_v36  ;;  %v6059_v34 = vmax.f32 %v247_v33, 0.0 }
 0x112   :  { %v6031_v20 = vpop.permute.xlu1 %782 }
 0x113   :  { %7697 = vst [vmem:[#allocation28_spill] sm:$0xff] %v6031_v20  ;;  %5079 = vset.pattern.permute.xlu1 %v7701_v50  ;;  %v6052_v20 = vmax.f32 %v250_v56, 0.0  ;;  %v6064_v50 = vmax.f32 %v239_v12, 0.0  ;;  %v6087_v25 = vpop.permute.xlu0 %810 }
 0x114   :  { %738 = vperm.xlu1 %5079, %v5615_v23   ;;  %7704 = vst [vmem:[#allocation32_spill] sm:$0xff] %v6087_v25 }
 0x115   :  { %v4767_v52 = vpop.f32.mrb[12].mxu0  ;;  %7703 = vst [vmem:[#allocation31_spill] sm:$0xff] %v6064_v50  ;;  %v560_v12 = vrot.slane %v6064_v50, 1  ;;  %v333_v33 = vrot.slane %v6064_v50, 7 }
 0x116   :  { %v295_v49 = vadd.f32 %v4767_v52, %v5983_v30  ;;  %v286_v18 = vpop.f32.mrb[13].mxu0  ;;  %v335_v52 = vrot.slane %v6059_v34, 7 }
 0x117   :  { %v6062_v24 = vpop.permute.xlu1 %702  ;;  %v287_v23 = vadd.f32 %v5983_v30, %v286_v18  ;;  %v4768_v56 = vpop.f32.mrb[14].mxu0  ;;  %v334_v18 = vrot.slane %v5987_v27, 7 }
 0x118   :  { %742 = vperm.xlu1 %5079, %v5685_v35   ;;  %v6069_v8 = vmax.f32 %v295_v49, 0.0  ;;  %v298_v36 = vadd.f32 %v4768_v56, %v5983_v30  ;;  %v289_v46 = vpop.f32.mrb[15].mxu0  ;;  %v5176_v49 = vld [vmem:[%s7668_s27 + $0x1c0] sm:$0xff]   ;;  %v537_v56 = vmul.f32 %v5827_v17, %v6064_v50  ;;  %v539_v17 = vmul.f32 %v5771_v54, %v6059_v34 }
 0x119   :  { %v290_v19 = vadd.f32 %v5983_v30, %v289_v46  ;;  %v6089_v7 = vmax.f32 %v287_v23, 0.0  ;;  %4549 = vmatprep.subr.bf16.mxu0 %v5176_v49  ;;  %v6119_v49 = vsel %vm351_vm1, %v334_v18, %v335_v52  ;;  %v6135_v54 = vsel %vm351_vm1, %v333_v33, %v334_v18 }
 0x11a   :  { %v6081_v55 = vmax.f32 %v298_v36, 0.0  ;;  %v538_v36 = vmul.f32 %v5850_v28, %v5987_v27  ;;  %v6113_v28 = vsel %vm576_vm0, %v560_v12, %v561_v47  ;;  %v7711_v27 = vrot.slane %v6069_v8, 7 }
 0x11b   :  { %7705 = vst [vmem:[#allocation33_spill] sm:$0xff] %v6089_v7  ;;  %v6091_v46 = vmax.f32 %v290_v19, 0.0  ;;  %7709 = vst [vmem:[#allocation35_spill] sm:$0xff] %v6113_v28 }
 0x11c   :  { %5081 = vset.pattern.permute.xlu1 %v7706_v42  ;;  %v6094_v44 = vpop.permute.xlu1 %610  ;;  %v7636_v45 = vrot.slane %v6081_v55, 1  ;;  %v536_v23 = vmul.f32 %v5797_v62, %v6081_v55  ;;  %v348_v19 = vrot.slane %v6081_v55, 7  ;;  %v7707_v42 = vrot.slane %v6052_v20, 7 }
 0x11d   :  { %654 = vperm.xlu1 %5081, %v5685_v35   ;;  %v7639_v35 = vrot.slane %v6091_v46, 1 }
 0x11e   :  { %v6109_v25 = vsel %vm351_vm1, %v335_v52, %v7707_v42  ;;  %v6125_v62 = vsel %vm576_vm0, %v7636_v45, %v560_v12  ;;  %v552_v42 = vpack.c.bf16 %v537_v56, %v536_v23  ;;  %v6131_v50 = vsel %vm351_vm1, %v7711_v27, %v348_v19 }
 0x11f   :  { %7708 = vst [vmem:[#allocation34_spill] sm:$0xff] %v6109_v25  ;;  %7710 = vst [vmem:[#allocation36_spill] sm:$0xff] %v6125_v62  ;;  %v7713_v52 = vrot.slane %v6089_v7, 1  ;;  %v657_v12 = vmul.f32 %v5951_v26, %v6125_v62  ;;  %v6149_v56 = vsel %vm351_vm1, %v348_v19, %v333_v33  ;;  %v746_v27 = vmul.f32 %v5947_v59, %v6135_v54  ;;  %v6163_v19 = vpop.permute.xlu0 %822 }
 0x120   :  { %7712 = vst [vmem:[#allocation37_spill] sm:$0xff] %v6131_v50  ;;  %7714 = vst [vmem:[#allocation38_spill] sm:$0xff] %v6149_v56  ;;  %v658_v23 = vmul.f32 %v5956_v61, %v6113_v28  ;;  %v7715_v45 = vmov 5   ;;  %1824 = vmatprep.mubr.bf16.mxu1 %v552_v42  ;;  %v448_v26 = vmul.f32 %v5733_v43, %v6131_v50  ;;  %v449_v33 = vmul.f32 %v5750_v48, %v6149_v56  ;;  %v6170_v61 = vld [vmem:[%s7665_s26 + $0x70] sm:$0xff] }
 0x121   :  { %v6143_v1 = vsel %vm576_vm0, %v7713_v52, %v7639_v35  ;;  %5082 = vset.pattern.permute.xlu1 %v7715_v45  ;;  %v6157_v7 = vpop.permute.xlu1 %874  ;;  %v266_v59 = vadd.f32 %v5998_v32, %v5983_v30  ;;  %v747_v45 = vmul.f32 %v5972_v4, %v6119_v49  ;;  %v745_v43 = vmul.f32 %v5943_v58, %v6149_v56  ;;  %v5161_v58 = vld [vmem:[%s7668_s27 + $0x100] sm:$0xff]  }
 0x122   :  { %914 = vperm.xlu1 %5082, %v6170_v61   ;;  %v748_v48 = vmul.f32 %v5977_v15, %v6109_v25  ;;  %v673_v42 = vpack.c.bf16 %v658_v23, %v657_v12  ;;  %v464_v52 = vpack.c.bf16 %v449_v33, %v448_v26  ;;  %v6181_v32 = vmul.f32 %v5920_v51, %v6039_v57  ;;  %v7745_v56 = vld [vmem:[#allocation10_spill] sm:$0xff] }
 0x123   :  { %v263_v35 = vadd.f32 %v5995_v63, %v5983_v30  ;;  %v761_v18 = vpack.c.bf16 %v746_v27, %v745_v43  ;;  %v553_v62 = vpack.c.bf16 %v539_v17, %v538_v36  ;;  %v7716_v4 = vrot.slane %v6052_v20, 1  ;;  %v5162_v27 = vld [vmem:[%s7668_s27 + $0x148] sm:$0xff]  }
 0x124   :  { %1825 = vmatmul.mubr.bf16.vlgmr.msra.gmra.mrb[0].mxu1 %v464_v52  ;;  %v7717_v15 = vrot.slane %v6059_v34, 1  ;;  %v6204_v36 = vmax.f32 %v266_v59, 0.0  ;;  %v762_v17 = vpack.c.bf16 %v748_v48, %v747_v45  ;;  %v451_v23 = vmul.f32 %v5790_v60, %v6119_v49  ;;  %v5178_v60 = vld [vmem:[%s7668_s27 + $0x1c8] sm:$0xff]  }
 0x125   :  { %v6185_v50 = vpop.permute.xlu1 %878  ;;  %1921 = vmatprep.mubr.bf16.mxu0 %v761_v18  ;;  %1832 = vmatprep.mubr.bf16.mxu1 %v553_v62  ;;  %v450_v26 = vmul.f32 %v5913_v13, %v6135_v54  ;;  %v603_v18 = vpop.permute.xlu0 %602  ;;  %v6217_v62 = vmax.f32 %v263_v35, 0.0  ;;  %v541_v33 = vmul.f32 %v5859_v39, %v6005_v6  ;;  %v7719_v59 = vrot.slane %v6005_v6, 7 }
 0x126   :  { %v6196_v51 = vsel %vm576_vm0, %v7717_v15, %v7716_v4  ;;  %v7718_v12 = vmov %v7717_v15  ;;  %1922 = vmatmul.mubr.bf16.vlgmr.msra.gmra.mrb[16].mxu0 %v673_v42  ;;  %5083 = vset.pattern.permute.xlu1 %v7694_v5  ;;  %v7720_v35 = vrot.slane %v6052_v20, 7  ;;  %v540_v39 = vmul.f32 %v5813_v9, %v6052_v20  ;;  %v5163_v4 = vld [vmem:[%s7668_s27 + $0x108] sm:$0xff]  }
 0x127   :  { %v6202_v63 = vsel %vm576_vm0, %v561_v47, %v7718_v12  ;;  %v5177_v47 = vld [vmem:[%s7668_s27 + $0x180] sm:$0xff]   ;;  %1929 = vmatprep.mubr.bf16.mxu0 %v762_v17  ;;  %826 = vperm.xlu1 %5083, %v6170_v61   ;;  %v660_v13 = vmul.f32 %v5989_v14, %v6196_v51  ;;  %v750_v48 = vmul.f32 %v6062_v24, %v6039_v57  ;;  %v339_v14 = vrot.slane %v6217_v62, 7  ;;  %v6256_v24 = vld [vmem:[%s7665_s26 + $0x78] sm:$0xff] }
 0x128   :  { %v659_v5 = vmul.f32 %v603_v18, %v6202_v63  ;;  %v6234_v45 = vsel %vm351_vm1, %v7720_v35, %v7719_v59  ;;  %4486 = vmatpush3.bf16.msra.mxu1 %v5161_v58  ;;  %v340_v52 = vrot.slane %v6204_v36, 7  ;;  %v465_v9 = vpack.c.bf16 %v451_v23, %v450_v26  ;;  %4550 = vmatpush3.bf16.msra.mxu0 %v5177_v47 }
 0x129   :  { %7721 = vst [vmem:[#allocation39_spill] sm:$0xff] %v6234_v45  ;;  %v749_v43 = vmul.f32 %v5954_v16, %v6234_v45  ;;  %4487 = vmatprep.subr.bf16.mxu1 %v5162_v27  ;;  %v5164_v16 = vld [vmem:[%s7668_s27 + $0x150] sm:$0xff]   ;;  %v554_v58 = vpack.c.bf16 %v541_v33, %v540_v39  ;;  %4551 = vmatprep.subr.bf16.mxu0 %v5178_v60  ;;  %v7722_v17 = vrot.slane %v6005_v6, 1  ;;  %v7723_v27 = vrot.slane %v6052_v20, 1 }
 0x12a   :  { %v791_v42 = vpop.permute.xlu1 %790  ;;  %v674_v12 = vpack.c.bf16 %v660_v13, %v659_v5  ;;  %v574_v47 = vrot.slane %v6069_v8, 1  ;;  %v271_v18 = vadd.f32 %v5983_v30, %v6017_v37  ;;  %v6276_v60 = vsel %vm351_vm1, %v339_v14, %v340_v52  ;;  %v5165_v5 = vld [vmem:[%s7668_s27 + $0x110] sm:$0xff]  }
 0x12b   :  { %v6248_v15 = vmul.f32 %v791_v42, %v6009_v11  ;;  %830 = vperm.xlu1 %5083, %v6256_v24   ;;  %v6265_v23 = vsel %vm576_vm0, %v7723_v27, %v7722_v17  ;;  %v763_v33 = vpack.c.bf16 %v750_v48, %v749_v43  ;;  %7724 = vst [vmem:[#allocation40_spill] sm:$0xff] %v6276_v60  ;;  %v7725_v59 = vrot.slane %v6009_v11, 7  ;;  %v5166_v43 = vld [vmem:[%s7668_s27 + $0x158] sm:$0xff]   ;;  %v615_v48 = vpop.permute.xlu0 %614 }
 0x12c   :  { %1833 = vmatmul.mubr.bf16.gmra.mrb[4].mxu1 %v465_v9  ;;  %v752_v35 = vmul.f32 %v5962_v3, %v6276_v60  ;;  %v453_v39 = vmul.f32 %v5852_v29, %v6234_v45  ;;  %v7727_v42 = vmov 7   ;;  %v7728_v9 = vrot.slane %v6081_v55, 1  ;;  %v5179_v29 = vld [vmem:[%s7668_s27 + $0x188] sm:$0xff]  }
 0x12d   :  { %1840 = vmatprep.mubr.bf16.mxu1 %v554_v58  ;;  %4488 = vmatpush3.bf16.msra.mxu1 %v5163_v4  ;;  %v6285_v37 = vsel %vm351_vm1, %v7725_v59, %v339_v14  ;;  %v542_v14 = vmul.f32 %v5868_v41, %v6009_v11  ;;  %v662_v58 = vmul.f32 %v615_v48, %v6047_v53  ;;  %v7645_v17 = vrot.slane %v6204_v36, 1 }
 0x12e   :  { %1930 = vmatmul.mubr.bf16.gmra.mrb[20].mxu0 %v674_v12  ;;  %7726 = vst [vmem:[#allocation41_spill] sm:$0xff] %v6285_v37  ;;  %4489 = vmatprep.subr.bf16.mxu1 %v5164_v16  ;;  %v6302_v3 = vsel %vm576_vm0, %v574_v47, %v7728_v9  ;;  %v661_v16 = vmul.f32 %v6094_v44, %v6265_v23  ;;  %v6313_v12 = vld [vmem:[%s7665_s26 + $0x8] sm:$0xff]  ;;  %v566_v44 = vrot.slane %v6217_v62, 1  ;;  %v6325_v59 = vmax.f32 %v271_v18, 0.0  ;;  %v5180_v18 = vld [vmem:[%s7668_s27 + $0x1d0] sm:$0xff]  }
 0x12f   :  { %v707_v13 = vpop.permute.xlu1 %706  ;;  %1937 = vmatprep.mubr.bf16.mxu0 %v763_v33  ;;  %5084 = vset.pattern.permute.xlu1 %v7727_v42  ;;  %v452_v41 = vmul.f32 %v5833_v22, %v6109_v25  ;;  %v543_v27 = vmul.f32 %v5857_v38, %v6217_v62  ;;  %v5168_v22 = vld [vmem:[%s7668_s27 + $0x160] sm:$0xff]   ;;  %v7729_v38 = vrot.slane %v6091_v46, 1 }
 0x130   :  { %v751_v4 = vmul.f32 %v707_v13, %v6285_v37  ;;  %1038 = vperm.xlu1 %5084, %v6313_v12   ;;  %v5167_v13 = vld [vmem:[%s7668_s27 + $0x118] sm:$0xff]   ;;  %4552 = vmatpush3.bf16.msra.mxu0 %v5179_v29  ;;  %v5169_v29 = vld [vmem:[%s7668_s27 + $0x120] sm:$0xff]  }
 0x131   :  { %4490 = vmatpush3.bf16.msra.mxu1 %v5165_v5  ;;  %v466_v33 = vpack.c.bf16 %v453_v39, %v452_v41  ;;  %v555_v26 = vpack.c.bf16 %v543_v27, %v542_v14  ;;  %v6334_v5 = vsel %vm576_vm0, %v7729_v38, %v574_v47  ;;  %v675_v39 = vpack.c.bf16 %v662_v58, %v661_v16  ;;  %v5371_v47 = vld [vmem:[%s7665_s26] sm:$0xff] }
 0x132   :  { %4491 = vmatprep.subr.bf16.mxu1 %v5166_v43  ;;  %v764_v48 = vpack.c.bf16 %v752_v35, %v751_v4  ;;  %v7730_v43 = vmov 6   ;;  %v6344_v35 = vsel %vm576_vm0, %v566_v44, %v7645_v17  ;;  %v5181_v4 = vld [vmem:[%s7668_s27 + $0x190] sm:$0xff]   ;;  %v455_v14 = vmul.f32 %v5864_v40, %v6285_v37  ;;  %4553 = vmatprep.subr.bf16.mxu0 %v5180_v18 }
 0x133   :  { %v274_v16 = vadd.f32 %v5983_v30, %v6027_v31  ;;  %v7731_v58 = vrot.slane %v6009_v11, 1  ;;  %v545_v27 = vmul.f32 %v5876_v10, %v6325_v59  ;;  %v341_v40 = vrot.slane %v6325_v59, 7  ;;  %v5182_v31 = vld [vmem:[%s7668_s27 + $0x1d8] sm:$0xff]  }
 0x134   :  { %v619_v9 = vpop.permute.xlu1 %618  ;;  %5085 = vset.pattern.permute.xlu1 %v7730_v43  ;;  %1841 = vmatmul.mubr.bf16.gmra.mrb[8].mxu1 %v466_v33  ;;  %v5170_v33 = vld [vmem:[%s7668_s27 + $0x168] sm:$0xff]   ;;  %v7732_v10 = vmov 8  }
 0x135   :  { %946 = vperm.xlu1 %5085, %v5371_v47   ;;  %1848 = vmatprep.mubr.bf16.mxu1 %v555_v26  ;;  %v6363_v26 = vsel %vm576_vm0, %v7731_v58, %v566_v44 }
 0x136   :  { %1938 = vmatmul.mubr.bf16.gmra.mrb[24].mxu0 %v675_v39  ;;  %4492 = vmatpush3.bf16.msra.mxu1 %v5167_v13  ;;  %v663_v13 = vmul.f32 %v619_v9, %v6363_v26  ;;  %v5183_v39 = vld [vmem:[%s7668_s27 + $0x198] sm:$0xff]   ;;  %v467_v9 = vpack.c.bf16 %v455_v14, %v6181_v32  ;;  %v5185_v32 = vld [vmem:[%s7668_s27 + $0x1e0] sm:$0xff]   ;;  %v5172_v14 = vld [vmem:[%s7668_s27 + $0x170] sm:$0xff]  }
 0x137   :  { %1945 = vmatprep.mubr.bf16.mxu0 %v764_v48  ;;  %4493 = vmatprep.subr.bf16.mxu1 %v5168_v22  ;;  %v279_v48 = vadd.f32 %v6014_v2, %v5983_v30  ;;  %v7733_v22 = vld [vmem:[#allocation2_spill] sm:$0xff]  ;;  %v6391_v2 = vsel %vm351_vm1, %v340_v52, %v341_v40 }
 0x138   :  { %v623_v41 = vpop.permute.xlu1 %622  ;;  %v544_v38 = vmul.f32 %v7733_v22, %v6204_v36  ;;  %4554 = vmatpush3.bf16.msra.mxu0 %v5181_v4  ;;  %7734 = vst [vmem:[#allocation2_spill] sm:$0xff] %v6391_v2  ;;  %v5171_v4 = vld [vmem:[%s7668_s27 + $0x128] sm:$0xff]   ;;  %v5186_v52 = vld [vmem:[%s7668_s27 + $0x1a0] sm:$0xff]   ;;  %v5173_v22 = vld [vmem:[%s7668_s27 + $0x130] sm:$0xff]  }
 0x139   :  { %v664_v44 = vmul.f32 %v623_v41, %v6344_v35  ;;  %5087 = vset.pattern.permute.xlu1 %v7732_v10  ;;  %v6385_v41 = vmax.f32 %v274_v16, 0.0  ;;  %4555 = vmatprep.subr.bf16.mxu0 %v5182_v31  ;;  %v7735_v16 = vld [vmem:[#allocation5_spill] sm:$0xff]  ;;  %v7736_v31 = vld [vmem:[#allocation4_spill] sm:$0xff] }
 0x13a   :  { %1122 = vperm.xlu1 %5087, %v5371_v47   ;;  %4494 = vmatpush3.bf16.msra.mxu1 %v5169_v29  ;;  %v556_v18 = vpack.c.bf16 %v545_v27, %v544_v38  ;;  %v6404_v29 = vmax.f32 %v279_v48, 0.0  ;;  %v457_v27 = vmul.f32 %v7735_v16, %v6391_v2 }
 0x13b   :  { %v676_v58 = vpack.c.bf16 %v664_v44, %v663_v13  ;;  %4495 = vmatprep.subr.bf16.mxu1 %v5170_v33  ;;  %v5188_v33 = vld [vmem:[%s7668_s27 + $0x1e8] sm:$0xff]   ;;  %v546_v13 = vmul.f32 %v7736_v31, %v6385_v41  ;;  %v342_v44 = vrot.slane %v6385_v41, 7  ;;  %v627_v31 = vpop.permute.xlu0 %626 }
 0x13c   :  { %1849 = vmatmul.mubr.bf16.gmra.mrb[12].mxu1 %v467_v9  ;;  %4556 = vmatpush3.bf16.msra.mxu0 %v5183_v39  ;;  %v7644_v48 = vrot.slane %v6404_v29, 7  ;;  %v5174_v39 = vld [vmem:[%s7668_s27 + $0x178] sm:$0xff]  }
 0x13d   :  { %v6399_v47 = vpop.permute.xlu1 %886  ;;  %1856 = vmatprep.mubr.bf16.mxu1 %v556_v18  ;;  %4557 = vmatprep.subr.bf16.mxu0 %v5185_v32  ;;  %v5189_v32 = vld [vmem:[%s7668_s27 + $0x1a8] sm:$0xff]  }
 0x13e   :  { %1946 = vmatmul.mubr.bf16.gmra.mrb[28].mxu0 %v676_v58  ;;  %1126 = vperm.xlu1 %5087, %v6313_v12   ;;  %v7737_v12 = vld [vmem:[#allocation3_spill] sm:$0xff] }
 0x13f   :  { %4496 = vmatpush3.bf16.msra.mxu1 %v5171_v4  ;;  %v456_v38 = vmul.f32 %v7737_v12, %v6276_v60  ;;  %v7738_v58 = vld [vmem:[#allocation27_spill] sm:$0xff]  ;;  %v7739_v4 = vld [vmem:[#allocation6_spill] sm:$0xff] }
 0x140   :  { %4497 = vmatprep.subr.bf16.mxu1 %v5172_v14  ;;  %v282_v9 = vadd.f32 %v7738_v58, %v5983_v30  ;;  %v547_v16 = vmul.f32 %v7739_v4, %v6404_v29  ;;  %4558 = vmatpush3.bf16.msra.mxu0 %v5186_v52  ;;  %v5372_v14 = vld [vmem:[%s7665_s26 + $0x18] sm:$0xff]  ;;  %v5191_v30 = vld [vmem:[%s7668_s27 + $0x1f0] sm:$0xff]   ;;  %v6444_v52 = vsel %vm351_vm1, %v341_v40, %v342_v44 }
 0x141   :  { %v468_v12 = vpack.c.bf16 %v457_v27, %v456_v38  ;;  %4559 = vmatprep.subr.bf16.mxu0 %v5188_v33  ;;  %7740 = vst [vmem:[#allocation5_spill] sm:$0xff] %v6444_v52  ;;  %v6450_v4 = vsel %vm351_vm1, %v342_v44, %v7644_v48  ;;  %v5175_v27 = vld [vmem:[%s7668_s27 + $0x138] sm:$0xff]   ;;  %v6458_v33 = vld [vmem:[%s7668_s27 + $0x200] sm:$0xff]  }
 0x142   :  { %v6429_v18 = vpop.permute.xlu1 %794  ;;  %1134 = vperm.xlu1 %5087, %v5372_v14   ;;  %v557_v58 = vpack.c.bf16 %v547_v16, %v546_v13  ;;  %v6460_v40 = vmax.f32 %v282_v9, 0.0  ;;  %v5192_v13 = vld [vmem:[%s7668_s27 + $0x1b0] sm:$0xff]   ;;  %v5194_v9 = vld [vmem:[%s7668_s27 + $0x1f8] sm:$0xff]  }
 0x143   :  { %4498 = vmatpush3.bf16.msra.mxu1 %v5173_v22  ;;  %v7741_v22 = vld [vmem:[#allocation14_spill] sm:$0xff] }
 0x144   :  { %1857 = vmatmul.mubr.bf16.gmra.mrb[16].mxu1 %v468_v12  ;;  %4499 = vmatprep.subr.bf16.mxu1 %v5174_v39  ;;  %v458_v38 = vmul.f32 %v7741_v22, %v6444_v52  ;;  %v7742_v39 = vld [vmem:[#allocation8_spill] sm:$0xff]  ;;  %v7743_v12 = vld [vmem:[#allocation33_spill] sm:$0xff]  ;;  %v6479_v22 = vpop.permute.xlu0 %638  ;;  %v548_v60 = vmul.f32 %v7745_v56, %v6460_v40  ;;  %v344_v37 = vrot.slane %v6460_v40, 7 }
 0x145   :  { %1864 = vmatprep.mubr.bf16.mxu1 %v557_v58  ;;  %4560 = vmatpush3.bf16.msra.mxu0 %v5189_v32  ;;  %v459_v16 = vmul.f32 %v7742_v39, %v6450_v4  ;;  %v5373_v32 = vld [vmem:[%s7665_s26 + $0x10] sm:$0xff]  ;;  %v7744_v58 = vld [vmem:[#allocation7_spill] sm:$0xff]  ;;  %v345_v17 = vrot.slane %v7743_v12, 7  ;;  %v568_v39 = vrot.slane %v6325_v59, 1 }
 0x146   :  { %5089 = vset.pattern.permute.xlu1 %v7727_v42  ;;  %4561 = vmatprep.subr.bf16.mxu0 %v5191_v30  ;;  %v549_v48 = vmul.f32 %v7744_v58, %v7743_v12  ;;  %v5195_v58 = vld [vmem:[%s7668_s27 + $0x1b8] sm:$0xff]  }
 0x147   :  { %v715_v44 = vpop.permute.xlu1 %714  ;;  %1042 = vperm.xlu1 %5089, %v5373_v32   ;;  %4500 = vmatpush3.bf16.msra.mxu1 %v5175_v27  ;;  %v469_v27 = vpack.c.bf16 %v459_v16, %v458_v38  ;;  %v6495_v56 = vsel %vm351_vm1, %v344_v37, %v345_v17 }
 0x148   :  { %4769 = vmatprep.subr.bf16.mxu1 %v6458_v33  ;;  %v753_v11 = vmul.f32 %v715_v44, %v6391_v2  ;;  %v558_v30 = vpack.c.bf16 %v549_v48, %v548_v60  ;;  %v7747_v44 = vrot.slane %v6385_v41, 1  ;;  %v7748_v60 = vrot.slane %v6404_v29, 7  ;;  %v6515_v16 = vpop.permute.xlu0 %650 }
 0x149   :  { %4562 = vmatpush3.bf16.msra.mxu0 %v5192_v13  ;;  %v7746_v13 = vrot.slane %v6204_v36, 1 }
 0x14a   :  { %4563 = vmatprep.subr.bf16.mxu0 %v5194_v9  ;;  %v6513_v48 = vsel %vm351_vm1, %v7748_v60, %v344_v37  ;;  %v7752_v37 = vld [vmem:[#allocation11_spill] sm:$0xff] }
 0x14b   :  { %v719_v57 = vpop.permute.xlu1 %718  ;;  %5090 = vset.pattern.permute.xlu1 %v7730_v43  ;;  %v6501_v25 = vsel %vm576_vm0, %v7746_v13, %v568_v39  ;;  %7749 = vst [vmem:[#allocation4_spill] sm:$0xff] %v6513_v48 }
 0x14c   :  { %v754_v45 = vmul.f32 %v719_v57, %v6444_v52  ;;  %954 = vperm.xlu1 %5090, %v5373_v32   ;;  %1865 = vmatmul.mubr.bf16.gmra.mrb[20].mxu1 %v469_v27  ;;  %v6507_v57 = vsel %vm576_vm0, %v568_v39, %v7747_v44  ;;  %v665_v9 = vmul.f32 %v627_v31, %v6501_v25  ;;  %v7751_v39 = vld [vmem:[#allocation9_spill] sm:$0xff] }
 0x14d   :  { %1872 = vmatprep.mubr.bf16.mxu1 %v558_v30  ;;  %4564 = vmatpush3.bf16.msra.mxu0 %v5195_v58  ;;  %v346_v30 = vrot.slane %v6091_v46, 7  ;;  %v550_v27 = vmul.f32 %v7751_v39, %v6091_v46  ;;  %v460_v58 = vmul.f32 %v7752_v37, %v6513_v48  ;;  %v7753_v44 = vld [vmem:[#allocation13_spill] sm:$0xff] }
 0x14e   :  { %v765_v38 = vpack.c.bf16 %v754_v45, %v753_v11  ;;  %v7750_v11 = vld [vmem:[#allocation12_spill] sm:$0xff]  ;;  %v551_v60 = vmul.f32 %v7753_v44, %v6069_v8  ;;  %v7757_v37 = vld [vmem:[#allocation17_spill] sm:$0xff] }
 0x14f   :  { %v461_v45 = vmul.f32 %v7750_v11, %v6495_v56  ;;  %v6530_v11 = vsel %vm351_vm1, %v345_v17, %v346_v30  ;;  %v7755_v17 = vld [vmem:[#allocation16_spill] sm:$0xff] }
 0x150   :  { %v631_v32 = vpop.permute.xlu1 %630  ;;  %1953 = vmatprep.mubr.bf16.mxu0 %v765_v38  ;;  %958 = vperm.xlu1 %5090, %v5372_v14   ;;  %v559_v2 = vpack.c.bf16 %v551_v60, %v550_v27  ;;  %v7754_v38 = vrot.slane %v6069_v8, 7  ;;  %v7756_v27 = vld [vmem:[#allocation15_spill] sm:$0xff] }
 0x151   :  { %v666_v13 = vmul.f32 %v631_v32, %v6507_v57  ;;  %v470_v52 = vpack.c.bf16 %v461_v45, %v460_v58  ;;  %v859_v32 = vpop.permute.xlu0 %858  ;;  %v462_v45 = vmul.f32 %v7755_v17, %v6530_v11  ;;  %v7657_v17 = vrot.slane %v6460_v40, 1 }
 0x152   :  { %v6536_v14 = vsel %vm351_vm1, %v346_v30, %v7754_v38 }
 0x153   :  { %v677_v31 = vpack.c.bf16 %v666_v13, %v665_v9  ;;  %v5374_v9 = vld [vmem:[%s7665_s26 + $0x28] sm:$0xff]  ;;  %v463_v30 = vmul.f32 %v7756_v27, %v6536_v14  ;;  %v921_v13 = vmul.f32 %v859_v32, %v6113_v28  ;;  %v5375_v32 = vld [vmem:[%s7665_s26 + $0x20] sm:$0xff] }
 0x154   :  { %5091 = vset.pattern.permute.xlu1 %v7727_v42  ;;  %1873 = vmatmul.mubr.bf16.gmra.mrb[24].mxu1 %v470_v52  ;;  %v922_v52 = vmul.f32 %v7757_v37, %v6202_v63  ;;  %v7758_v27 = vld [vmem:[#allocation31_spill] sm:$0xff]  ;;  %v570_v37 = vrot.slane %v6404_v29, 1 }
 0x155   :  { %v6539_v39 = vpop.permute.xlu1 %890  ;;  %1054 = vperm.xlu1 %5091, %v5374_v9   ;;  %1880 = vmatprep.mubr.bf16.mxu1 %v559_v2  ;;  %v471_v44 = vpack.c.bf16 %v463_v30, %v462_v45  ;;  %v871_v2 = vpop.permute.xlu0 %870  ;;  %v7760_v30 = vld [vmem:[#allocation23_spill] sm:$0xff] }
 0x156   :  { %1954 = vmatmul.mubr.bf16.gmra.mrb[32].mxu0 %v677_v31  ;;  %v937_v60 = vpack.c.bf16 %v922_v52, %v921_v13  ;;  %v924_v31 = vmul.f32 %v871_v2, %v6265_v23  ;;  %v923_v13 = vmul.f32 %v7760_v30, %v6196_v51  ;;  %v7761_v52 = vld [vmem:[#allocation19_spill] sm:$0xff]  ;;  %v7762_v2 = vld [vmem:[#allocation22_spill] sm:$0xff] }
 0x158   :  { %v938_v6 = vpack.c.bf16 %v924_v31, %v923_v13  ;;  %v7763_v31 = vld [vmem:[#allocation28_spill] sm:$0xff] }
 0x159   :  { %5092 = vset.pattern.permute.xlu1 %v7730_v43  ;;  %v836_v13 = vmul.f32 %v7763_v31, %v6052_v20 }
 0x15a   :  { %v6552_v58 = vpop.permute.xlu1 %802  ;;  %966 = vperm.xlu1 %5092, %v5374_v9   ;;  %v7759_v9 = vld [vmem:[#allocation18_spill] sm:$0xff] }
 0x15b   :  { %v833_v45 = vmul.f32 %v7759_v9, %v7758_v27  ;;  %v5376_v9 = vld [vmem:[%s7665_s26 + $0x30] sm:$0xff]  ;;  %v7764_v27 = vrot.slane %v6385_v41, 1 }
 0x15c   :  { %1881 = vmatmul.mubr.bf16.gmra.mrb[28].mxu1 %v471_v44  ;;  %v755_v44 = vmul.f32 %v7761_v52, %v6450_v4  ;;  %v6581_v52 = vsel %vm576_vm0, %v570_v37, %v7657_v17  ;;  %v925_v17 = vmul.f32 %v6157_v7, %v6047_v53 }
 0x15d   :  { %2018 = vmatprep.mubr.bf16.mxu1 %v937_v60  ;;  %v849_v28 = vpack.c.bf16 %v7762_v2, %v833_v45  ;;  %v668_v2 = vmul.f32 %v6479_v22, %v6581_v52 }
 0x15e   :  { %v6554_v38 = vpop.permute.xlu1 %806  ;;  %5093 = vset.pattern.permute.xlu1 %v7732_v10 }
 0x15f   :  { %1138 = vperm.xlu1 %5093, %v5375_v32   ;;  %v5187_v32 = vld [vmem:[%s7668_s27 + $0x208] sm:$0xff]  }
 0x163   :  { %v727_v60 = vpop.permute.xlu1 %726  ;;  %1146 = vperm.xlu1 %5093, %v5376_v9  }
 0x164   :  { %v756_v30 = vmul.f32 %v727_v60, %v6513_v48  ;;  %2019 = vmatmul.mubr.bf16.vlgmr.msra.gmra.mrb[32].mxu1 %v849_v28  ;;  %v5190_v60 = vld [vmem:[%s7668_s27 + $0x210] sm:$0xff]   ;;  %v6595_v28 = vsel %vm576_vm0, %v7764_v27, %v570_v37  ;;  %v5193_v48 = vld [vmem:[%s7668_s27 + $0x218] sm:$0xff]  }
 0x165   :  { %2026 = vmatprep.mubr.bf16.mxu1 %v938_v6  ;;  %4770 = vmatpush3.bf16.msra.mxu1 %v6458_v33  ;;  %v926_v6 = vmul.f32 %v6185_v50, %v6363_v26  ;;  %v5377_v33 = vld [vmem:[%s7665_s26 + $0x38] sm:$0xff] }
 0x166   :  { %v766_v45 = vpack.c.bf16 %v756_v30, %v755_v44  ;;  %4771 = vmatprep.subr.bf16.mxu1 %v5187_v32  ;;  %v7765_v44 = vld [vmem:[#allocation26_spill] sm:$0xff] }
 0x167   :  { %1150 = vperm.xlu1 %5093, %v5377_v33   ;;  %v835_v30 = vmul.f32 %v7765_v44, %v6059_v34  ;;  %v939_v50 = vpack.c.bf16 %v926_v6, %v925_v17  ;;  %v5196_v17 = vld [vmem:[%s7668_s27 + $0x220] sm:$0xff]   ;;  %v7766_v6 = vpack.c.bf16 %v6248_v15, %v6055_v21  ;;  %v839_v44 = vmul.f32 %v6429_v18, %v6217_v62  ;;  %v7768_v18 = vld [vmem:[#allocation20_spill] sm:$0xff] }
 0x168   :  { %v635_v22 = vpop.permute.xlu1 %634  ;;  %1961 = vmatprep.mubr.bf16.mxu0 %v766_v45  ;;  %v929_v15 = vmul.f32 %v6539_v39, %v6507_v57  ;;  %v7769_v39 = vrot.slane %v7743_v12, 1 }
 0x169   :  { %v667_v31 = vmul.f32 %v635_v22, %v6595_v28  ;;  %4772 = vmatpush3.bf16.msra.mxu1 %v5187_v32  ;;  %v850_v27 = vpack.c.bf16 %v836_v13, %v835_v30  ;;  %v883_v22 = vpop.permute.xlu0 %882  ;;  %v928_v32 = vmul.f32 %v6399_v47, %v6501_v25  ;;  %v5378_v30 = vld [vmem:[%s7665_s26 + $0x40] sm:$0xff] }
 0x16a   :  { %4773 = vmatprep.subr.bf16.mxu1 %v5190_v60  ;;  %v927_v7 = vmul.f32 %v883_v22, %v6344_v35 }
 0x16b   :  { %v678_v37 = vpack.c.bf16 %v668_v2, %v667_v31  ;;  %5095 = vset.pattern.permute.xlu1 %v7727_v42  ;;  %v5198_v31 = vld [vmem:[%s7668_s27 + $0x230] sm:$0xff]  }
 0x16c   :  { %1062 = vperm.xlu1 %5095, %v5377_v33   ;;  %2027 = vmatmul.mubr.bf16.gmra.mrb[36].mxu1 %v850_v27  ;;  %v940_v2 = vpack.c.bf16 %v928_v32, %v927_v7  ;;  %v758_v27 = vmul.f32 %v7768_v18, %v6530_v11 }
 0x16d   :  { %v899_v45 = vpop.permute.xlu1 %898  ;;  %1962 = vmatmul.mubr.bf16.gmra.mrb[36].mxu0 %v678_v37  ;;  %2034 = vmatprep.mubr.bf16.mxu1 %v939_v50  ;;  %v895_v33 = vpop.permute.xlu0 %894  ;;  %v5379_v50 = vld [vmem:[%s7665_s26 + $0x48] sm:$0xff] }
 0x16e   :  { %4774 = vmatpush3.bf16.msra.mxu1 %v5190_v60  ;;  %v5197_v60 = vld [vmem:[%s7668_s27 + $0x228] sm:$0xff]   ;;  %v930_v21 = vmul.f32 %v895_v33, %v6595_v28 }
 0x16f   :  { %4775 = vmatprep.subr.bf16.mxu1 %v5193_v48 }
 0x170   :  { %5096 = vset.pattern.permute.xlu1 %v7730_v43  ;;  %v941_v7 = vpack.c.bf16 %v930_v21, %v929_v15 }
 0x171   :  { %v903_v13 = vpop.permute.xlu1 %902  ;;  %970 = vperm.xlu1 %5096, %v5376_v9  }
 0x172   :  { %4776 = vmatpush3.bf16.msra.mxu1 %v5193_v48  ;;  %v7767_v48 = vld [vmem:[#allocation30_spill] sm:$0xff] }
 0x173   :  { %4777 = vmatprep.subr.bf16.mxu1 %v5196_v17  ;;  %v840_v9 = vmul.f32 %v7767_v48, %v6204_v36 }
 0x174   :  { %2035 = vmatmul.mubr.bf16.gmra.mrb[40].mxu1 %v7766_v6  ;;  %v5199_v6 = vld [vmem:[%s7668_s27 + $0x238] sm:$0xff]  }
 0x175   :  { %5097 = vset.pattern.permute.xlu1 %v7727_v42  ;;  %2042 = vmatprep.mubr.bf16.mxu1 %v940_v2  ;;  %v852_v37 = vpack.c.bf16 %v840_v9, %v839_v44  ;;  %v841_v9 = vmul.f32 %v6552_v58, %v6325_v59 }
 0x176   :  { %v815_v47 = vpop.permute.xlu1 %814  ;;  %1066 = vperm.xlu1 %5097, %v5378_v30   ;;  %4778 = vmatpush3.bf16.msra.mxu1 %v5196_v17  ;;  %v7770_v17 = vrot.slane %v6460_v40, 1  ;;  %v931_v30 = vmul.f32 %v899_v45, %v6581_v52  ;;  %v907_v45 = vpop.permute.xlu0 %906 }
 0x177   :  { %4779 = vmatprep.subr.bf16.mxu1 %v5197_v60  ;;  %v844_v58 = vmul.f32 %v815_v47, %v6460_v40 }
 0x178   :  { %v6650_v2 = vsel %vm576_vm0, %v7770_v17, %v7769_v39 }
 0x179   :  { %v932_v44 = vmul.f32 %v903_v13, %v6650_v2 }
 0x17a   :  { %1070 = vperm.xlu1 %5097, %v5379_v50   ;;  %4780 = vmatpush3.bf16.msra.mxu1 %v5197_v60  ;;  %v842_v60 = vmul.f32 %v6554_v38, %v6385_v41 }
 0x17b   :  { %v731_v22 = vpop.permute.xlu1 %730  ;;  %4781 = vmatprep.subr.bf16.mxu1 %v5198_v31  ;;  %v942_v15 = vpack.c.bf16 %v932_v44, %v931_v30  ;;  %v919_v30 = vpop.permute.xlu0 %918 }
 0x17c   :  { %v757_v32 = vmul.f32 %v731_v22, %v6495_v56  ;;  %2043 = vmatmul.mubr.bf16.gmra.mrb[44].mxu1 %v852_v37  ;;  %v853_v21 = vpack.c.bf16 %v842_v60, %v841_v9  ;;  %v5380_v22 = vld [vmem:[%s7665_s26 + $0x50] sm:$0xff] }
 0x17d   :  { %2050 = vmatprep.mubr.bf16.mxu1 %v941_v7 }
 0x17e   :  { %v767_v33 = vpack.c.bf16 %v758_v27, %v757_v32  ;;  %5098 = vset.pattern.permute.xlu1 %v7730_v43  ;;  %4782 = vmatpush3.bf16.msra.mxu1 %v5198_v31  ;;  %v7771_v31 = vld [vmem:[#allocation32_spill] sm:$0xff] }
 0x17f   :  { %982 = vperm.xlu1 %5098, %v5379_v50   ;;  %4783 = vmatprep.subr.bf16.mxu1 %v5199_v6  ;;  %v843_v27 = vmul.f32 %v7771_v31, %v6404_v29  ;;  %v671_v31 = vmul.f32 %v6515_v16, %v6334_v5  ;;  %v5383_v16 = vld [vmem:[%s7665_s26 + $0x60] sm:$0xff] }
 0x180   :  { %v643_v48 = vpop.permute.xlu1 %642  ;;  %1969 = vmatprep.mubr.bf16.mxu0 %v767_v33  ;;  %v846_v33 = vmul.f32 %v6163_v19, %v6091_v46  ;;  %v5382_v19 = vld [vmem:[%s7665_s26 + $0x68] sm:$0xff] }
 0x181   :  { %v669_v18 = vmul.f32 %v643_v48, %v6650_v2  ;;  %v854_v39 = vpack.c.bf16 %v844_v58, %v843_v27  ;;  %v5381_v48 = vld [vmem:[%s7665_s26 + $0x58] sm:$0xff]  ;;  %v951_v58 = vpop.permute.xlu0 %950 }
 0x182   :  { %4784 = vmatpush3.bf16.msra.mxu1 %v5199_v6 }
 0x183   :  { %5099 = vset.pattern.permute.xlu1 %v7732_v10 }
 0x184   :  { %v647_v38 = vpop.permute.xlu1 %646  ;;  %1158 = vperm.xlu1 %5099, %v5379_v50   ;;  %2051 = vmatmul.mubr.bf16.gmra.mrb[48].mxu1 %v853_v21  ;;  %v933_v50 = vmul.f32 %v907_v45, %v6143_v1 }
 0x185   :  { %v670_v13 = vmul.f32 %v647_v38, %v6143_v1  ;;  %2058 = vmatprep.mubr.bf16.mxu1 %v942_v15  ;;  %v7772_v15 = vld [vmem:[#allocation37_spill] sm:$0xff] }
 0x187   :  { %v679_v37 = vpack.c.bf16 %v670_v13, %v669_v18 }
 0x188   :  { %1162 = vperm.xlu1 %5099, %v5380_v22  }
 0x189   :  { %v911_v7 = vpop.permute.xlu1 %910  ;;  %1970 = vmatmul.mubr.bf16.gmra.mrb[40].mxu0 %v679_v37 }
 0x18a   :  { %v934_v32 = vmul.f32 %v911_v7, %v6334_v5 }
 0x18c   :  { %v943_v17 = vpack.c.bf16 %v934_v32, %v933_v50  ;;  %5100 = vset.pattern.permute.xlu1 %v7727_v42  ;;  %2059 = vmatmul.mubr.bf16.gmra.mrb[52].mxu1 %v854_v39  ;;  %v1131_v32 = vpop.permute.xlu0 %1130 }
 0x18d   :  { %1074 = vperm.xlu1 %5100, %v5380_v22  }
 0x18e   :  { %v819_v47 = vpop.permute.xlu1 %818  ;;  %2066 = vmatprep.mubr.bf16.mxu1 %v943_v17 }
 0x18f   :  { %v845_v6 = vmul.f32 %v819_v47, %v7743_v12 }
 0x190   :  { %v1143_v47 = vpop.permute.xlu0 %1142 }
 0x191   :  { %v855_v60 = vpack.c.bf16 %v846_v33, %v845_v6  ;;  %5102 = vset.pattern.permute.xlu1 %v7730_v43 }
 0x192   :  { %986 = vperm.xlu1 %5102, %v5380_v22   ;;  %v7773_v22 = vld [vmem:[#allocation36_spill] sm:$0xff] }
 0x193   :  { %v739_v44 = vpop.permute.xlu1 %738  ;;  %v936_v7 = vmul.f32 %v919_v30, %v7773_v22 }
 0x194   :  { %2067 = vmatmul.mubr.bf16.gmra.mrb[56].mxu1 %v855_v60  ;;  %v759_v21 = vmul.f32 %v739_v44, %v6536_v14 }
 0x196   :  { %990 = vperm.xlu1 %5102, %v5381_v48   ;;  %v1035_v48 = vpop.permute.xlu0 %1034 }
 0x197   :  { %v743_v9 = vpop.permute.xlu1 %742 }
 0x198   :  { %v760_v38 = vmul.f32 %v743_v9, %v7772_v15  ;;  %v7774_v9 = vld [vmem:[#allocation21_spill] sm:$0xff] }
 0x199   :  { %v1097_v30 = vmul.f32 %v1035_v48, %v7774_v9 }
 0x19a   :  { %v768_v18 = vpack.c.bf16 %v760_v38, %v759_v21  ;;  %5103 = vset.pattern.permute.xlu1 %v7727_v42 }
 0x19b   :  { %1086 = vperm.xlu1 %5103, %v5382_v19  }
 0x19c   :  { %v655_v13 = vpop.permute.xlu1 %654  ;;  %1977 = vmatprep.mubr.bf16.mxu0 %v768_v18 }
 0x19d   :  { %v672_v27 = vmul.f32 %v655_v13, %v6302_v3 }
 0x19f   :  { %v680_v37 = vpack.c.bf16 %v672_v27, %v671_v31  ;;  %5105 = vset.pattern.permute.xlu1 %v7730_v43 }
 0x1a0   :  { %998 = vperm.xlu1 %5105, %v5382_v19   ;;  %v1010_v19 = vmul.f32 %v951_v58, %v6119_v49  ;;  %v7775_v58 = vld [vmem:[#allocation24_spill] sm:$0xff] }
 0x1a1   :  { %v915_v45 = vpop.permute.xlu1 %914  ;;  %1978 = vmatmul.mubr.bf16.gmra.mrb[44].mxu0 %v680_v37 }
 0x1a2   :  { %v935_v50 = vmul.f32 %v915_v45, %v6302_v3 }
 0x1a4   :  { %v944_v39 = vpack.c.bf16 %v936_v7, %v935_v50  ;;  %5106 = vset.pattern.permute.xlu1 %v7732_v10  ;;  %v1187_v50 = vmul.f32 %v1131_v32, %v6265_v23 }
 0x1a5   :  { %1170 = vperm.xlu1 %5106, %v5383_v16  }
 0x1a6   :  { %2074 = vmatprep.mubr.bf16.mxu1 %v944_v39  ;;  %v827_v17 = vpop.permute.xlu1 %826 }
 0x1a7   :  { %v847_v33 = vmul.f32 %v827_v17, %v6069_v8 }
 0x1a9   :  { %1178 = vperm.xlu1 %5106, %v6170_v61  }
 0x1aa   :  { %v831_v6 = vpop.permute.xlu1 %830 }
 0x1ab   :  { %v848_v60 = vmul.f32 %v831_v6, %v6081_v55 }
 0x1ad   :  { %v856_v44 = vpack.c.bf16 %v848_v60, %v847_v33  ;;  %1182 = vperm.xlu1 %5106, %v6256_v24   ;;  %v7776_v33 = vld [vmem:[#allocation34_spill] sm:$0xff] }
 0x1af   :  { %v1039_v10 = vpop.permute.xlu1 %1038  ;;  %2075 = vmatmul.mubr.bf16.gmra.mrb[60].mxu1 %v856_v44  ;;  %v7777_v44 = vld [vmem:[#allocation39_spill] sm:$0xff] }
 0x1b0   :  { %v1098_v21 = vmul.f32 %v1039_v10, %v6059_v34  ;;  %v7778_v10 = vld [vmem:[#allocation25_spill] sm:$0xff] }
 0x1b1   :  { %5108 = vset.pattern.permute.xlu1 %v7727_v42 }
 0x1b2   :  { %v1113_v38 = vpack.c.bf16 %v1098_v21, %v1097_v30  ;;  %1094 = vperm.xlu1 %5108, %v6256_v24   ;;  %v1047_v24 = vpop.permute.xlu0 %1046 }
 0x1b4   :  { %v947_v18 = vpop.permute.xlu1 %946  ;;  %2115 = vmatprep.mubr.bf16.mxu0 %v1113_v38 }
 0x1b5   :  { %v1009_v13 = vmul.f32 %v947_v18, %v6135_v54  ;;  %v7779_v18 = vld [vmem:[#allocation29_spill] sm:$0xff] }
 0x1b6   :  { %5109 = vset.pattern.permute.xlu1 %v7730_v43  ;;  %v1051_v39 = vpop.permute.xlu0 %1050 }
 0x1b7   :  { %v1025_v31 = vpack.c.bf16 %v1010_v19, %v1009_v13  ;;  %1002 = vperm.xlu1 %5109, %v6170_v61   ;;  %v1100_v61 = vmul.f32 %v1047_v24, %v7775_v58  ;;  %v1101_v9 = vmul.f32 %v1051_v39, %v7778_v10  ;;  %v7780_v13 = vld [vmem:[#allocation41_spill] sm:$0xff] }
 0x1b8   :  { %v6752_v39 = vld [vmem:[%s7597_s9 + $0x10] ss:$8 sps:$4 sm:$0xff]  }
 0x1b9   :  { %v1123_v27 = vpop.permute.xlu1 %1122  ;;  %2116 = vmatmul.mubr.bf16.vlgmr.msra.gmra.mrb[48].mxu0 %v1025_v31 }
 0x1ba   :  { %v1185_v34 = vmul.f32 %v1123_v27, %v6202_v63 }
 0x1bd   :  { %v1127_v37 = vpop.permute.xlu1 %1126 }
 0x1be   :  { %v1186_v42 = vmul.f32 %v1127_v37, %v6196_v51  ;;  %v1059_v51 = vpop.permute.xlu0 %1058 }
 0x1c0   :  { %v1201_v45 = vpack.c.bf16 %v1186_v42, %v1185_v34  ;;  %v1190_v34 = vmul.f32 %v1143_v47, %v6344_v35  ;;  %v6734_v35 = vld [vmem:[%s7597_s9] ss:$8 sps:$4 sm:$0xff]  }
 0x1c1   :  { %v1135_v7 = vpop.permute.xlu1 %1134 }
 0x1c2   :  { %v1188_v49 = vmul.f32 %v1135_v7, %v6047_v53  ;;  %4785 = vmatprep.mubr.bf16.mxu1 %v1201_v45  ;;  %v6717_v53 = vpop.permute.xlu0 %1078 }
 0x1c4   :  { %v1202_v54 = vpack.c.bf16 %v1188_v49, %v1187_v50  ;;  %v5200_v50 = vld [vmem:[%s7781_s2] sm:$0xff]  }
 0x1c6   :  { %v1043_v43 = vpop.permute.xlu1 %1042  ;;  %4786 = vmatmul.mubr.bf16.vlgmr.msra.gmra.mrb[64].mxu1 %v1202_v54 }
 0x1c7   :  { %v1099_v16 = vmul.f32 %v1043_v43, %v6052_v20  ;;  %v963_v20 = vpop.permute.xlu0 %962 }
 0x1c8   :  { %v1013_v19 = vmul.f32 %v963_v20, %v7779_v18 }
 0x1c9   :  { %v1114_v17 = vpack.c.bf16 %v1100_v61, %v1099_v16  ;;  %v6757_v16 = vld [vmem:[%s7597_s9 + $0x14] ss:$8 sps:$4 sm:$0xff]  }
 0x1cb   :  { %v955_v63 = vpop.permute.xlu1 %954  ;;  %2123 = vmatprep.mubr.bf16.mxu0 %v1114_v17  ;;  %v975_v58 = vpop.permute.xlu0 %974 }
 0x1cc   :  { %v1011_v60 = vmul.f32 %v955_v63, %v7776_v33  ;;  %v6772_v63 = vld [vmem:[%s7597_s9 + $0x20] ss:$8 sps:$4 sm:$0xff]   ;;  %v5212_v33 = vld [vmem:[%s7781_s2 + $0x18] sm:$0xff]  }
 0x1cf   :  { %v959_v6 = vpop.permute.xlu1 %958 }
 0x1d0   :  { %v1012_v23 = vmul.f32 %v959_v6, %v7777_v44 }
 0x1d2   :  { %v1026_v32 = vpack.c.bf16 %v1012_v23, %v1011_v60  ;;  %v7782_v60 = vld [vmem:[#allocation2_spill] sm:$0xff]  ;;  %v7783_v23 = vld [vmem:[#allocation40_spill] sm:$0xff] }
 0x1d3   :  { %v1016_v44 = vmul.f32 %v975_v58, %v7782_v60  ;;  %v5224_v60 = vld [vmem:[%s7781_s2 + $0x30] sm:$0xff]  }
 0x1d4   :  { %v1055_v48 = vpop.permute.xlu1 %1054  ;;  %2124 = vmatmul.mubr.bf16.gmra.mrb[52].mxu0 %v1026_v32 }
 0x1d5   :  { %v1102_v30 = vmul.f32 %v1055_v48, %v6217_v62  ;;  %v5393_v62 = vmov 0.0   ;;  %v979_v48 = vpop.permute.xlu0 %978 }
 0x1d6   :  { %4801 = vmatprep.subr.bf16.mxu0 %v5393_v62 }
 0x1d7   :  { %v1115_v21 = vpack.c.bf16 %v1102_v30, %v1101_v9  ;;  %4802 = vmatpush3.bf16.msra.mxu0 %v5200_v50  ;;  %v6790_v9 = vld [vmem:[%s7597_s9 + $0x30] ss:$8 sps:$4 sm:$0xff]  }
 0x1d8   :  { %4803 = vmatprep.subr.bf16.mxu0 %v5393_v62 }
 0x1d9   :  { %v967_v38 = vpop.permute.xlu1 %966  ;;  %2131 = vmatprep.mubr.bf16.mxu0 %v1115_v21  ;;  %v5216_v21 = vld [vmem:[%s7781_s2 + $0x20] sm:$0xff]   ;;  %v6803_v18 = vpop.permute.xlu0 %994 }
 0x1da   :  { %v1014_v31 = vmul.f32 %v967_v38, %v7780_v13  ;;  %v6801_v38 = vld [vmem:[%s7597_s9 + $0x44] ss:$8 sps:$4 sm:$0xff]  }
 0x1dc   :  { %v1027_v27 = vpack.c.bf16 %v1014_v31, %v1013_v19  ;;  %v6808_v19 = vld [vmem:[%s7598_s5] ss:$0 sm:$0xff] }
 0x1dd   :  { %v6814_v31 = vld [vmem:[%s7597_s9 + $0x40] ss:$8 sps:$4 sm:$0xff]  }
 0x1de   :  { %v1139_v37 = vpop.permute.xlu1 %1138  ;;  %2132 = vmatmul.mubr.bf16.gmra.mrb[56].mxu0 %v1027_v27 }
 0x1df   :  { %v1189_v42 = vmul.f32 %v1139_v37, %v6363_v26  ;;  %v6739_v26 = vld [vmem:[%s7597_s9 + $0x4] ss:$8 sps:$4 sm:$0xff]  }
 0x1e0   :  { %2509 = vmatprep.subr.bf16.mxu1 %v6739_v26 }
 0x1e1   :  { %v1203_v45 = vpack.c.bf16 %v1190_v34, %v1189_v42  ;;  %2510 = vmatpush1.bf16.msra.mxu1 %v6734_v35  ;;  %v6820_v42 = vld [vmem:[%s7597_s9 + $0x54] ss:$8 sps:$4 sm:$0xff]  }
 0x1e2   :  { %v1147_v24 = vpop.permute.xlu1 %1146  ;;  %2511 = vmatprep.subr.bf16.mxu1 %v6757_v16 }
 0x1e3   :  { %4789 = vmatprep.mubr.bf16.mxu1 %v1203_v45  ;;  %v1191_v49 = vmul.f32 %v1147_v24, %v6501_v25  ;;  %v5204_v25 = vld [vmem:[%s7781_s2 + $0x8] sm:$0xff]  }
 0x1e4   :  { %4804 = vmatpush3.bf16.msra.mxu0 %v5204_v25 }
 0x1e5   :  { %4805 = vmatprep.subr.bf16.mxu0 %v5393_v62  ;;  %2512 = vmatpush1.bf16.msra.mxu1 %v6752_v39 }
 0x1e6   :  { %v1151_v7 = vpop.permute.xlu1 %1150 }
 0x1e7   :  { %v1192_v54 = vmul.f32 %v1151_v7, %v6507_v57  ;;  %v1103_v57 = vmul.f32 %v1059_v51, %v6204_v36  ;;  %v5208_v36 = vld [vmem:[%s7781_s2 + $0x10] sm:$0xff]  }
 0x1e8   :  { %v6777_v51 = vld [vmem:[%s7597_s9 + $0x34] ss:$8 sps:$4 sm:$0xff]   ;;  %4806 = vmatpush3.bf16.msra.mxu0 %v5208_v36 }
 0x1e9   :  { %v1204_v47 = vpack.c.bf16 %v1192_v54, %v1191_v49  ;;  %4807 = vmatprep.subr.bf16.mxu0 %v5393_v62  ;;  %v5220_v49 = vld [vmem:[%s7781_s2 + $0x28] sm:$0xff]  }
 0x1eb   :  { %v1063_v43 = vpop.permute.xlu1 %1062  ;;  %4790 = vmatmul.mubr.bf16.gmra.mrb[68].mxu1 %v1204_v47 }
 0x1ec   :  { %v1104_v61 = vmul.f32 %v1063_v43, %v6325_v59  ;;  %v6766_v59 = vld [vmem:[%s7597_s9 + $0x24] ss:$8 sps:$4 sm:$0xff]   ;;  %4808 = vmatpush3.bf16.msra.mxu0 %v5212_v33 }
 0x1ed   :  { %2513 = vmatprep.subr.bf16.mxu1 %v6766_v59  ;;  %4809 = vmatprep.subr.bf16.mxu0 %v5393_v62 }
 0x1ee   :  { %v1116_v17 = vpack.c.bf16 %v1104_v61, %v1103_v57  ;;  %2514 = vmatpush1.bf16.msra.mxu1 %v6772_v63 }
 0x1ef   :  { %2515 = vmatprep.subr.bf16.mxu1 %v6777_v51 }
 0x1f0   :  { %v971_v6 = vpop.permute.xlu1 %970  ;;  %2139 = vmatprep.mubr.bf16.mxu0 %v1116_v17  ;;  %4810 = vmatpush3.bf16.msra.mxu0 %v5216_v21  ;;  %v6841_v17 = vld [vmem:[%s7597_s9 + $0x64] ss:$8 sps:$4 sm:$0xff]  }
 0x1f1   :  { %v1015_v32 = vmul.f32 %v971_v6, %v7783_v23  ;;  %4811 = vmatprep.subr.bf16.mxu0 %v5393_v62 }
 0x1f2   :  { %2516 = vmatpush1.bf16.msra.mxu1 %v6790_v9 }
 0x1f3   :  { %v1028_v10 = vpack.c.bf16 %v1016_v44, %v1015_v32  ;;  %2517 = vmatprep.subr.bf16.mxu1 %v6801_v38  ;;  %v7784_v44 = vld [vmem:[#allocation5_spill] sm:$0xff] }
 0x1f4   :  { %4812 = vmatpush3.bf16.msra.mxu0 %v5220_v49  ;;  %v1017_v23 = vmul.f32 %v979_v48, %v7784_v44 }
 0x1f5   :  { %v1067_v30 = vpop.permute.xlu1 %1066  ;;  %2140 = vmatmul.mubr.bf16.gmra.mrb[60].mxu0 %v1028_v10  ;;  %4813 = vmatprep.subr.bf16.mxu0 %v5393_v62 }
 0x1f6   :  { %v1105_v45 = vmul.f32 %v1067_v30, %v6385_v41  ;;  %2518 = vmatpush1.bf16.msra.mxu1 %v6814_v31  ;;  %v6833_v41 = vld [vmem:[%s7597_s9 + $0x50] ss:$8 sps:$4 sm:$0xff]   ;;  %v1155_v30 = vpop.permute.xlu0 %1154 }
 0x1f7   :  { %v4373_v20 = vpop.f32.mrb[0].mxu1  ;;  %2519 = vmatprep.subr.bf16.mxu1 %v6820_v42 }
 0x1f8   :  { %v4374_v13 = vpop.f32.mrb[1].mxu1  ;;  %4814 = vmatpush3.bf16.msra.mxu0 %v5224_v60 }
 0x1f9   :  { %v4375_v27 = vadd.f32 %v4374_v13, %v4373_v20  ;;  %v4437_v37 = vpop.f32.mrb[16].mxu0  ;;  %v1071_v34 = vpop.permute.xlu1 %1070  ;;  %v6856_v13 = vld [vmem:[%s7597_s9 + $0x60] ss:$8 sps:$4 sm:$0xff]   ;;  %4815 = vmatprep.subr.bf16.mxu0 %v5393_v62 }
 0x1fa   :  { %v1106_v24 = vmul.f32 %v1071_v34, %v6404_v29  ;;  %v4376_v7 = vpop.f32.mrb[2].mxu1  ;;  %v4438_v50 = vpop.f32.mrb[17].mxu0  ;;  %2520 = vmatpush1.bf16.msra.mxu1 %v6833_v41 }
 0x1fb   :  { %v1827_v54 = vadd.f32 %v4375_v27, %v6808_v19  ;;  %v4439_v47 = vadd.f32 %v4438_v50, %v4437_v37  ;;  %v4377_v43 = vpop.f32.mrb[3].mxu1  ;;  %v4440_v25 = vpop.f32.mrb[18].mxu0  ;;  %2521 = vmatprep.subr.bf16.mxu1 %v6841_v17 }
 0x1fc   :  { %v1117_v57 = vpack.c.bf16 %v1106_v24, %v1105_v45  ;;  %v4378_v58 = vadd.f32 %v4377_v43, %v4376_v7  ;;  %v4441_v61 = vpop.f32.mrb[19].mxu0  ;;  %v5228_v24 = vld [vmem:[%s7781_s2 + $0x38] sm:$0xff]   ;;  %v1167_v60 = vpop.permute.xlu0 %1166 }
 0x1fd   :  { %v6835_v29 = vadd.f32 %v4439_v47, %v1827_v54  ;;  %v4442_v36 = vadd.f32 %v4441_v61, %v4440_v25  ;;  %v6865_v7 = vld [vmem:[%s7597_s9 + $0x74] ss:$8 sps:$4 sm:$0xff]   ;;  %v1193_v25 = vmul.f32 %v1155_v30, %v6595_v28  ;;  %v6875_v61 = vld [vmem:[%s7597_s9 + $0x70] ss:$8 sps:$4 sm:$0xff]   ;;  %4816 = vmatpush3.bf16.msra.mxu0 %v5228_v24 }
 0x1fe   :  { %v1830_v6 = vadd.f32 %v4378_v58, %v6808_v19  ;;  %v983_v33 = vpop.permute.xlu1 %982  ;;  %2147 = vmatprep.mubr.bf16.mxu0 %v1117_v57  ;;  %2522 = vmatpush1.bf16.msra.mxu1 %v6856_v13 }
 0x1ff   :  { %v1018_v32 = vmul.f32 %v983_v33, %v6450_v4  ;;  %v4379_v10 = vpop.f32.mrb[4].mxu1  ;;  %2523 = vmatprep.subr.bf16.mxu1 %v6865_v7  ;;  %2558 = vmatprep.subr.bf16.mxu0 %v6739_v26 }
 0x200   :  { %v6850_v21 = vadd.f32 %v4442_v36, %v1830_v6  ;;  %v4380_v20 = vpop.f32.mrb[5].mxu1 }
 0x201   :  { %v1029_v27 = vpack.c.bf16 %v1018_v32, %v1017_v23  ;;  %v4381_v37 = vadd.f32 %v4380_v20, %v4379_v10  ;;  %v4443_v34 = vpop.f32.mrb[20].mxu0  ;;  %v4382_v48 = vpop.f32.mrb[6].mxu1  ;;  %v1196_v32 = vmul.f32 %v1167_v60, %v6143_v1  ;;  %v1108_v1 = vmul.f32 %v6717_v53, %v7743_v12 }
 0x202   :  { %v4444_v4 = vpop.f32.mrb[21].mxu0  ;;  %v4383_v45 = vpop.f32.mrb[7].mxu1  ;;  %2524 = vmatpush1.bf16.msra.mxu1 %v6875_v61 }
 0x203   :  { %v1835_v50 = vadd.f32 %v4381_v37, %v6808_v19  ;;  %v4445_v49 = vadd.f32 %v4444_v4, %v4443_v34  ;;  %v4384_v54 = vadd.f32 %v4383_v45, %v4382_v48  ;;  %v4446_v47 = vpop.f32.mrb[22].mxu0  ;;  %v1159_v43 = vpop.permute.xlu1 %1158  ;;  %2148 = vmatmul.mubr.bf16.gmra.mrb[64].mxu0 %v1029_v27 }
 0x204   :  { %v1194_v57 = vmul.f32 %v1159_v43, %v6581_v52  ;;  %v4447_v58 = vpop.f32.mrb[23].mxu0 }
 0x205   :  { %v6877_v36 = vadd.f32 %v4445_v49, %v1835_v50  ;;  %v1838_v6 = vadd.f32 %v4384_v54, %v6808_v19  ;;  %v4448_v33 = vadd.f32 %v4447_v58, %v4446_v47 }
 0x206   :  { %v1205_v44 = vpack.c.bf16 %v1194_v57, %v1193_v25 }
 0x207   :  { %v6881_v28 = vadd.f32 %v4448_v33, %v1838_v6  ;;  %v1163_v52 = vpop.permute.xlu1 %1162  ;;  %v4385_v23 = vpop.f32.mrb[8].mxu1 }
 0x208   :  { %v1195_v10 = vmul.f32 %v1163_v52, %v6650_v2  ;;  %v4386_v30 = vpop.f32.mrb[9].mxu1  ;;  %4793 = vmatprep.mubr.bf16.mxu1 %v1205_v44  ;;  %v1175_v33 = vpop.permute.xlu0 %1174 }
 0x209   :  { %v4387_v20 = vadd.f32 %v4386_v30, %v4385_v23  ;;  %v4449_v27 = vpop.f32.mrb[24].mxu0  ;;  %v4388_v37 = vpop.f32.mrb[10].mxu1 }
 0x20a   :  { %v1206_v34 = vpack.c.bf16 %v1196_v32, %v1195_v10  ;;  %v4450_v48 = vpop.f32.mrb[25].mxu0  ;;  %v4389_v4 = vpop.f32.mrb[11].mxu1 }
 0x20b   :  { %v1843_v45 = vadd.f32 %v4387_v20, %v6808_v19  ;;  %v4451_v24 = vadd.f32 %v4450_v48, %v4449_v27  ;;  %v4390_v50 = vadd.f32 %v4389_v4, %v4388_v37  ;;  %v4452_v49 = vpop.f32.mrb[26].mxu0  ;;  %v7785_v4 = vld [vmem:[#allocation4_spill] sm:$0xff] }
 0x20c   :  { %v4453_v26 = vpop.f32.mrb[27].mxu0  ;;  %v1075_v2 = vpop.permute.xlu1 %1074  ;;  %4794 = vmatmul.mubr.bf16.gmra.mrb[72].mxu1 %v1206_v34 }
 0x20d   :  { %v6890_v54 = vadd.f32 %v4451_v24, %v1843_v45  ;;  %v1846_v47 = vadd.f32 %v4390_v50, %v6808_v19  ;;  %v4454_v43 = vadd.f32 %v4453_v26, %v4452_v49  ;;  %v1107_v25 = vmul.f32 %v1075_v2, %v6460_v40 }
 0x20f   :  { %v6894_v57 = vadd.f32 %v4454_v43, %v1846_v47  ;;  %v1118_v58 = vpack.c.bf16 %v1108_v1, %v1107_v25  ;;  %v4391_v6 = vpop.f32.mrb[12].mxu1  ;;  %v1083_v47 = vpop.permute.xlu0 %1082 }
 0x210   :  { %v4392_v60 = vpop.f32.mrb[13].mxu1 }
 0x211   :  { %v4393_v44 = vadd.f32 %v4392_v60, %v4391_v6  ;;  %v4455_v52 = vpop.f32.mrb[28].mxu0  ;;  %v987_v23 = vpop.permute.xlu1 %986  ;;  %2155 = vmatprep.mubr.bf16.mxu0 %v1118_v58  ;;  %v1109_v60 = vmul.f32 %v1083_v47, %v6091_v46 }
 0x212   :  { %v4394_v12 = vpop.f32.mrb[14].mxu1  ;;  %v4456_v53 = vpop.f32.mrb[29].mxu0  ;;  %v1019_v45 = vmul.f32 %v987_v23, %v7785_v4 }
 0x213   :  { %v1851_v32 = vadd.f32 %v4393_v44, %v6808_v19  ;;  %v4457_v10 = vadd.f32 %v4456_v53, %v4455_v52  ;;  %v4395_v30 = vpop.f32.mrb[15].mxu1  ;;  %v4458_v20 = vpop.f32.mrb[30].mxu0 }
 0x214   :  { %v4396_v27 = vadd.f32 %v4395_v30, %v4394_v12  ;;  %v4459_v37 = vpop.f32.mrb[31].mxu0 }
 0x215   :  { %v6897_v40 = vadd.f32 %v4457_v10, %v1851_v32  ;;  %v4460_v34 = vadd.f32 %v4459_v37, %v4458_v20  ;;  %v991_v48 = vpop.permute.xlu1 %990  ;;  %v1021_v10 = vmul.f32 %v6803_v18, %v6530_v11 }
 0x216   :  { %v1854_v24 = vadd.f32 %v4396_v27, %v6808_v19  ;;  %v1020_v50 = vmul.f32 %v991_v48, %v6495_v56 }
 0x217   :  { %v4397_v49 = vpop.f32.mrb[16].mxu1 }
 0x218   :  { %v6902_v1 = vadd.f32 %v4460_v34, %v1854_v24  ;;  %v1030_v26 = vpack.c.bf16 %v1020_v50, %v1019_v45  ;;  %v4398_v2 = vpop.f32.mrb[17].mxu1  ;;  %v1198_v45 = vmul.f32 %v1175_v33, %v6302_v3 }
 0x219   :  { %v4399_v43 = vadd.f32 %v4398_v2, %v4397_v49  ;;  %v4400_v25 = vpop.f32.mrb[18].mxu1 }
 0x21a   :  { %v1087_v58 = vpop.permute.xlu1 %1086  ;;  %v4401_v6 = vpop.f32.mrb[19].mxu1  ;;  %2156 = vmatmul.mubr.bf16.gmra.mrb[68].mxu0 %v1030_v26 }
 0x21b   :  { %v1859_v44 = vadd.f32 %v4399_v43, %v6808_v19  ;;  %v1110_v52 = vmul.f32 %v1087_v58, %v6069_v8  ;;  %v4402_v23 = vadd.f32 %v4401_v6, %v4400_v25 }
 0x21d   :  { %v1119_v12 = vpack.c.bf16 %v1110_v52, %v1109_v60  ;;  %v1862_v56 = vadd.f32 %v4402_v23, %v6808_v19 }
 0x21f   :  { %v999_v53 = vpop.permute.xlu1 %998  ;;  %v4403_v32 = vpop.f32.mrb[20].mxu1  ;;  %2163 = vmatprep.mubr.bf16.mxu0 %v1119_v12 }
 0x220   :  { %v1022_v30 = vmul.f32 %v999_v53, %v6536_v14  ;;  %v4404_v20 = vpop.f32.mrb[21].mxu1 }
 0x221   :  { %v4405_v27 = vadd.f32 %v4404_v20, %v4403_v32  ;;  %v4406_v37 = vpop.f32.mrb[22].mxu1  ;;  %v7786_v32 = vld [vmem:[#allocation35_spill] sm:$0xff] }
 0x222   :  { %v1031_v46 = vpack.c.bf16 %v1022_v30, %v1021_v10  ;;  %v4407_v34 = vpop.f32.mrb[23].mxu1  ;;  %v1091_v30 = vpop.permute.xlu0 %1090 }
 0x223   :  { %v6912_v48 = vadd.f32 %v4405_v27, %v6808_v19  ;;  %v4408_v8 = vadd.f32 %v4407_v34, %v4406_v37 }
 0x224   :  { %v1171_v4 = vpop.permute.xlu1 %1170  ;;  %2164 = vmatmul.mubr.bf16.gmra.mrb[72].mxu0 %v1031_v46 }
 0x225   :  { %v6916_v24 = vadd.f32 %v4408_v8, %v6808_v19  ;;  %v1197_v11 = vmul.f32 %v1171_v4, %v6334_v5 }
 0x227   :  { %v1207_v18 = vpack.c.bf16 %v1198_v45, %v1197_v11  ;;  %v4409_v14 = vpop.f32.mrb[24].mxu1 }
 0x228   :  { %v1179_v50 = vpop.permute.xlu1 %1178  ;;  %v4410_v49 = vpop.f32.mrb[25].mxu1 }
 0x229   :  { %v4411_v26 = vadd.f32 %v4410_v49, %v4409_v14  ;;  %v4461_v2 = vpop.f32.mrb[32].mxu0  ;;  %v4412_v47 = vpop.f32.mrb[26].mxu1  ;;  %4797 = vmatprep.mubr.bf16.mxu1 %v1207_v18  ;;  %v1199_v60 = vmul.f32 %v1179_v50, %v7773_v22  ;;  %v1111_v22 = vmul.f32 %v1091_v30, %v6081_v55  ;;  %v7788_v18 = vmov 0   ;;  %v7789_v55 = vld [vmem:[#allocation38_spill] sm:$0xff] }
 0x22a   :  { %v4462_v43 = vpop.f32.mrb[33].mxu0  ;;  %v4413_v25 = vpop.f32.mrb[27].mxu1 }
 0x22b   :  { %v6920_v58 = vadd.f32 %v4411_v26, %v6808_v19  ;;  %v4463_v6 = vadd.f32 %v4462_v43, %v4461_v2  ;;  %v4414_v3 = vadd.f32 %v4413_v25, %v4412_v47  ;;  %v4464_v33 = vpop.f32.mrb[34].mxu0  ;;  %v2293_v26 = vld [vmem:[%s7599_s6] sm:$0x1] }
 0x22c   :  { %v4465_v52 = vpop.f32.mrb[35].mxu0  ;;  %v1183_v5 = vpop.permute.xlu1 %1182 }
 0x22d   :  { %v6923_v23 = vadd.f32 %v4463_v6, %v1859_v44  ;;  %v6926_v12 = vadd.f32 %v4414_v3, %v6808_v19  ;;  %v4466_v53 = vadd.f32 %v4465_v52, %v4464_v33  ;;  %v1200_v10 = vmul.f32 %v1183_v5, %v7786_v32  ;;  %v7787_v44 = vld [vmem:[#allocation31_spill] sm:$0xff] }
 0x22e   :  { %v2294_v3 = vpack.c.bf16 %v2293_v26, %v2293_v26 }
 0x22f   :  { %v6929_v20 = vadd.f32 %v4466_v53, %v1862_v56  ;;  %v1208_v27 = vpack.c.bf16 %v1200_v10, %v1199_v60  ;;  %v4415_v37 = vpop.f32.mrb[28].mxu1  ;;  %v1007_v56 = vpop.permute.xlu0 %1006 }
 0x230   :  { %v4416_v46 = vpop.f32.mrb[29].mxu1  ;;  %v1024_v43 = vmul.f32 %v1007_v56, %v7789_v55 }
 0x231   :  { %v4417_v34 = vadd.f32 %v4416_v46, %v4415_v37  ;;  %v1095_v8 = vpop.permute.xlu1 %1094  ;;  %v4418_v4 = vpop.f32.mrb[30].mxu1  ;;  %4798 = vmatmul.mubr.bf16.gmra.mrb[76].mxu1 %v1208_v27 }
 0x232   :  { %v1112_v45 = vmul.f32 %v1095_v8, %v7787_v44  ;;  %v4419_v11 = vpop.f32.mrb[31].mxu1  ;;  %2541 = vmatprep.mubr.bf16.mxu1 %v7788_v18 }
 0x233   :  { %v6935_v14 = vadd.f32 %v4417_v34, %v6808_v19  ;;  %v4420_v50 = vadd.f32 %v4419_v11, %v4418_v4 }
 0x234   :  { %v1120_v49 = vpack.c.bf16 %v1112_v45, %v1111_v22 }
 0x235   :  { %v6941_v2 = vadd.f32 %v4420_v50, %v6808_v19 }
 0x236   :  { %v1003_v47 = vpop.permute.xlu1 %1002  ;;  %2171 = vmatprep.mubr.bf16.mxu0 %v1120_v49 }
 0x237   :  { %v1023_v25 = vmul.f32 %v1003_v47, %v7772_v15  ;;  %v4501_v6 = vpop.f32.mrb[32].mxu1 }
 0x238   :  { %v4502_v33 = vpop.f32.mrb[33].mxu1 }
 0x239   :  { %v1032_v60 = vpack.c.bf16 %v1024_v43, %v1023_v25  ;;  %v4503_v52 = vadd.f32 %v4502_v33, %v4501_v6  ;;  %v4504_v5 = vpop.f32.mrb[34].mxu1  ;;  %2542 = vmatmul.mubr.bf16.vlgmr.msra.gmra.mrb[80].mxu1 %v2294_v3 }
 0x23a   :  { %v4505_v53 = vpop.f32.mrb[35].mxu1  ;;  %4853 = vmatprep.mubr.msk.f32.mxu1 %vm5394_vm2, %v5393_v62 }
 0x23b   :  { %v6948_v19 = vadd.f32 %v4503_v52, %v6835_v29  ;;  %v4506_v32 = vadd.f32 %v4505_v53, %v4504_v5  ;;  %2172 = vmatmul.mubr.bf16.gmra.mrb[76].mxu0 %v1032_v60 }
 0x23c   :  { %4817 = vmatprep.mubr.msk.bf16.mxu0 %vm5394_vm2, %v5393_v62 }
 0x23d   :  { %v6953_v15 = vadd.f32 %v4506_v32, %v6850_v21 }
 0x23f   :  { %v4507_v10 = vpop.f32.mrb[36].mxu1 }
 0x240   :  { %v4467_v30 = vpop.f32.mrb[36].mxu0  ;;  %v4508_v27 = vpop.f32.mrb[37].mxu1 }
 0x241   :  { %v4509_v37 = vadd.f32 %v4508_v27, %v4507_v10  ;;  %v4468_v46 = vpop.f32.mrb[37].mxu0  ;;  %v4510_v34 = vpop.f32.mrb[38].mxu1 }
 0x242   :  { %v4469_v8 = vadd.f32 %v4468_v46, %v4467_v30  ;;  %v4470_v4 = vpop.f32.mrb[38].mxu0  ;;  %v4511_v22 = vpop.f32.mrb[39].mxu1 }
 0x243   :  { %v6956_v29 = vadd.f32 %v4509_v37, %v6877_v36  ;;  %v4512_v44 = vadd.f32 %v4511_v22, %v4510_v34  ;;  %v4471_v45 = vpop.f32.mrb[39].mxu0  ;;  %4818 = vmatmul.mubr.bf16.vlgmr.msra.gmra.mrb[80].mxu0 %v2294_v3 }
 0x244   :  { %v1964_v11 = vadd.f32 %v4469_v8, %v6912_v48  ;;  %v4472_v50 = vadd.f32 %v4471_v45, %v4470_v4  ;;  %2559 = vmatpush1.bf16.msra.mxu0 %v6734_v35  ;;  %2590 = vmatprep.mubr.bf16.mxu0 %v7788_v18 }
 0x245   :  { %v6962_v21 = vadd.f32 %v4512_v44, %v6881_v28  ;;  %2560 = vmatprep.subr.bf16.mxu0 %v6757_v16 }
 0x246   :  { %v1967_v56 = vadd.f32 %v4472_v50, %v6916_v24 }
 0x247   :  { %v4513_v49 = vpop.f32.mrb[40].mxu1 }
 0x248   :  { %v4514_v36 = vpop.f32.mrb[41].mxu1  ;;  %2561 = vmatpush1.bf16.msra.mxu0 %v6752_v39 }
 0x249   :  { %v4515_v26 = vadd.f32 %v4514_v36, %v4513_v49  ;;  %v4516_v47 = vpop.f32.mrb[42].mxu1  ;;  %2562 = vmatprep.subr.bf16.mxu0 %v6766_v59 }
 0x24a   :  { %v4517_v48 = vpop.f32.mrb[43].mxu1 }
 0x24b   :  { %v6969_v35 = vadd.f32 %v4515_v26, %v6890_v54  ;;  %v4518_v55 = vadd.f32 %v4517_v48, %v4516_v47 }
 0x24c   :  { %2563 = vmatpush1.bf16.msra.mxu0 %v6772_v63 }
 0x24d   :  { %v6973_v28 = vadd.f32 %v4518_v55, %v6894_v57  ;;  %2564 = vmatprep.subr.bf16.mxu0 %v6777_v51 }
 0x24f   :  { %v4519_v16 = vpop.f32.mrb[44].mxu1 }
 0x250   :  { %v4520_v24 = vpop.f32.mrb[45].mxu1  ;;  %2565 = vmatpush1.bf16.msra.mxu0 %v6790_v9 }
 0x251   :  { %v4521_v39 = vadd.f32 %v4520_v24, %v4519_v16  ;;  %v4522_v43 = vpop.f32.mrb[46].mxu1  ;;  %2566 = vmatprep.subr.bf16.mxu0 %v6801_v38 }
 0x252   :  { %v4523_v59 = vpop.f32.mrb[47].mxu1 }
 0x253   :  { %v6979_v54 = vadd.f32 %v4521_v39, %v6897_v40  ;;  %v4524_v25 = vadd.f32 %v4523_v59, %v4522_v43 }
 0x254   :  { %2567 = vmatpush1.bf16.msra.mxu0 %v6814_v31 }
 0x255   :  { %v6983_v63 = vadd.f32 %v4524_v25, %v6902_v1  ;;  %2568 = vmatprep.subr.bf16.mxu0 %v6820_v42 }
 0x257   :  { %v4525_v51 = vpop.f32.mrb[48].mxu1 }
 0x258   :  { %v4526_v57 = vpop.f32.mrb[49].mxu1  ;;  %2569 = vmatpush1.bf16.msra.mxu0 %v6833_v41 }
 0x259   :  { %v4527_v9 = vadd.f32 %v4526_v57, %v4525_v51  ;;  %v4528_v6 = vpop.f32.mrb[50].mxu1  ;;  %2570 = vmatprep.subr.bf16.mxu0 %v6841_v17 }
 0x25a   :  { %v4529_v38 = vpop.f32.mrb[51].mxu1 }
 0x25b   :  { %v6989_v40 = vadd.f32 %v4527_v9, %v6923_v23  ;;  %v4530_v3 = vadd.f32 %v4529_v38, %v4528_v6 }
 0x25c   :  { %v4473_v33 = vpop.f32.mrb[40].mxu0  ;;  %2571 = vmatpush1.bf16.msra.mxu0 %v6856_v13 }
 0x25d   :  { %v4474_v31 = vpop.f32.mrb[41].mxu0  ;;  %v6993_v1 = vadd.f32 %v4530_v3, %v6929_v20  ;;  %2572 = vmatprep.subr.bf16.mxu0 %v6865_v7 }
 0x25e   :  { %v4475_v42 = vadd.f32 %v4474_v31, %v4473_v33  ;;  %v4476_v60 = vpop.f32.mrb[42].mxu0 }
 0x25f   :  { %v4477_v41 = vpop.f32.mrb[43].mxu0  ;;  %v4531_v5 = vpop.f32.mrb[52].mxu1 }
 0x260   :  { %v1972_v52 = vadd.f32 %v4475_v42, %v6920_v58  ;;  %v4478_v17 = vadd.f32 %v4477_v41, %v4476_v60  ;;  %v4532_v53 = vpop.f32.mrb[53].mxu1  ;;  %2573 = vmatpush1.bf16.msra.mxu0 %v6875_v61  ;;  %v5395_v60 = vmov 0.0|0.0   ;;  %v2671_v41 = vld [vmem:[%s7600_s19] sm:$0xff] }
 0x261   :  { %v4533_v32 = vadd.f32 %v4532_v53, %v4531_v5  ;;  %v4534_v10 = vpop.f32.mrb[54].mxu1  ;;  %4963 = vmatprep.subr.bf16.mxu1 %v5395_v60 }
 0x262   :  { %v1975_v23 = vadd.f32 %v4478_v17, %v6926_v12  ;;  %v4535_v13 = vpop.f32.mrb[55].mxu1  ;;  %v2674_v17 = vld [vmem:[%s7600_s19 + $0x18] sm:$0xff] }
 0x263   :  { %v6999_v30 = vadd.f32 %v4533_v32, %v1964_v11  ;;  %v4536_v20 = vadd.f32 %v4535_v13, %v4534_v10  ;;  %v2675_v10 = vld [vmem:[%s7600_s19 + $0x20] sm:$0xff]  ;;  %v2676_v13 = vld [vmem:[%s7600_s19 + $0x28] sm:$0xff] }
 0x265   :  { %v7001_v27 = vadd.f32 %v4536_v20, %v1967_v56  ;;  %v7042_v20 = vpack.c.bf16 %v2676_v13, %v2675_v10 }
 0x267   :  { %v4537_v37 = vpop.f32.mrb[56].mxu1 }
 0x268   :  { %v4538_v7 = vpop.f32.mrb[57].mxu1 }
 0x269   :  { %v4539_v46 = vadd.f32 %v4538_v7, %v4537_v37  ;;  %v4540_v34 = vpop.f32.mrb[58].mxu1  ;;  %v2677_v37 = vld [vmem:[%s7600_s19 + $0x30] sm:$0xff]  ;;  %v2678_v7 = vld [vmem:[%s7600_s19 + $0x38] sm:$0xff] }
 0x26a   :  { %v4541_v58 = vpop.f32.mrb[59].mxu1 }
 0x26b   :  { %v7003_v8 = vadd.f32 %v4539_v46, %v1972_v52  ;;  %v4542_v4 = vadd.f32 %v4541_v58, %v4540_v34  ;;  %v2672_v52 = vld [vmem:[%s7600_s19 + $0x8] sm:$0xff]  ;;  %v7052_v58 = vpack.c.bf16 %v2678_v7, %v2677_v37 }
 0x26d   :  { %v7005_v22 = vadd.f32 %v4542_v4, %v1975_v23 }
 0x274   :  { %v4479_v61 = vpop.f32.mrb[44].mxu0 }
 0x275   :  { %v4480_v12 = vpop.f32.mrb[45].mxu0 }
 0x276   :  { %v4481_v44 = vadd.f32 %v4480_v12, %v4479_v61  ;;  %v4482_v45 = vpop.f32.mrb[46].mxu0  ;;  %v2679_v12 = vld [vmem:[%s7600_s19 + $0x40] sm:$0xff] }
 0x277   :  { %v4483_v50 = vpop.f32.mrb[47].mxu0 }
 0x278   :  { %v1980_v11 = vadd.f32 %v4481_v44, %v6935_v14  ;;  %v4484_v49 = vadd.f32 %v4483_v50, %v4482_v45  ;;  %v2680_v44 = vld [vmem:[%s7600_s19 + $0x48] sm:$0xff] }
 0x27a   :  { %v1983_v56 = vadd.f32 %v4484_v49, %v6941_v2  ;;  %v7063_v49 = vpack.c.bf16 %v2680_v44, %v2679_v12 }
 0x282   :  { %v4543_v36 = vpop.f32.mrb[60].mxu1 }
 0x283   :  { %v4544_v26 = vpop.f32.mrb[61].mxu1 }
 0x284   :  { %v4545_v47 = vadd.f32 %v4544_v26, %v4543_v36  ;;  %v4546_v48 = vpop.f32.mrb[62].mxu1  ;;  %v2681_v26 = vld [vmem:[%s7600_s19 + $0x50] sm:$0xff] }
 0x285   :  { %v4547_v55 = vpop.f32.mrb[63].mxu1 }
 0x286   :  { %v7009_v16 = vadd.f32 %v4545_v47, %v1980_v11  ;;  %v4548_v24 = vadd.f32 %v4547_v55, %v4546_v48  ;;  %v2682_v47 = vld [vmem:[%s7600_s19 + $0x58] sm:$0xff] }
 0x288   :  { %v7011_v39 = vadd.f32 %v4548_v24, %v1983_v56 }
 0x28c   :  { %v4565_v43 = vpop.f32.mrb[48].mxu0 }
 0x28d   :  { %v4566_v59 = vpop.f32.mrb[49].mxu0 }
 0x28e   :  { %v4567_v25 = vadd.f32 %v4566_v59, %v4565_v43  ;;  %v4568_v51 = vpop.f32.mrb[50].mxu0  ;;  %v2684_v59 = vld [vmem:[%s7600_s19 + $0x68] sm:$0xff] }
 0x28f   :  { %v4569_v57 = vpop.f32.mrb[51].mxu0 }
 0x290   :  { %v4570_v9 = vadd.f32 %v4569_v57, %v4568_v51  ;;  %v2118_v14 = vadd.f32 %v4567_v25, %v6948_v19  ;;  %v2673_v19 = vld [vmem:[%s7600_s19 + $0x10] sm:$0xff] }
 0x291   :  { %v7031_v23 = vpack.c.bf16 %v2674_v17, %v2673_v19 }
 0x292   :  { %v2121_v2 = vadd.f32 %v4570_v9, %v6953_v15  ;;  %v7025_v15 = vpack.c.bf16 %v2672_v52, %v2671_v41 }
 0x294   :  { %4965 = vmatpush3.bf16.msra.mxu1 %v7025_v15 }
 0x295   :  { %4966 = vmatprep.subr.bf16.mxu1 %v5395_v60 }
 0x298   :  { %4968 = vmatpush3.bf16.msra.mxu1 %v7031_v23 }
 0x299   :  { %v4787_v6 = vpop.f32.mrb[64].mxu1  ;;  %4969 = vmatprep.subr.bf16.mxu1 %v5395_v60 }
 0x29a   :  { %v2214_v38 = vpop.f32.mrb[65].mxu1 }
 0x29b   :  { %v2215_v3 = vadd.f32 %v2214_v38, %v2118_v14  ;;  %v4788_v33 = vpop.f32.mrb[66].mxu1 }
 0x29c   :  { %v2217_v31 = vpop.f32.mrb[67].mxu1  ;;  %4971 = vmatpush3.bf16.msra.mxu1 %v7042_v20 }
 0x29d   :  { %v2218_v42 = vadd.f32 %v2217_v31, %v2121_v2  ;;  %v2277_v5 = vmax.f32 %v2215_v3, 0.0  ;;  %4972 = vmatprep.subr.bf16.mxu1 %v5395_v60  ;;  %v2685_v3 = vld [vmem:[%s7600_s19 + $0x70] sm:$0xff] }
 0x29f   :  { %v2278_v53 = vmax.f32 %v2218_v42, 0.0 }
 0x2a0   :  { %4974 = vmatpush3.bf16.msra.mxu1 %v7052_v58 }
 0x2a1   :  { %v2550_v32 = vpack.c.bf16 %v2278_v53, %v2277_v5  ;;  %4975 = vmatprep.subr.bf16.mxu1 %v5395_v60 }
 0x2a3   :  { %2591 = vmatmul.mubr.bf16.vlgmr.msra.gmra.mrb[84].mxu0 %v2550_v32 }
 0x2a4   :  { %2600 = vmatprep.mubr.bf16.mxu0 %v7788_v18  ;;  %4977 = vmatpush3.bf16.msra.mxu1 %v7063_v49 }
 0x2a5   :  { %4978 = vmatprep.subr.bf16.mxu1 %v5395_v60 }
 0x2a7   :  { %v4571_v46 = vpop.f32.mrb[52].mxu0 }
 0x2a8   :  { %v4572_v34 = vpop.f32.mrb[53].mxu0 }
 0x2a9   :  { %v4573_v4 = vadd.f32 %v4572_v34, %v4571_v46  ;;  %v4574_v61 = vpop.f32.mrb[54].mxu0 }
 0x2aa   :  { %v4575_v45 = vpop.f32.mrb[55].mxu0 }
 0x2ab   :  { %v2126_v50 = vadd.f32 %v4573_v4, %v6956_v29  ;;  %v4576_v11 = vadd.f32 %v4575_v45, %v4574_v61  ;;  %v7074_v29 = vpack.c.bf16 %v2682_v47, %v2681_v26 }
 0x2ad   :  { %v2223_v56 = vadd.f32 %v4787_v6, %v2126_v50  ;;  %v2129_v36 = vadd.f32 %v4576_v11, %v6962_v21  ;;  %v2683_v21 = vld [vmem:[%s7600_s19 + $0x60] sm:$0xff]  ;;  %4980 = vmatpush3.bf16.msra.mxu1 %v7074_v29 }
 0x2ae   :  { %v7084_v2 = vpack.c.bf16 %v2684_v59, %v2683_v21  ;;  %4981 = vmatprep.subr.bf16.mxu1 %v5395_v60 }
 0x2af   :  { %v2226_v48 = vadd.f32 %v4788_v33, %v2129_v36  ;;  %v2279_v55 = vmax.f32 %v2223_v56, 0.0  ;;  %v2686_v33 = vld [vmem:[%s7600_s19 + $0x78] sm:$0xff] }
 0x2b0   :  { %v7097_v42 = vpack.c.bf16 %v2686_v33, %v2685_v3 }
 0x2b1   :  { %v2280_v24 = vmax.f32 %v2226_v48, 0.0  ;;  %v4577_v43 = vpop.f32.mrb[56].mxu0  ;;  %4983 = vmatpush3.bf16.msra.mxu1 %v7084_v2 }
 0x2b2   :  { %v4578_v25 = vpop.f32.mrb[57].mxu0  ;;  %4984 = vmatprep.subr.bf16.mxu1 %v5395_v60 }
 0x2b3   :  { %v4579_v51 = vadd.f32 %v4578_v25, %v4577_v43  ;;  %v4580_v57 = vpop.f32.mrb[58].mxu0  ;;  %v2551_v9 = vpack.c.bf16 %v2280_v24, %v2279_v55 }
 0x2b4   :  { %v4581_v14 = vpop.f32.mrb[59].mxu0 }
 0x2b5   :  { %v4582_v6 = vadd.f32 %v4581_v14, %v4580_v57  ;;  %2601 = vmatmul.mubr.bf16.gmra.mrb[88].mxu0 %v2551_v9  ;;  %v2134_v38 = vadd.f32 %v4579_v51, %v6969_v35  ;;  %4986 = vmatpush3.bf16.msra.mxu1 %v7097_v42 }
 0x2b6   :  { %2610 = vmatprep.mubr.bf16.mxu0 %v7788_v18  ;;  %4988 = vmatprep.subr.bf16.mxu1 %v7025_v15 }
 0x2b7   :  { %v2137_v31 = vadd.f32 %v4582_v6, %v6973_v28 }
 0x2be   :  { %v4791_v35 = vpop.f32.mrb[68].mxu1 }
 0x2bf   :  { %v2230_v41 = vpop.f32.mrb[69].mxu1 }
 0x2c0   :  { %v2231_v52 = vadd.f32 %v2230_v41, %v2134_v38  ;;  %v4792_v19 = vpop.f32.mrb[70].mxu1 }
 0x2c1   :  { %v2233_v17 = vpop.f32.mrb[71].mxu1 }
 0x2c2   :  { %v2234_v5 = vadd.f32 %v2233_v17, %v2137_v31  ;;  %v2281_v53 = vmax.f32 %v2231_v52, 0.0 }
 0x2c4   :  { %v2282_v32 = vmax.f32 %v2234_v5, 0.0 }
 0x2c6   :  { %v2552_v10 = vpack.c.bf16 %v2282_v32, %v2281_v53 }
 0x2c8   :  { %v4583_v28 = vpop.f32.mrb[60].mxu0  ;;  %2611 = vmatmul.mubr.bf16.gmra.mrb[92].mxu0 %v2552_v10 }
 0x2c9   :  { %v4584_v13 = vpop.f32.mrb[61].mxu0  ;;  %2620 = vmatprep.mubr.bf16.mxu0 %v7788_v18 }
 0x2ca   :  { %v4585_v37 = vadd.f32 %v4584_v13, %v4583_v28  ;;  %v4586_v60 = vpop.f32.mrb[62].mxu0 }
 0x2cb   :  { %v4587_v7 = vpop.f32.mrb[63].mxu0 }
 0x2cc   :  { %v2142_v46 = vadd.f32 %v4585_v37, %v6979_v54  ;;  %v4588_v34 = vadd.f32 %v4587_v7, %v4586_v60 }
 0x2ce   :  { %v2239_v4 = vadd.f32 %v4791_v35, %v2142_v46  ;;  %v2145_v61 = vadd.f32 %v4588_v34, %v6983_v63 }
 0x2d0   :  { %v2242_v12 = vadd.f32 %v4792_v19, %v2145_v61  ;;  %v2283_v44 = vmax.f32 %v2239_v4, 0.0 }
 0x2d2   :  { %v2284_v45 = vmax.f32 %v2242_v12, 0.0 }
 0x2d4   :  { %v2553_v50 = vpack.c.bf16 %v2284_v45, %v2283_v44 }
 0x2d6   :  { %v4589_v11 = vpop.f32.mrb[64].mxu0  ;;  %2621 = vmatmul.mubr.bf16.gmra.mrb[96].mxu0 %v2553_v50 }
 0x2d7   :  { %v4590_v56 = vpop.f32.mrb[65].mxu0  ;;  %2630 = vmatprep.mubr.bf16.mxu0 %v7788_v18 }
 0x2d8   :  { %v4591_v36 = vadd.f32 %v4590_v56, %v4589_v11  ;;  %v4592_v26 = vpop.f32.mrb[66].mxu0  ;;  %v7115_v11 = vsub.s32 0, %v6007_v0 }
 0x2d9   :  { %v4593_v47 = vpop.f32.mrb[67].mxu0 }
 0x2da   :  { %v4594_v48 = vadd.f32 %v4593_v47, %v4592_v26  ;;  %v2150_v55 = vadd.f32 %v4591_v36, %v6989_v40 }
 0x2dc   :  { %v2153_v54 = vadd.f32 %v4594_v48, %v6993_v1 }
 0x2df   :  { %v4795_v24 = vpop.f32.mrb[72].mxu1 }
 0x2e0   :  { %v2246_v43 = vpop.f32.mrb[73].mxu1 }
 0x2e1   :  { %v2247_v63 = vadd.f32 %v2246_v43, %v2150_v55  ;;  %v4796_v21 = vpop.f32.mrb[74].mxu1  ;;  %v2311_v43 = vld [vmem:[%s7602_s8] sm:$0x1] }
 0x2e2   :  { %v2249_v59 = vpop.f32.mrb[75].mxu1 }
 0x2e3   :  { %v2250_v25 = vadd.f32 %v2249_v59, %v2153_v54  ;;  %v2285_v51 = vmax.f32 %v2247_v63, 0.0 }
 0x2e5   :  { %v2286_v57 = vmax.f32 %v2250_v25, 0.0 }
 0x2e7   :  { %v2554_v9 = vpack.c.bf16 %v2286_v57, %v2285_v51 }
 0x2e9   :  { %2631 = vmatmul.mubr.bf16.gmra.mrb[100].mxu0 %v2554_v9 }
 0x2ea   :  { %2640 = vmatprep.mubr.bf16.mxu0 %v7788_v18 }
 0x2ed   :  { %v4595_v14 = vpop.f32.mrb[68].mxu0 }
 0x2ee   :  { %v4596_v6 = vpop.f32.mrb[69].mxu0 }
 0x2ef   :  { %v4597_v38 = vadd.f32 %v4596_v6, %v4595_v14  ;;  %v4598_v3 = vpop.f32.mrb[70].mxu0 }
 0x2f0   :  { %v4599_v33 = vpop.f32.mrb[71].mxu0 }
 0x2f1   :  { %v2158_v40 = vadd.f32 %v4597_v38, %v6999_v30  ;;  %v4600_v1 = vadd.f32 %v4599_v33, %v4598_v3 }
 0x2f3   :  { %v2255_v31 = vadd.f32 %v4795_v24, %v2158_v40  ;;  %v2161_v35 = vadd.f32 %v4600_v1, %v7001_v27 }
 0x2f5   :  { %v2258_v41 = vadd.f32 %v4796_v21, %v2161_v35  ;;  %v2287_v52 = vmax.f32 %v2255_v31, 0.0 }
 0x2f7   :  { %v2288_v19 = vmax.f32 %v2258_v41, 0.0  ;;  %v4601_v17 = vpop.f32.mrb[72].mxu0 }
 0x2f8   :  { %v4602_v5 = vpop.f32.mrb[73].mxu0 }
 0x2f9   :  { %v4603_v53 = vadd.f32 %v4602_v5, %v4601_v17  ;;  %v4604_v32 = vpop.f32.mrb[74].mxu0  ;;  %v2555_v10 = vpack.c.bf16 %v2288_v19, %v2287_v52 }
 0x2fa   :  { %v4605_v28 = vpop.f32.mrb[75].mxu0 }
 0x2fb   :  { %v4606_v13 = vadd.f32 %v4605_v28, %v4604_v32  ;;  %2641 = vmatmul.mubr.bf16.gmra.mrb[104].mxu0 %v2555_v10  ;;  %v2166_v37 = vadd.f32 %v4603_v53, %v7003_v8 }
 0x2fc   :  { %2650 = vmatprep.mubr.bf16.mxu0 %v7788_v18 }
 0x2fd   :  { %v2169_v30 = vadd.f32 %v4606_v13, %v7005_v22  ;;  %v2417_v22 = vld [vmem:[%s7601_s10] sm:$0x3] }
 0x2fe   :  { %v7123_v55 = vrot.slane %v2417_v22, %v7115_v11 }
 0x304   :  { %v4799_v60 = vpop.f32.mrb[76].mxu1 }
 0x305   :  { %v2262_v7 = vpop.f32.mrb[77].mxu1 }
 0x306   :  { %v2263_v27 = vadd.f32 %v2262_v7, %v2166_v37  ;;  %v4800_v46 = vpop.f32.mrb[78].mxu1 }
 0x307   :  { %v2265_v34 = vpop.f32.mrb[79].mxu1 }
 0x308   :  { %v2266_v4 = vadd.f32 %v2265_v34, %v2169_v30  ;;  %v2289_v61 = vmax.f32 %v2263_v27, 0.0 }
 0x30a   :  { %v2290_v12 = vmax.f32 %v2266_v4, 0.0 }
 0x30c   :  { %v2556_v44 = vpack.c.bf16 %v2290_v12, %v2289_v61  ;;  %v2543_v45 = vpop.f32.mrb[80].mxu1 }
 0x30d   :  { %v2544_v25 = vadd.f32 %v2543_v45, %v7123_v55 }
 0x30e   :  { %v4607_v50 = vpop.f32.mrb[76].mxu0  ;;  %2651 = vmatmul.mubr.bf16.gmra.mrb[108].mxu0 %v2556_v44 }
 0x30f   :  { %v4608_v8 = vpop.f32.mrb[77].mxu0  ;;  %2660 = vmatprep.mubr.bf16.mxu0 %v7788_v18 }
 0x310   :  { %v4609_v56 = vadd.f32 %v4608_v8, %v4607_v50  ;;  %v4610_v36 = vpop.f32.mrb[78].mxu0 }
 0x311   :  { %v4611_v26 = vpop.f32.mrb[79].mxu0 }
 0x312   :  { %v2174_v47 = vadd.f32 %v4609_v56, %v7009_v16  ;;  %v4612_v48 = vadd.f32 %v4611_v26, %v4610_v36 }
 0x314   :  { %v2271_v54 = vadd.f32 %v4799_v60, %v2174_v47  ;;  %v2177_v24 = vadd.f32 %v4612_v48, %v7011_v39  ;;  %v7138_v39 = vsub.s32 1, %v6007_v0 }
 0x316   :  { %v2274_v63 = vadd.f32 %v4800_v46, %v2177_v24  ;;  %v2394_v21 = vpop.f32.mrb[80].mxu0  ;;  %v2291_v57 = vmax.f32 %v2271_v54, 0.0 }
 0x317   :  { %v2395_v59 = vadd.f32 %v2394_v21, %v2311_v43  ;;  %v4819_v51 = vpop.f32.mrb[81].mxu0 }
 0x318   :  { %v2292_v9 = vmax.f32 %v2274_v63, 0.0  ;;  %v2397_v16 = vpop.f32.mrb[82].mxu0 }
 0x319   :  { %v2400_v14 = vmul.f32 0.17677669, %v2395_v59  ;;  %v4820_v6 = vpop.f32.mrb[83].mxu0 }
 0x31a   :  { %v2557_v38 = vpack.c.bf16 %v2292_v9, %v2291_v57 }
 0x31b   :  { %v2688_v3 = vmul.f32 %v2544_v25, %v2400_v14  ;;  %v7156_v0 = vrot.slane %v2400_v14, %v7115_v11 }
 0x31c   :  { %2661 = vmatmul.mubr.bf16.gmra.mrb[112].mxu0 %v2557_v38 }
 0x31d   :  { %4854 = vmatmul.mubr.f32.vlgmr.msra.gmra.mrb[84].mxu1 %v2688_v3 }
 0x31e   :  { %4990 = vmatpush3.bf16.msra.mxu1 %v7025_v15  ;;  %v7143_v15 = vrot.slane %v2417_v22, %v7138_v39 }
 0x31f   :  { %4992 = vmatprep.subr.bf16.mxu1 %v7031_v23 }
 0x322   :  { %4994 = vmatpush3.bf16.msra.mxu1 %v7031_v23  ;;  %v2545_v23 = vpop.f32.mrb[81].mxu1 }
 0x323   :  { %4996 = vmatprep.subr.bf16.mxu1 %v7042_v20  ;;  %v7147_v33 = vadd.f32 %v2545_v23, %v7143_v15 }
 0x326   :  { %4998 = vmatpush3.bf16.msra.mxu1 %v7042_v20  ;;  %v2547_v20 = vpop.f32.mrb[82].mxu1 }
 0x327   :  { %5000 = vmatprep.subr.bf16.mxu1 %v7052_v58 }
 0x32a   :  { %5002 = vmatpush3.bf16.msra.mxu1 %v7052_v58  ;;  %v2548_v58 = vpop.f32.mrb[83].mxu1 }
 0x32b   :  { %5004 = vmatprep.subr.bf16.mxu1 %v7063_v49 }
 0x32e   :  { %5006 = vmatpush3.bf16.msra.mxu1 %v7063_v49 }
 0x32f   :  { %5008 = vmatprep.subr.bf16.mxu1 %v7074_v29 }
 0x332   :  { %5010 = vmatpush3.bf16.msra.mxu1 %v7074_v29 }
 0x333   :  { %5012 = vmatprep.subr.bf16.mxu1 %v7084_v2 }
 0x336   :  { %5014 = vmatpush3.bf16.msra.mxu1 %v7084_v2 }
 0x337   :  { %5016 = vmatprep.subr.bf16.mxu1 %v7097_v42 }
 0x33a   :  { %5018 = vmatpush3.bf16.msra.mxu1 %v7097_v42 }
 0x33b   :  { %4938 = vmatprep.subr.mxu1 %v5393_v62 }
 0x376   :  { %v2592_v49 = vpop.f32.mrb[84].mxu0 }
 0x377   :  { %v2593_v40 = vadd.f32 %v2592_v49, %v7123_v55  ;;  %v2594_v1 = vpop.f32.mrb[85].mxu0 }
 0x378   :  { %v7160_v29 = vadd.f32 %v2594_v1, %v7143_v15  ;;  %v2596_v31 = vpop.f32.mrb[86].mxu0 }
 0x379   :  { %v2763_v35 = vmul.f32 %v7156_v0, %v2593_v40  ;;  %v2597_v2 = vadd.f32 %v2596_v31, %v7123_v55  ;;  %v2598_v41 = vpop.f32.mrb[87].mxu0 }
 0x37a   :  { %v7165_v42 = vadd.f32 %v2598_v41, %v7143_v15 }
 0x37b   :  { %v2764_v52 = vmul.f32 %v7156_v0, %v2597_v2  ;;  %4888 = vmatprep.mubr.f32.mxu1 %v2763_v35 }
 0x37d   :  { %4889 = vmatmul.mubr.f32.vlgmr.msra.gmra.mrb[86].mxu1 %v2764_v52 }
 0x388   :  { %v2602_v19 = vpop.f32.mrb[88].mxu0 }
 0x389   :  { %v2603_v17 = vadd.f32 %v2602_v19, %v7123_v55  ;;  %v2604_v5 = vpop.f32.mrb[89].mxu0 }
 0x38a   :  { %v7170_v53 = vadd.f32 %v2604_v5, %v7143_v15  ;;  %v2606_v32 = vpop.f32.mrb[90].mxu0 }
 0x38b   :  { %v2765_v10 = vmul.f32 %v7156_v0, %v2603_v17  ;;  %v2607_v28 = vadd.f32 %v2606_v32, %v7123_v55  ;;  %v2608_v13 = vpop.f32.mrb[91].mxu0 }
 0x38c   :  { %v7175_v37 = vadd.f32 %v2608_v13, %v7143_v15 }
 0x38d   :  { %v2766_v30 = vmul.f32 %v7156_v0, %v2607_v28  ;;  %4891 = vmatprep.mubr.f32.mxu1 %v2765_v10 }
 0x38f   :  { %4892 = vmatmul.mubr.f32.gmra.mrb[88].mxu1 %v2766_v30 }
 0x39b   :  { %v2612_v60 = vpop.f32.mrb[92].mxu0 }
 0x39c   :  { %v2613_v7 = vadd.f32 %v2612_v60, %v7123_v55  ;;  %v2614_v27 = vpop.f32.mrb[93].mxu0 }
 0x39d   :  { %v7180_v46 = vadd.f32 %v2614_v27, %v7143_v15  ;;  %v2616_v34 = vpop.f32.mrb[94].mxu0 }
 0x39e   :  { %v2767_v4 = vmul.f32 %v7156_v0, %v2613_v7  ;;  %v2617_v61 = vadd.f32 %v2616_v34, %v7123_v55  ;;  %v2618_v12 = vpop.f32.mrb[95].mxu0 }
 0x39f   :  { %v7185_v44 = vadd.f32 %v2618_v12, %v7143_v15 }
 0x3a0   :  { %v2768_v45 = vmul.f32 %v7156_v0, %v2617_v61  ;;  %4894 = vmatprep.mubr.f32.mxu1 %v2767_v4 }
 0x3a2   :  { %4895 = vmatmul.mubr.f32.gmra.mrb[90].mxu1 %v2768_v45 }
 0x3a9   :  { %v2622_v50 = vpop.f32.mrb[96].mxu0 }
 0x3aa   :  { %v2623_v8 = vadd.f32 %v2622_v50, %v7123_v55  ;;  %v2624_v22 = vpop.f32.mrb[97].mxu0 }
 0x3ab   :  { %v7190_v56 = vadd.f32 %v2624_v22, %v7143_v15  ;;  %v2626_v36 = vpop.f32.mrb[98].mxu0 }
 0x3ac   :  { %v2769_v26 = vmul.f32 %v7156_v0, %v2623_v8  ;;  %v2627_v47 = vadd.f32 %v2626_v36, %v7123_v55  ;;  %v2628_v48 = vpop.f32.mrb[99].mxu0 }
 0x3ad   :  { %v7195_v54 = vadd.f32 %v2628_v48, %v7143_v15 }
 0x3ae   :  { %v2770_v24 = vmul.f32 %v7156_v0, %v2627_v47  ;;  %4897 = vmatprep.mubr.f32.mxu1 %v2769_v26 }
 0x3b0   :  { %4898 = vmatmul.mubr.f32.gmra.mrb[92].mxu1 %v2770_v24 }
 0x3bc   :  { %v2632_v43 = vpop.f32.mrb[100].mxu0 }
 0x3bd   :  { %v2633_v63 = vadd.f32 %v2632_v43, %v7123_v55  ;;  %v2634_v21 = vpop.f32.mrb[101].mxu0 }
 0x3be   :  { %v7200_v59 = vadd.f32 %v2634_v21, %v7143_v15  ;;  %v2636_v25 = vpop.f32.mrb[102].mxu0 }
 0x3bf   :  { %v2771_v51 = vmul.f32 %v7156_v0, %v2633_v63  ;;  %v2637_v57 = vadd.f32 %v2636_v25, %v7123_v55  ;;  %v2638_v9 = vpop.f32.mrb[103].mxu0 }
 0x3c0   :  { %v7205_v16 = vadd.f32 %v2638_v9, %v7143_v15 }
 0x3c1   :  { %v2772_v14 = vmul.f32 %v7156_v0, %v2637_v57  ;;  %4900 = vmatprep.mubr.f32.mxu1 %v2771_v51 }
 0x3c3   :  { %4901 = vmatmul.mubr.f32.gmra.mrb[94].mxu1 %v2772_v14  ;;  %v2687_v14 = vld [vmem:[%s7603_s20] sm:$0xf] }
 0x3c4   :  { %4912 = vmatprep.subr.msk.mxu0 %vm3151_vm4, %v2687_v14  ;;  %4939 = vmatpush3.msk.msra.mxu1 %vm3151_vm4, %v2687_v14 }
 0x3c5   :  { %4913 = vmatpush3.msk.msra.mxu0 %vm3151_vm4, %v2687_v14 }
 0x3c6   :  { %4943 = vmatprep.subr.bf16.mxu0 %v5393_v62 }
 0x3ce   :  { %v2642_v6 = vpop.f32.mrb[104].mxu0 }
 0x3cf   :  { %v2643_v38 = vadd.f32 %v2642_v6, %v7123_v55  ;;  %v2644_v3 = vpop.f32.mrb[105].mxu0 }
 0x3d0   :  { %v7210_v23 = vadd.f32 %v2644_v3, %v7143_v15  ;;  %v2646_v20 = vpop.f32.mrb[106].mxu0 }
 0x3d1   :  { %v2773_v58 = vmul.f32 %v7156_v0, %v2643_v38  ;;  %v2647_v49 = vadd.f32 %v2646_v20, %v7123_v55  ;;  %v2648_v40 = vpop.f32.mrb[107].mxu0 }
 0x3d2   :  { %v7215_v1 = vadd.f32 %v2648_v40, %v7143_v15 }
 0x3d3   :  { %v2774_v31 = vmul.f32 %v7156_v0, %v2647_v49  ;;  %4903 = vmatprep.mubr.f32.mxu1 %v2773_v58 }
 0x3d5   :  { %4904 = vmatmul.mubr.f32.gmra.mrb[96].mxu1 %v2774_v31 }
 0x3e1   :  { %v2652_v35 = vpop.f32.mrb[108].mxu0 }
 0x3e2   :  { %v2653_v2 = vadd.f32 %v2652_v35, %v7123_v55  ;;  %v2654_v41 = vpop.f32.mrb[109].mxu0 }
 0x3e3   :  { %v7220_v52 = vadd.f32 %v2654_v41, %v7143_v15  ;;  %v2656_v19 = vpop.f32.mrb[110].mxu0 }
 0x3e4   :  { %v2775_v17 = vmul.f32 %v7156_v0, %v2653_v2  ;;  %v2657_v5 = vadd.f32 %v2656_v19, %v7123_v55  ;;  %v2658_v32 = vpop.f32.mrb[111].mxu0 }
 0x3e5   :  { %v7225_v10 = vadd.f32 %v2658_v32, %v7143_v15 }
 0x3e6   :  { %v2776_v28 = vmul.f32 %v7156_v0, %v2657_v5  ;;  %4906 = vmatprep.mubr.f32.mxu1 %v2775_v17 }
 0x3e8   :  { %4907 = vmatmul.mubr.f32.gmra.mrb[98].mxu1 %v2776_v28 }
 0x3ef   :  { %v2662_v13 = vpop.f32.mrb[112].mxu0 }
 0x3f0   :  { %v2663_v30 = vadd.f32 %v2662_v13, %v7123_v55  ;;  %v2664_v60 = vpop.f32.mrb[113].mxu0  ;;  %v7229_v7 = vpop.f32.mrb[84].mxu1 }
 0x3f1   :  { %v7232_v27 = vadd.f32 %v2664_v60, %v7143_v15  ;;  %v2666_v34 = vpop.f32.mrb[114].mxu0  ;;  %v4855_v4 = vpop.f32.mrb[85].mxu1 }
 0x3f2   :  { %v2777_v61 = vmul.f32 %v7156_v0, %v2663_v30  ;;  %v2667_v12 = vadd.f32 %v2666_v34, %v7123_v55  ;;  %v2668_v45 = vpop.f32.mrb[115].mxu0 }
 0x3f3   :  { %v7237_v50 = vadd.f32 %v2668_v45, %v7143_v15 }
 0x3f4   :  { %v2778_v8 = vmul.f32 %v7156_v0, %v2667_v12  ;;  %4909 = vmatprep.mubr.f32.mxu1 %v2777_v61 }
 0x3f6   :  { %4910 = vmatmul.mubr.f32.gmra.mrb[100].mxu1 %v2778_v8 }
 0x3f7   :  { %4940 = vmatprep.mubr.msk.f32.mxu1 %vm5394_vm2, %v5393_v62 }
 0x450   :  { %v4890_v22 = vpop.f32.mrb[86].mxu1 }
 0x451   :  { %v2845_v36 = vpop.f32.mrb[87].mxu1  ;;  %v2926_v47 = vsel %vm2924_vm3, %v4890_v22, -inf }
 0x452   :  { %v2925_v24 = vsel %vm2924_vm3, %v2845_v36, -inf }
 0x462   :  { %v4893_v26 = vpop.f32.mrb[88].mxu1 }
 0x463   :  { %v2929_v48 = vsel %vm2924_vm3, %v4893_v26, -inf  ;;  %v2855_v55 = vpop.f32.mrb[89].mxu1 }
 0x464   :  { %v2930_v15 = vmax.f32 %v2926_v47, %v2929_v48  ;;  %v2927_v43 = vsel %vm2924_vm3, %v2855_v55, -inf }
 0x465   :  { %v2928_v0 = vmax.f32 %v2925_v24, %v2927_v43 }
 0x475   :  { %v4896_v63 = vpop.f32.mrb[90].mxu1 }
 0x476   :  { %v2933_v21 = vsel %vm2924_vm3, %v4896_v63, -inf  ;;  %v2865_v25 = vpop.f32.mrb[91].mxu1 }
 0x477   :  { %v2934_v51 = vmax.f32 %v2930_v15, %v2933_v21  ;;  %v2931_v57 = vsel %vm2924_vm3, %v2865_v25, -inf }
 0x478   :  { %v2932_v9 = vmax.f32 %v2928_v0, %v2931_v57 }
 0x483   :  { %v4899_v6 = vpop.f32.mrb[92].mxu1 }
 0x484   :  { %v2937_v38 = vsel %vm2924_vm3, %v4899_v6, -inf  ;;  %v2875_v3 = vpop.f32.mrb[93].mxu1 }
 0x485   :  { %v2938_v20 = vmax.f32 %v2934_v51, %v2937_v38  ;;  %v2935_v58 = vsel %vm2924_vm3, %v2875_v3, -inf }
 0x486   :  { %v2936_v49 = vmax.f32 %v2932_v9, %v2935_v58 }
 0x488   :  { %v2939_v40 = vmax.f32 %v2936_v49, %v2938_v20 }
 0x48a   :  { %v2940_v31 = vrot.slane %v2939_v40, 4 }
 0x48c   :  { %v2941_v35 = vmax.f32 %v2939_v40, %v2940_v31 }
 0x48e   :  { %v2942_v2 = vrot.slane %v2941_v35, 2 }
 0x490   :  { %v2943_v41 = vmax.f32 %v2941_v35, %v2942_v2 }
 0x492   :  { %v2944_v19 = vrot.slane %v2943_v41, 1 }
 0x494   :  { %v2945_v17 = vmax.f32 %v2943_v41, %v2944_v19 }
 0x496   :  { %v2967_v5 = vmax.f32 %v2945_v17, %v7229_v7  ;;  %v7255_v32 = vpop.f32.mrb[94].mxu1 }
 0x497   :  { %v7257_v28 = vpop.f32.mrb[95].mxu1 }
 0x498   :  { %v2972_v13 = vrot.slane %v2967_v5, %v7115_v11  ;;  %v3025_v30 = vsub.f32 %v7229_v7, %v2967_v5  ;;  %v2946_v38 = vsel %vm2924_vm3, %v7257_v28, -inf }
 0x49a   :  { %v2977_v60 = vsub.f32 %v2845_v36, %v2972_v13  ;;  %v2978_v34 = vsub.f32 %v4890_v22, %v2972_v13  ;;  %v2979_v4 = vsub.f32 %v2855_v55, %v2972_v13  ;;  %v2980_v61 = vsub.f32 %v4893_v26, %v2972_v13 }
 0x49b   :  { %v2981_v12 = vsub.f32 %v2865_v25, %v2972_v13  ;;  %v2982_v45 = vsub.f32 %v4896_v63, %v2972_v13  ;;  %v2983_v8 = vsub.f32 %v2875_v3, %v2972_v13  ;;  %v2984_v47 = vsub.f32 %v4899_v6, %v2972_v13 }
 0x49c   :  { %v2993_v48 = vmul.f32 1.442695, %v2977_v60  ;;  %v2995_v24 = vmul.f32 1.442695, %v2978_v34  ;;  %v2997_v15 = vmul.f32 1.442695, %v2979_v4 }
 0x49d   :  { %v2999_v43 = vmul.f32 1.442695, %v2980_v61  ;;  %v3001_v0 = vmul.f32 1.442695, %v2981_v12  ;;  %v3003_v21 = vmul.f32 1.442695, %v2982_v45 }
 0x49e   :  { %5328 = vpow2.f32 %v2993_v48  ;;  %v3005_v51 = vmul.f32 1.442695, %v2983_v8  ;;  %v3007_v22 = vmul.f32 1.442695, %v2984_v47  ;;  %v2947_v25 = vsel %vm2924_vm3, %v7255_v32, -inf }
 0x49f   :  { %5330 = vpow2.f32 %v2995_v24  ;;  %v3027_v8 = vmul.f32 1.442695, %v3025_v30 }
 0x4a0   :  { %5332 = vpow2.f32 %v2997_v15 }
 0x4a1   :  { %5334 = vpow2.f32 %v2999_v43 }
 0x4a2   :  { %5336 = vpow2.f32 %v3001_v0 }
 0x4a3   :  { %5338 = vpow2.f32 %v3003_v21 }
 0x4a4   :  { %5340 = vpow2.f32 %v3005_v51 }
 0x4a5   :  { %5342 = vpow2.f32 %v3007_v22 }
 0x4a6   :  { %5344 = vpow2.f32 %v3027_v8 }
 0x4a8   :  { %v5329_v36 = vpop.eup %5328  ;;  %v7261_v26 = vpop.f32.mrb[96].mxu1 }
 0x4a9   :  { %v5331_v55 = vpop.eup %5330  ;;  %v3031_v63 = vsel %vm2924_vm3, %v5329_v36, 0.0  ;;  %v2950_v57 = vsel %vm2924_vm3, %v7261_v26, -inf  ;;  %v7268_v9 = vpop.f32.mrb[97].mxu1 }
 0x4aa   :  { %v5333_v14 = vpop.eup %5332  ;;  %v3032_v6 = vsel %vm2924_vm3, %v5331_v55, 0.0  ;;  %v2951_v3 = vmax.f32 %v2947_v25, %v2950_v57  ;;  %v2948_v20 = vsel %vm2924_vm3, %v7268_v9, -inf }
 0x4ab   :  { %v5335_v58 = vpop.eup %5334  ;;  %v3033_v49 = vadd.f32 %v3032_v6, %v3031_v63  ;;  %v2949_v40 = vmax.f32 %v2946_v38, %v2948_v20  ;;  %v3034_v31 = vsel %vm2924_vm3, %v5333_v14, 0.0 }
 0x4ac   :  { %v5337_v35 = vpop.eup %5336  ;;  %v3036_v41 = vsel %vm2924_vm3, %v5335_v58, 0.0 }
 0x4ad   :  { %v3035_v2 = vadd.f32 %v3034_v31, %v3033_v49  ;;  %v5339_v19 = vpop.eup %5338  ;;  %v3038_v5 = vsel %vm2924_vm3, %v5337_v35, 0.0 }
 0x4ae   :  { %v5341_v13 = vpop.eup %5340  ;;  %v3040_v34 = vsel %vm2924_vm3, %v5339_v19, 0.0 }
 0x4af   :  { %v3037_v17 = vadd.f32 %v3036_v41, %v3035_v2  ;;  %v5343_v4 = vpop.eup %5342  ;;  %v3042_v12 = vsel %vm2924_vm3, %v5341_v13, 0.0 }
 0x4b0   :  { %v3044_v47 = vsel %vm2924_vm3, %v5343_v4, 0.0  ;;  %v5345_v38 = vpop.eup %5344 }
 0x4b1   :  { %v3039_v60 = vadd.f32 %v3038_v5, %v3037_v17 }
 0x4b3   :  { %v3041_v61 = vadd.f32 %v3040_v34, %v3039_v60 }
 0x4b5   :  { %v3043_v45 = vadd.f32 %v3042_v12, %v3041_v61 }
 0x4b7   :  { %v3045_v48 = vadd.f32 %v3044_v47, %v3043_v45 }
 0x4b9   :  { %v3046_v24 = vrot.slane %v3045_v48, 4 }
 0x4bb   :  { %v3047_v15 = vadd.f32 %v3046_v24, %v3045_v48  ;;  %v7281_v43 = vpop.f32.mrb[98].mxu1 }
 0x4bc   :  { %v2954_v0 = vsel %vm2924_vm3, %v7281_v43, -inf  ;;  %v2905_v21 = vpop.f32.mrb[99].mxu1 }
 0x4bd   :  { %v3048_v51 = vrot.slane %v3047_v15, 2  ;;  %v2955_v22 = vmax.f32 %v2951_v3, %v2954_v0  ;;  %v2952_v63 = vsel %vm2924_vm3, %v2905_v21, -inf }
 0x4be   :  { %v2953_v25 = vmax.f32 %v2949_v40, %v2952_v63 }
 0x4bf   :  { %v3049_v57 = vadd.f32 %v3048_v51, %v3047_v15 }
 0x4c1   :  { %v3050_v6 = vrot.slane %v3049_v57, 1 }
 0x4c3   :  { %v3051_v30 = vadd.f32 %v3050_v6, %v3049_v57 }
 0x4c5   :  { %v3073_v20 = vadd.f32 %v5345_v38, %v3051_v30 }
 0x4c7   :  { %5346 = vrcp.f32 %v3073_v20 }
 0x4c9   :  { %v4911_v49 = vpop.f32.mrb[100].mxu1 }
 0x4ca   :  { %v2958_v31 = vsel %vm2924_vm3, %v4911_v49, -inf  ;;  %v2915_v2 = vpop.f32.mrb[101].mxu1 }
 0x4cb   :  { %v2959_v41 = vmax.f32 %v2955_v22, %v2958_v31  ;;  %v2956_v17 = vsel %vm2924_vm3, %v2915_v2, -inf }
 0x4cc   :  { %v2957_v5 = vmax.f32 %v2953_v25, %v2956_v17 }
 0x4ce   :  { %v2960_v60 = vmax.f32 %v2957_v5, %v2959_v41 }
 0x4d0   :  { %v2961_v34 = vrot.slane %v2960_v60, 4 }
 0x4d1   :  { %v5347_v3 = vpop.eup %5346 }
 0x4d2   :  { %v3080_v61 = vrot.slane %v5347_v3, %v7115_v11  ;;  %v2962_v40 = vmax.f32 %v2960_v60, %v2961_v34  ;;  %v7289_v12 = vmul.f32 %v5347_v3, %v5345_v38 }
 0x4d4   :  { %v2963_v45 = vrot.slane %v2962_v40, 2  ;;  %v3085_v8 = vmul.f32 %v5329_v36, %v3080_v61  ;;  %v3086_v47 = vmul.f32 %v5331_v55, %v3080_v61  ;;  %v3087_v48 = vmul.f32 %v5333_v14, %v3080_v61 }
 0x4d5   :  { %v3088_v24 = vmul.f32 %v5335_v58, %v3080_v61  ;;  %v3089_v15 = vmul.f32 %v5337_v35, %v3080_v61  ;;  %v3090_v0 = vmul.f32 %v5339_v19, %v3080_v61  ;;  %v3091_v51 = vmul.f32 %v5341_v13, %v3080_v61 }
 0x4d6   :  { %v2964_v22 = vmax.f32 %v2962_v40, %v2963_v45  ;;  %4914 = vmatprep.mubr.msk.f32.mxu0 %vm2924_vm3, %v3085_v8  ;;  %v3092_v63 = vmul.f32 %v5343_v4, %v3080_v61 }
 0x4d7   :  { %4915 = vmatmul.mubr.msk.f32.vlgmr.msra.gmra.mrb[116].mxu0 %vm2924_vm3, %v3086_v47 }
 0x4d8   :  { %v2965_v25 = vrot.slane %v2964_v22, 1  ;;  %4917 = vmatprep.mubr.msk.f32.mxu0 %vm2924_vm3, %v3087_v48 }
 0x4da   :  { %v2966_v57 = vmax.f32 %v2964_v22, %v2965_v25 }
 0x4db   :  { %4918 = vmatmul.mubr.msk.f32.gmra.mrb[118].mxu0 %vm2924_vm3, %v3088_v24 }
 0x4dc   :  { %v2968_v36 = vmax.f32 %v2966_v57, %v7229_v7  ;;  %4920 = vmatprep.mubr.msk.f32.mxu0 %vm2924_vm3, %v3089_v15 }
 0x4de   :  { %v2976_v55 = vrot.slane %v2968_v36, %v7115_v11  ;;  %v3026_v14 = vsub.f32 %v7229_v7, %v2968_v36 }
 0x4df   :  { %4921 = vmatmul.mubr.msk.f32.gmra.mrb[120].mxu0 %vm2924_vm3, %v3090_v0 }
 0x4e0   :  { %v2985_v58 = vsub.f32 %v7257_v28, %v2976_v55  ;;  %v2986_v35 = vsub.f32 %v7255_v32, %v2976_v55  ;;  %v2987_v19 = vsub.f32 %v7268_v9, %v2976_v55  ;;  %v2988_v13 = vsub.f32 %v7261_v26, %v2976_v55  ;;  %4923 = vmatprep.mubr.msk.f32.mxu0 %vm2924_vm3, %v3091_v51 }
 0x4e1   :  { %v2989_v4 = vsub.f32 %v2905_v21, %v2976_v55  ;;  %v2990_v6 = vsub.f32 %v7281_v43, %v2976_v55  ;;  %v2991_v30 = vsub.f32 %v2915_v2, %v2976_v55  ;;  %v2992_v38 = vsub.f32 %v4911_v49, %v2976_v55 }
 0x4e2   :  { %v3009_v20 = vmul.f32 1.442695, %v2985_v58  ;;  %v3011_v31 = vmul.f32 1.442695, %v2986_v35  ;;  %v3013_v7 = vmul.f32 1.442695, %v2987_v19 }
 0x4e3   :  { %v3015_v41 = vmul.f32 1.442695, %v2988_v13  ;;  %4924 = vmatmul.mubr.msk.f32.gmra.mrb[122].mxu0 %vm2924_vm3, %v3092_v63  ;;  %v3017_v32 = vmul.f32 1.442695, %v2989_v4  ;;  %v3019_v28 = vmul.f32 1.442695, %v2990_v6 }
 0x4e4   :  { %5348 = vpow2.f32 %v3009_v20  ;;  %v3021_v26 = vmul.f32 1.442695, %v2991_v30  ;;  %v3023_v9 = vmul.f32 1.442695, %v2992_v38  ;;  %v3029_v25 = vmul.f32 1.442695, %v3026_v14 }
 0x4e5   :  { %5350 = vpow2.f32 %v3011_v31 }
 0x4e6   :  { %5352 = vpow2.f32 %v3013_v7 }
 0x4e7   :  { %5354 = vpow2.f32 %v3015_v41 }
 0x4e8   :  { %5356 = vpow2.f32 %v3017_v32 }
 0x4e9   :  { %5358 = vpow2.f32 %v3019_v28 }
 0x4ea   :  { %5360 = vpow2.f32 %v3021_v26 }
 0x4eb   :  { %5362 = vpow2.f32 %v3023_v9 }
 0x4ec   :  { %5364 = vpow2.f32 %v3029_v25  ;;  %v5239_v25 = vld [vmem:[%s7604_s11 + $0x38] sm:$0xff]  }
 0x4ee   :  { %v5349_v43 = vpop.eup %5348 }
 0x4ef   :  { %v5351_v21 = vpop.eup %5350  ;;  %v3052_v49 = vsel %vm2924_vm3, %v5349_v43, 0.0 }
 0x4f0   :  { %v5353_v2 = vpop.eup %5352  ;;  %v3053_v17 = vsel %vm2924_vm3, %v5351_v21, 0.0 }
 0x4f1   :  { %v5355_v5 = vpop.eup %5354  ;;  %v3054_v60 = vadd.f32 %v3053_v17, %v3052_v49  ;;  %v3055_v34 = vsel %vm2924_vm3, %v5353_v2, 0.0 }
 0x4f2   :  { %v5357_v3 = vpop.eup %5356  ;;  %v3057_v40 = vsel %vm2924_vm3, %v5355_v5, 0.0 }
 0x4f3   :  { %v3056_v61 = vadd.f32 %v3055_v34, %v3054_v60  ;;  %v5359_v45 = vpop.eup %5358  ;;  %v3059_v47 = vsel %vm2924_vm3, %v5357_v3, 0.0  ;;  %v5245_v34 = vld [vmem:[%s7605_s13 + $0x14] ss:$8 sps:$4 sm:$0xff]  }
 0x4f4   :  { %v5361_v48 = vpop.eup %5360  ;;  %v3061_v15 = vsel %vm2924_vm3, %v5359_v45, 0.0 }
 0x4f5   :  { %v3058_v8 = vadd.f32 %v3057_v40, %v3056_v61  ;;  %v5363_v0 = vpop.eup %5362  ;;  %v3063_v22 = vsel %vm2924_vm3, %v5361_v48, 0.0  ;;  %v5243_v61 = vld [vmem:[%s7605_s13 + $0x10] ss:$8 sps:$4 sm:$0xff]   ;;  %v5248_v40 = vld [vmem:[%s7605_s13 + $0x24] ss:$8 sps:$4 sm:$0xff]  }
 0x4f6   :  { %v3065_v57 = vsel %vm2924_vm3, %v5363_v0, 0.0  ;;  %v5365_v6 = vpop.eup %5364 }
 0x4f7   :  { %v3060_v24 = vadd.f32 %v3059_v47, %v3058_v8  ;;  %v5246_v8 = vld [vmem:[%s7605_s13 + $0x20] ss:$8 sps:$4 sm:$0xff]   ;;  %v5251_v47 = vld [vmem:[%s7605_s13 + $0x34] ss:$8 sps:$4 sm:$0xff]  }
 0x4f9   :  { %v3062_v51 = vadd.f32 %v3061_v15, %v3060_v24  ;;  %v5249_v24 = vld [vmem:[%s7605_s13 + $0x30] ss:$8 sps:$4 sm:$0xff]   ;;  %v5254_v15 = vld [vmem:[%s7605_s13 + $0x44] ss:$8 sps:$4 sm:$0xff]  }
 0x4fb   :  { %v3064_v63 = vadd.f32 %v3063_v22, %v3062_v51 }
 0x4fd   :  { %v3066_v36 = vadd.f32 %v3065_v57, %v3064_v63  ;;  %v5252_v57 = vld [vmem:[%s7605_s13 + $0x40] ss:$8 sps:$4 sm:$0xff]  }
 0x4ff   :  { %v3067_v55 = vrot.slane %v3066_v36, 4 }
 0x501   :  { %v3068_v58 = vadd.f32 %v3067_v55, %v3066_v36 }
 0x503   :  { %v3069_v35 = vrot.slane %v3068_v58, 2 }
 0x505   :  { %v3070_v19 = vadd.f32 %v3069_v35, %v3068_v58 }
 0x507   :  { %v3071_v13 = vrot.slane %v3070_v19, 1 }
 0x509   :  { %v3072_v4 = vadd.f32 %v3071_v13, %v3070_v19  ;;  %v5255_v19 = vld [vmem:[%s7605_s13 + $0x50] ss:$8 sps:$4 sm:$0xff]  }
 0x50b   :  { %v3074_v30 = vadd.f32 %v5365_v6, %v3072_v4 }
 0x50d   :  { %5366 = vrcp.f32 %v3074_v30 }
 0x517   :  { %v5367_v38 = vpop.eup %5366 }
 0x518   :  { %v3084_v20 = vrot.slane %v5367_v38, %v7115_v11  ;;  %v3102_v31 = vmul.f32 %v5367_v38, %v5365_v6 }
 0x51a   :  { %v3093_v7 = vmul.f32 %v5349_v43, %v3084_v20  ;;  %v3094_v14 = vmul.f32 %v5351_v21, %v3084_v20  ;;  %v3302_v41 = vrot.slane %v3102_v31, 7  ;;  %v3095_v32 = vmul.f32 %v5353_v2, %v3084_v20  ;;  %v5234_v43 = vld [vmem:[%s7604_s11 + $0x10] sm:$0xff]   ;;  %v5235_v21 = vld [vmem:[%s7604_s11 + $0x18] sm:$0xff]   ;;  %v5240_v2 = vld [vmem:[%s7605_s13] ss:$8 sps:$4 sm:$0xff]  }
 0x51b   :  { %v3096_v28 = vmul.f32 %v5355_v5, %v3084_v20  ;;  %v3097_v26 = vmul.f32 %v5357_v3, %v3084_v20  ;;  %v3098_v9 = vmul.f32 %v5359_v45, %v3084_v20  ;;  %v3099_v49 = vmul.f32 %v5361_v48, %v3084_v20  ;;  %v5242_v5 = vld [vmem:[%s7605_s13 + $0x4] ss:$8 sps:$4 sm:$0xff]   ;;  %v5238_v48 = vld [vmem:[%s7604_s11 + $0x30] sm:$0xff]  }
 0x51c   :  { %4926 = vmatprep.mubr.msk.f32.mxu0 %vm2924_vm3, %v3093_v7  ;;  %v3304_v17 = vsel %vm3303_vm5, %v3302_v41, %v7289_v12  ;;  %v3100_v60 = vmul.f32 %v5363_v0, %v3084_v20  ;;  %v5232_v12 = vld [vmem:[%s7604_s11] sm:$0xff]   ;;  %3660 = vmatprep.subr.bf16.mxu1 %v5242_v5  ;;  %v5237_v45 = vld [vmem:[%s7604_s11 + $0x28] sm:$0xff]  }
 0x51d   :  { %4927 = vmatmul.mubr.msk.f32.gmra.mrb[124].mxu0 %vm2924_vm3, %v3094_v14  ;;  %4941 = vmatmul.mubr.msk.f32.vlgmr.msra.gmra.mrb[102].mxu1 %vm2924_vm3, %v3304_v17  ;;  %v5236_v3 = vld [vmem:[%s7604_s11 + $0x20] sm:$0xff]  }
 0x51e   :  { %4929 = vmatprep.mubr.msk.f32.mxu0 %vm2924_vm3, %v3095_v32  ;;  %3692 = vmatprep.mubr.bf16.mxu1 %v7788_v18  ;;  %v5233_v18 = vld [vmem:[%s7604_s11 + $0x8] sm:$0xff]  }
 0x51f   :  { %4944 = vmatpush3.bf16.msra.mxu0 %v5232_v12  ;;  %3661 = vmatpush1.bf16.msra.mxu1 %v5240_v2 }
 0x520   :  { %4945 = vmatprep.subr.bf16.mxu0 %v5393_v62  ;;  %3662 = vmatprep.subr.bf16.mxu1 %v5245_v34 }
 0x521   :  { %4930 = vmatmul.mubr.msk.f32.gmra.mrb[126].mxu0 %vm2924_vm3, %v3096_v28 }
 0x522   :  { %4932 = vmatprep.mubr.msk.f32.mxu0 %vm2924_vm3, %v3097_v26 }
 0x523   :  { %4946 = vmatpush3.bf16.msra.mxu0 %v5233_v18  ;;  %3663 = vmatpush1.bf16.msra.mxu1 %v5243_v61 }
 0x524   :  { %4947 = vmatprep.subr.bf16.mxu0 %v5393_v62  ;;  %3664 = vmatprep.subr.bf16.mxu1 %v5248_v40 }
 0x525   :  { %4933 = vmatmul.mubr.msk.f32.gmra.mrb[128].mxu0 %vm2924_vm3, %v3098_v9 }
 0x526   :  { %4935 = vmatprep.mubr.msk.f32.mxu0 %vm2924_vm3, %v3099_v49 }
 0x527   :  { %4948 = vmatpush3.bf16.msra.mxu0 %v5234_v43  ;;  %3665 = vmatpush1.bf16.msra.mxu1 %v5246_v8 }
 0x528   :  { %4949 = vmatprep.subr.bf16.mxu0 %v5393_v62  ;;  %3666 = vmatprep.subr.bf16.mxu1 %v5251_v47 }
 0x529   :  { %4936 = vmatmul.mubr.msk.f32.gmra.mrb[130].mxu0 %vm2924_vm3, %v3100_v60  ;;  %v3422_v60 = vrot.slane %v7147_v33, %v7115_v11 }
 0x52a   :  { %4959 = vmatprep.mubr.msk.bf16.mxu0 %vm5394_vm2, %v5393_v62 }
 0x52b   :  { %4950 = vmatpush3.bf16.msra.mxu0 %v5235_v21  ;;  %3667 = vmatpush1.bf16.msra.mxu1 %v5249_v24 }
 0x52c   :  { %4951 = vmatprep.subr.bf16.mxu0 %v5393_v62  ;;  %3668 = vmatprep.subr.bf16.mxu1 %v5254_v15 }
 0x52f   :  { %4952 = vmatpush3.bf16.msra.mxu0 %v5236_v3  ;;  %3669 = vmatpush1.bf16.msra.mxu1 %v5252_v57 }
 0x530   :  { %4953 = vmatprep.subr.bf16.mxu0 %v5393_v62 }
 0x533   :  { %4954 = vmatpush3.bf16.msra.mxu0 %v5237_v45 }
 0x534   :  { %4955 = vmatprep.subr.bf16.mxu0 %v5393_v62 }
 0x537   :  { %4956 = vmatpush3.bf16.msra.mxu0 %v5238_v48 }
 0x538   :  { %4957 = vmatprep.subr.bf16.mxu0 %v5393_v62  ;;  %v5260_v62 = vld [vmem:[%s7605_s13 + $0x64] ss:$8 sps:$4 sm:$0xff]  }
 0x53b   :  { %4958 = vmatpush3.bf16.msra.mxu0 %v5239_v25 }
 0x5aa   :  { %v4916_v0 = vpop.f32.mrb[116].mxu0 }
 0x5ab   :  { %v3378_v51 = vmul.f32 %v4916_v0, %v7165_v42  ;;  %v3221_v22 = vpop.f32.mrb[117].mxu0  ;;  %v5257_v42 = vld [vmem:[%s7605_s13 + $0x54] ss:$8 sps:$4 sm:$0xff]  }
 0x5ac   :  { %v3377_v63 = vmul.f32 %v3221_v22, %v7160_v29  ;;  %3670 = vmatprep.subr.bf16.mxu1 %v5257_v42 }
 0x5ad   :  { %3671 = vmatpush1.bf16.msra.mxu1 %v5255_v19 }
 0x5ae   :  { %v3393_v36 = vadd.f32 %v3378_v51, %v3377_v63  ;;  %v4919_v55 = vpop.f32.mrb[118].mxu0  ;;  %3672 = vmatprep.subr.bf16.mxu1 %v5260_v62 }
 0x5af   :  { %v3380_v29 = vmul.f32 %v4919_v55, %v7175_v37  ;;  %v3231_v58 = vpop.f32.mrb[119].mxu0 }
 0x5b0   :  { %v3379_v35 = vmul.f32 %v3231_v58, %v7170_v53  ;;  %v5258_v53 = vld [vmem:[%s7605_s13 + $0x60] ss:$8 sps:$4 sm:$0xff]  }
 0x5b1   :  { %3673 = vmatpush1.bf16.msra.mxu1 %v5258_v53  ;;  %v5269_v53 = vld [vmem:[%s7606_s15 + $0x14] ss:$8 sps:$4 sm:$0xff]  }
 0x5b2   :  { %v3394_v13 = vadd.f32 %v3393_v36, %v3379_v35  ;;  %v4922_v4 = vpop.f32.mrb[120].mxu0 }
 0x5b3   :  { %v3382_v6 = vmul.f32 %v4922_v4, %v7185_v44  ;;  %v3241_v30 = vpop.f32.mrb[121].mxu0 }
 0x5b4   :  { %v3381_v37 = vmul.f32 %v3241_v30, %v7180_v46  ;;  %v3395_v38 = vadd.f32 %v3394_v13, %v3380_v29  ;;  %v5263_v30 = vld [vmem:[%s7605_s13 + $0x74] ss:$8 sps:$4 sm:$0xff]  }
 0x5b5   :  { %3674 = vmatprep.subr.bf16.mxu1 %v5263_v30 }
 0x5b6   :  { %v3396_v20 = vadd.f32 %v3395_v38, %v3381_v37  ;;  %v4925_v31 = vpop.f32.mrb[122].mxu0  ;;  %v5264_v37 = vld [vmem:[%s7606_s15] ss:$8 sps:$4 sm:$0xff]   ;;  %v5266_v38 = vld [vmem:[%s7606_s15 + $0x4] ss:$8 sps:$4 sm:$0xff]  }
 0x5b7   :  { %v3384_v7 = vmul.f32 %v4925_v31, %v7195_v54  ;;  %v3251_v14 = vpop.f32.mrb[123].mxu0  ;;  %3909 = vmatprep.subr.bf16.mxu0 %v5266_v38  ;;  %v5272_v31 = vld [vmem:[%s7606_s15 + $0x24] ss:$8 sps:$4 sm:$0xff]  }
 0x5b8   :  { %v3383_v41 = vmul.f32 %v3251_v14, %v7190_v56  ;;  %v3397_v32 = vadd.f32 %v3396_v20, %v3382_v6  ;;  %v5267_v20 = vld [vmem:[%s7606_s15 + $0x10] ss:$8 sps:$4 sm:$0xff]   ;;  %v5275_v14 = vld [vmem:[%s7606_s15 + $0x34] ss:$8 sps:$4 sm:$0xff]  }
 0x5ba   :  { %v3398_v44 = vadd.f32 %v3397_v32, %v3383_v41  ;;  %v5273_v41 = vld [vmem:[%s7606_s15 + $0x30] ss:$8 sps:$4 sm:$0xff]   ;;  %v5278_v32 = vld [vmem:[%s7606_s15 + $0x44] ss:$8 sps:$4 sm:$0xff]  }
 0x5bc   :  { %v3399_v28 = vadd.f32 %v3398_v44, %v3384_v7  ;;  %v5270_v7 = vld [vmem:[%s7606_s15 + $0x20] ss:$8 sps:$4 sm:$0xff]  }
 0x5bd   :  { %v5276_v44 = vld [vmem:[%s7606_s15 + $0x40] ss:$8 sps:$4 sm:$0xff]  }
 0x5be   :  { %v3400_v26 = vrot.slane %v3399_v28, 4 }
 0x5c0   :  { %v3401_v46 = vadd.f32 %v3400_v26, %v3399_v28  ;;  %v5281_v28 = vld [vmem:[%s7606_s15 + $0x54] ss:$8 sps:$4 sm:$0xff]   ;;  %v5279_v26 = vld [vmem:[%s7606_s15 + $0x50] ss:$8 sps:$4 sm:$0xff]  }
 0x5c2   :  { %v3402_v9 = vrot.slane %v3401_v46, 2 }
 0x5c4   :  { %v3403_v49 = vadd.f32 %v3402_v9, %v3401_v46  ;;  %v5284_v46 = vld [vmem:[%s7606_s15 + $0x64] ss:$8 sps:$4 sm:$0xff]   ;;  %v5282_v9 = vld [vmem:[%s7606_s15 + $0x60] ss:$8 sps:$4 sm:$0xff]  }
 0x5c6   :  { %v3404_v17 = vrot.slane %v3403_v49, 1 }
 0x5c8   :  { %v3405_v54 = vadd.f32 %v3404_v17, %v3403_v49  ;;  %v5287_v49 = vld [vmem:[%s7606_s15 + $0x74] ss:$8 sps:$4 sm:$0xff]   ;;  %v5285_v17 = vld [vmem:[%s7606_s15 + $0x70] ss:$8 sps:$4 sm:$0xff]  }
 0x5f0   :  { %v4928_v12 = vpop.f32.mrb[124].mxu0  ;;  %v3373_v18 = vpop.f32.mrb[102].mxu1 }
 0x5f1   :  { %v3386_v43 = vmul.f32 %v4928_v12, %v7205_v16  ;;  %v3423_v21 = vmul.f32 %v3422_v60, %v3373_v18  ;;  %v3261_v2 = vpop.f32.mrb[125].mxu0  ;;  %v4942_v56 = vpop.f32.mrb[103].mxu1  ;;  %v5290_v60 = vld [vmem:[%s7606_s15 + $0x84] ss:$8 sps:$4 sm:$0xff]   ;;  %v5288_v12 = vld [vmem:[%s7606_s15 + $0x80] ss:$8 sps:$4 sm:$0xff]  }
 0x5f2   :  { %v3385_v5 = vmul.f32 %v3261_v2, %v7200_v59  ;;  %v5293_v18 = vld [vmem:[%s7606_s15 + $0x94] ss:$8 sps:$4 sm:$0xff]   ;;  %v5297_v56 = vld [vmem:[%s7606_s15 + $0xb0] ss:$8 sps:$4 sm:$0xff]  }
 0x5f3   :  { %v3428_v34 = vadd.f32 %v3423_v21, %v3405_v54  ;;  %v5296_v54 = vld [vmem:[%s7606_s15 + $0xa4] ss:$8 sps:$4 sm:$0xff]   ;;  %v5299_v2 = vld [vmem:[%s7606_s15 + $0xb4] ss:$8 sps:$4 sm:$0xff]  }
 0x5f4   :  { %v3406_v3 = vadd.f32 %v3386_v43, %v3385_v5  ;;  %v4931_v61 = vpop.f32.mrb[126].mxu0  ;;  %v5291_v43 = vld [vmem:[%s7606_s15 + $0x90] ss:$8 sps:$4 sm:$0xff]   ;;  %v5302_v5 = vld [vmem:[%s7606_s15 + $0xc4] ss:$8 sps:$4 sm:$0xff]  }
 0x5f5   :  { %v3388_v40 = vmul.f32 %v4931_v61, %v7215_v1  ;;  %v3271_v45 = vpop.f32.mrb[127].mxu0  ;;  %v5303_v61 = vld [vmem:[%s7606_s15 + $0xd0] ss:$8 sps:$4 sm:$0xff]  }
 0x5f6   :  { %v3387_v8 = vmul.f32 %v3271_v45, %v7210_v23 }
 0x5f8   :  { %v3407_v47 = vadd.f32 %v3406_v3, %v3387_v8  ;;  %v4934_v33 = vpop.f32.mrb[128].mxu0  ;;  %v5305_v3 = vld [vmem:[%s7606_s15 + $0xd4] ss:$8 sps:$4 sm:$0xff]  }
 0x5f9   :  { %v3390_v48 = vmul.f32 %v4934_v33, %v7225_v10  ;;  %v3281_v24 = vpop.f32.mrb[129].mxu0  ;;  %v3425_v10 = vrot.slane %v3423_v21, 1  ;;  %v5294_v21 = vld [vmem:[%s7606_s15 + $0xa0] ss:$8 sps:$4 sm:$0xff]  }
 0x5fa   :  { %v3389_v16 = vmul.f32 %v3281_v24, %v7220_v52  ;;  %v3408_v15 = vadd.f32 %v3407_v47, %v3388_v40  ;;  %v3430_v52 = vpack.c.bf16 %v3428_v34, %v3428_v34  ;;  %v5300_v34 = vld [vmem:[%s7606_s15 + $0xc0] ss:$8 sps:$4 sm:$0xff]  }
 0x5fb   :  { %v4267_v40 = vld [vmem:[%s7607_s12] ss:$0 sm:$0xff] }
 0x5fc   :  { %v3409_v0 = vadd.f32 %v3408_v15, %v3389_v16  ;;  %v4937_v51 = vpop.f32.mrb[130].mxu0  ;;  %v3457_v13 = vunpack.c.l.b16 %v3430_v52  ;;  %v5306_v16 = vld [vmem:[%s7606_s15 + $0xe0] ss:$8 sps:$4 sm:$0xff]   ;;  %v5308_v15 = vld [vmem:[%s7606_s15 + $0xe4] ss:$8 sps:$4 sm:$0xff]  }
 0x5fd   :  { %v3392_v59 = vmul.f32 %v4937_v51, %v7237_v50  ;;  %v3291_v22 = vpop.f32.mrb[131].mxu0  ;;  %v5309_v51 = vld [vmem:[%s7606_s15 + $0xf0] ss:$8 sps:$4 sm:$0xff]  }
 0x5fe   :  { %v3391_v63 = vmul.f32 %v3291_v22, %v7232_v27  ;;  %v3410_v25 = vadd.f32 %v3409_v0, %v3390_v48  ;;  %v5261_v27 = vld [vmem:[%s7605_s13 + $0x70] ss:$8 sps:$4 sm:$0xff]   ;;  %v5311_v0 = vld [vmem:[%s7606_s15 + $0xf4] ss:$8 sps:$4 sm:$0xff]   ;;  %v5313_v22 = vld [vmem:[%s7608_s17] sm:$0xff]  }
 0x5ff   :  { %3675 = vmatpush1.bf16.msra.mxu1 %v5261_v27 }
 0x600   :  { %v3411_v1 = vadd.f32 %v3410_v25, %v3391_v63  ;;  %v5314_v63 = vld [vmem:[%s7608_s17 + $0x48] sm:$0xff]  }
 0x601   :  { %v5315_v25 = vld [vmem:[%s7608_s17 + $0x8] sm:$0xff]  }
 0x602   :  { %v3412_v57 = vadd.f32 %v3411_v1, %v3392_v59  ;;  %v5312_v59 = vld [vmem:[%s7608_s17 + $0x40] sm:$0xff]   ;;  %v5316_v1 = vld [vmem:[%s7608_s17 + $0x50] sm:$0xff]  }
 0x603   :  { %4715 = vmatprep.subr.bf16.mxu1 %v5312_v59 }
 0x604   :  { %v3413_v42 = vrot.slane %v3412_v57, 4 }
 0x606   :  { %v3414_v23 = vadd.f32 %v3413_v42, %v3412_v57  ;;  %v5317_v57 = vld [vmem:[%s7608_s17 + $0x10] sm:$0xff]   ;;  %v5318_v42 = vld [vmem:[%s7608_s17 + $0x58] sm:$0xff]  }
 0x608   :  { %v3415_v36 = vrot.slane %v3414_v23, 2 }
 0x60a   :  { %v3416_v55 = vadd.f32 %v3415_v36, %v3414_v23  ;;  %v5319_v23 = vld [vmem:[%s7608_s17 + $0x18] sm:$0xff]   ;;  %v5320_v36 = vld [vmem:[%s7608_s17 + $0x60] sm:$0xff]  }
 0x60c   :  { %v3417_v29 = vrot.slane %v3416_v55, 1 }
 0x60e   :  { %v3418_v58 = vadd.f32 %v3417_v29, %v3416_v55  ;;  %v5321_v55 = vld [vmem:[%s7608_s17 + $0x20] sm:$0xff]   ;;  %v5322_v29 = vld [vmem:[%s7608_s17 + $0x68] sm:$0xff]  }
 0x610   :  { %v3429_v35 = vadd.f32 %v3425_v10, %v3418_v58  ;;  %v5323_v10 = vld [vmem:[%s7608_s17 + $0x28] sm:$0xff]   ;;  %v3568_v58 = vld [vmem:[%s7609_s14] sm:$0x3] }
 0x611   :  { %v3577_v52 = vrot.slane %v3568_v58, %v7138_v39 }
 0x612   :  { %v3431_v19 = vpack.c.bf16 %v3429_v35, %v3429_v35  ;;  %v3573_v35 = vrot.slane %v3568_v58, %v7115_v11 }
 0x614   :  { %v3458_v62 = vunpack.c.l.b16 %v3431_v19 }
 0x616   :  { %v3459_v4 = vrot.slane %v3458_v62, 7 }
 0x618   :  { %v3460_v50 = vsel %vm3303_vm5, %v3459_v4, %v3457_v13 }
 0x619   :  { %v3461_v6 = vpack.c.b16 %v3460_v50, %v3460_v50 }
 0x61b   :  { %4960 = vmatmul.mubr.bf16.vlgmr.msra.gmra.mrb[132].mxu0 %v3461_v6 }
 0x61c   :  { %3910 = vmatpush1.bf16.msra.mxu0 %v5264_v37 }
 0x61d   :  { %3911 = vmatprep.subr.bf16.mxu0 %v5269_v53  ;;  %v5324_v53 = vld [vmem:[%s7608_s17 + $0x70] sm:$0xff]  }
 0x620   :  { %3912 = vmatpush1.bf16.msra.mxu0 %v5267_v20  ;;  %v5325_v20 = vld [vmem:[%s7608_s17 + $0x30] sm:$0xff]  }
 0x621   :  { %3913 = vmatprep.subr.bf16.mxu0 %v5272_v31  ;;  %v5326_v31 = vld [vmem:[%s7608_s17 + $0x78] sm:$0xff]  }
 0x624   :  { %3914 = vmatpush1.bf16.msra.mxu0 %v5270_v7  ;;  %v5327_v7 = vld [vmem:[%s7608_s17 + $0x38] sm:$0xff]  }
 0x625   :  { %3915 = vmatprep.subr.bf16.mxu0 %v5275_v14  ;;  %v3737_v14 = vld [vmem:[%s7610_s16] sm:$0x3] }
 0x628   :  { %3916 = vmatpush1.bf16.msra.mxu0 %v5273_v41  ;;  %v3742_v41 = vrot.slane %v3737_v14, %v7115_v11 }
 0x629   :  { %3917 = vmatprep.subr.bf16.mxu0 %v5278_v32  ;;  %v3746_v32 = vrot.slane %v3737_v14, %v7138_v39 }
 0x62c   :  { %3918 = vmatpush1.bf16.msra.mxu0 %v5276_v44 }
 0x62d   :  { %3919 = vmatprep.subr.bf16.mxu0 %v5281_v28 }
 0x630   :  { %3920 = vmatpush1.bf16.msra.mxu0 %v5279_v26 }
 0x631   :  { %3921 = vmatprep.subr.bf16.mxu0 %v5284_v46 }
 0x634   :  { %3922 = vmatpush1.bf16.msra.mxu0 %v5282_v9 }
 0x635   :  { %3923 = vmatprep.subr.bf16.mxu0 %v5287_v49 }
 0x638   :  { %3924 = vmatpush1.bf16.msra.mxu0 %v5285_v17 }
 0x639   :  { %3925 = vmatprep.subr.bf16.mxu0 %v5290_v60 }
 0x63c   :  { %3926 = vmatpush1.bf16.msra.mxu0 %v5288_v12 }
 0x63d   :  { %3927 = vmatprep.subr.bf16.mxu0 %v5293_v18 }
 0x640   :  { %3928 = vmatpush1.bf16.msra.mxu0 %v5291_v43 }
 0x641   :  { %3929 = vmatprep.subr.bf16.mxu0 %v5296_v54  ;;  %v4324_v54 = vld [vmem:[%s7611_s18] ss:$0 sm:$0xff] }
 0x644   :  { %3930 = vmatpush1.bf16.msra.mxu0 %v5294_v21 }
 0x645   :  { %3931 = vmatprep.subr.bf16.mxu0 %v5299_v2 }
 0x648   :  { %3932 = vmatpush1.bf16.msra.mxu0 %v5297_v56 }
 0x649   :  { %3933 = vmatprep.subr.bf16.mxu0 %v5302_v5 }
 0x64c   :  { %3934 = vmatpush1.bf16.msra.mxu0 %v5300_v34 }
 0x64d   :  { %3935 = vmatprep.subr.bf16.mxu0 %v5305_v3 }
 0x650   :  { %3936 = vmatpush1.bf16.msra.mxu0 %v5303_v61 }
 0x651   :  { %3937 = vmatprep.subr.bf16.mxu0 %v5308_v15 }
 0x654   :  { %3938 = vmatpush1.bf16.msra.mxu0 %v5306_v16 }
 0x655   :  { %3939 = vmatprep.subr.bf16.mxu0 %v5311_v0 }
 0x658   :  { %3940 = vmatpush1.bf16.msra.mxu0 %v5309_v51 }
 0x6ee   :  { %v3545_v45 = vpop.f32.mrb[132].mxu0 }
 0x6ef   :  { %v3546_v8 = vadd.f32 %v4267_v40, %v3545_v45  ;;  %v4961_v47 = vpop.f32.mrb[133].mxu0 }
 0x6f0   :  { %v3548_v33 = vpop.f32.mrb[134].mxu0 }
 0x6f1   :  { %v3551_v48 = vpack.c.bf16 %v3546_v8, %v3546_v8  ;;  %v4962_v24 = vpop.f32.mrb[135].mxu0 }
 0x6f3   :  { %3693 = vmatmul.mubr.bf16.vlgmr.msra.gmra.mrb[104].mxu1 %v3551_v48 }
 0x6f4   :  { %4716 = vmatpush3.bf16.msra.mxu1 %v5313_v22 }
 0x6f5   :  { %4717 = vmatprep.subr.bf16.mxu1 %v5314_v63 }
 0x6f8   :  { %4718 = vmatpush3.bf16.msra.mxu1 %v5315_v25 }
 0x6f9   :  { %4719 = vmatprep.subr.bf16.mxu1 %v5316_v1 }
 0x6fc   :  { %4720 = vmatpush3.bf16.msra.mxu1 %v5317_v57 }
 0x6fd   :  { %4721 = vmatprep.subr.bf16.mxu1 %v5318_v42 }
 0x700   :  { %4722 = vmatpush3.bf16.msra.mxu1 %v5319_v23 }
 0x701   :  { %4723 = vmatprep.subr.bf16.mxu1 %v5320_v36 }
 0x704   :  { %4724 = vmatpush3.bf16.msra.mxu1 %v5321_v55 }
 0x705   :  { %4725 = vmatprep.subr.bf16.mxu1 %v5322_v29 }
 0x708   :  { %4726 = vmatpush3.bf16.msra.mxu1 %v5323_v10 }
 0x709   :  { %4727 = vmatprep.subr.bf16.mxu1 %v5324_v53 }
 0x70c   :  { %4728 = vmatpush3.bf16.msra.mxu1 %v5325_v20 }
 0x70d   :  { %4729 = vmatprep.subr.bf16.mxu1 %v5326_v31 }
 0x710   :  { %4730 = vmatpush3.bf16.msra.mxu1 %v5327_v7 }
 0x7c6   :  { %v3694_v19 = vpop.f32.mrb[104].mxu1 }
 0x7c7   :  { %v3695_v62 = vadd.f32 %v3694_v19, %v3573_v35  ;;  %v3696_v13 = vpop.f32.mrb[105].mxu1 }
 0x7c8   :  { %v3697_v4 = vadd.f32 %v3696_v13, %v3577_v52  ;;  %v3698_v50 = vpop.f32.mrb[106].mxu1 }
 0x7c9   :  { %v3701_v6 = vmax.f32 %v3695_v62, 0.0  ;;  %v3699_v27 = vpop.f32.mrb[107].mxu1 }
 0x7ca   :  { %v3702_v30 = vmax.f32 %v3697_v4, 0.0 }
 0x7cb   :  { %v3703_v38 = vpack.c.bf16 %v3701_v6, %v3701_v6 }
 0x7cc   :  { %v3704_v37 = vpack.c.bf16 %v3702_v30, %v3702_v30 }
 0x7ce   :  { %3941 = vmatprep.mubr.bf16.mxu0 %v3704_v37 }
 0x7cf   :  { %3942 = vmatmul.mubr.bf16.vlgmr.msra.gmra.mrb[136].mxu0 %v3703_v38 }
 0x8a2   :  { %v3943_v44 = vpop.f32.mrb[136].mxu0 }
 0x8a3   :  { %v3944_v28 = vadd.f32 %v3943_v44, %v3742_v41  ;;  %v3945_v26 = vpop.f32.mrb[137].mxu0 }
 0x8a4   :  { %v3946_v46 = vadd.f32 %v3945_v26, %v3746_v32  ;;  %v3947_v9 = vpop.f32.mrb[138].mxu0 }
 0x8a5   :  { %v3950_v49 = vmax.f32 %v3944_v28, 0.0  ;;  %v3948_v17 = vpop.f32.mrb[139].mxu0 }
 0x8a6   :  { %v3951_v60 = vmax.f32 %v3946_v46, 0.0 }
 0x8a7   :  { %v3952_v18 = vpack.c.bf16 %v3950_v49, %v3950_v49 }
 0x8a8   :  { %v3953_v12 = vpack.c.bf16 %v3951_v60, %v3951_v60 }
 0x8aa   :  { %4121 = vmatprep.mubr.bf16.mxu1 %v3953_v12 }
 0x8ab   :  { %4122 = vmatmul.mubr.bf16.vlgmr.msra.gmra.mrb[108].mxu1 %v3952_v18 }
 0x97e   :  { %v4731_v43 = vpop.f32.mrb[108].mxu1 }
 0x97f   :  { %v4732_v11 = vpop.f32.mrb[109].mxu1 }
 0x980   :  { %v4733_v21 = vadd.f32 %v4732_v11, %v4731_v43  ;;  %v4734_v39 = vpop.f32.mrb[110].mxu1 }
 0x981   :  { %v4735_v2 = vpop.f32.mrb[111].mxu1 }
 0x982   :  { %v4124_v56 = vadd.f32 %v4733_v21, %v4324_v54 }
 0x984   :  { %4129 = vst [vmem:[%s7612_s21] sm:$0x3] %v4124_v56 }

</bundles_post_ra>
